<compile_context>
chip_gen: v7x
topology: tpu7x:2x2x1
jax: 0.10.0
libtpu: 0.0.40
codegen_flags: <defaults>
</compile_context>

<pallas_src>
import math
from functools import partial

import jax
import jax.numpy as jnp
from jax.experimental import pallas as pl
from jax.experimental.pallas import tpu as pltpu  # noqa: F401  (TPU backend)

HIDDEN = 128
IN_FEAT = 7
BN_EPS = 1e-5


# ---------------------------------------------------------------------------
# Fused per-layer kernel:
#   select(perm) -> GCNConv -> Linear -> ReLU -> BatchNorm1d(train)
#   -> SAGPool score = tanh(GraphConv) -> x * score
# Outputs: scaled features [K,H], score row [1,K], selected adjacency [K,K].
# ---------------------------------------------------------------------------
def gcn_sag_layer_kernel(perm_col_ref, perm_row_ref, adj_ref, x_ref,
                         wc_ref, bc_ref, wf_ref, bf_ref,
                         gamma_ref, beta_ref, w2_ref, brel_ref,
                         h_ref, score_ref, adj_out_ref):
    k = adj_out_ref.shape[0]
    n_prev = adj_ref.shape[0]

    # --- SAGPool gather from the previous layer, fused as one-hot matmuls ---
    # P[i, j]  = (j == perm[i])  -> P @ X = X[perm],  P @ A @ P^T = A[perm][:, perm]
    cols = jax.lax.broadcasted_iota(jnp.int32, (k, n_prev), 1)
    rows = jax.lax.broadcasted_iota(jnp.int32, (n_prev, k), 0)
    p_sel = (cols == perm_col_ref[...]).astype(jnp.float32)      # [k, n_prev]
    p_sel_t = (rows == perm_row_ref[...]).astype(jnp.float32)    # [n_prev, k]

    x = jnp.dot(p_sel, x_ref[...], preferred_element_type=jnp.float32)     # [k, Fin]
    adj = jnp.dot(jnp.dot(p_sel, adj_ref[...], preferred_element_type=jnp.float32),
                  p_sel_t, preferred_element_type=jnp.float32)             # [k, k]
    adj_out_ref[...] = adj

    # --- GCNConv: D^{-1/2}(A+I)D^{-1/2} @ (X Wc) + bc, norm folded into [k,H] ---
    deg = jnp.sum(adj, axis=1, keepdims=True) + 1.0               # self-loop degree
    dinv = jax.lax.rsqrt(deg)                                      # [k, 1]
    xw = jnp.dot(x, wc_ref[...], preferred_element_type=jnp.float32)        # [k, H]
    y = dinv * xw
    h = dinv * (jnp.dot(adj, y, preferred_element_type=jnp.float32) + y) + bc_ref[...]

    # --- Linear + ReLU + BatchNorm1d (training mode, biased variance) ---
    h = jnp.dot(h, wf_ref[...], preferred_element_type=jnp.float32) + bf_ref[...]
    h = jnp.maximum(h, 0.0)
    mean = jnp.mean(h, axis=0, keepdims=True)
    var = jnp.mean((h - mean) * (h - mean), axis=0, keepdims=True)
    h = (h - mean) * jax.lax.rsqrt(var + BN_EPS) * gamma_ref[...] + beta_ref[...]
    # TODO(synk): BatchNorm1d running statistics are not tracked (train-mode batch stats only).

    # --- SAGPool score = tanh(GraphConv(h, adj)) as two tiny matmuls ---
    # w2 = [wroot | wrel]  ([H, 2]);  s_i = h_i.wroot + (sum_j A_ij h_j).wrel + b
    hw2 = jnp.dot(h, w2_ref[...], preferred_element_type=jnp.float32)       # [k, 2]
    aw2 = jnp.dot(adj, hw2, preferred_element_type=jnp.float32)             # [k, 2]
    s = hw2[:, 0:1] + aw2[:, 1:2] + brel_ref[...]
    ts = jnp.tanh(s)                                                         # [k, 1]

    # scaled node features for the next layer (selection happens there)
    h_ref[...] = h * ts

    # emit the score as a lane row (1, k) without a transpose:
    # diag-mask the column and reduce over sublanes.
    ri = jax.lax.broadcasted_iota(jnp.int32, (k, k), 0)
    ci = jax.lax.broadcasted_iota(jnp.int32, (k, k), 1)
    score_ref[...] = jnp.sum(jnp.where(ri == ci, ts, 0.0), axis=0, keepdims=True)


def gcn_sag_layer(perm_col, perm_row, adj, x, p, k_sel):
    args = (perm_col, perm_row, adj, x, p["wc"], p["bc"], p["wf"], p["bf"],
            p["gamma"], p["beta"], p["w2"], p["brel"])
    out_shape = (
        jax.ShapeDtypeStruct((k_sel, HIDDEN), jnp.float32),   # h * tanh(score)
        jax.ShapeDtypeStruct((1, k_sel), jnp.float32),        # score (lane row)
        jax.ShapeDtypeStruct((k_sel, k_sel), jnp.float32),    # selected adjacency
    )
    return pl.pallas_call(
        gcn_sag_layer_kernel,
        out_shape=out_shape,
        grid=(1,),
        in_specs=[pl.BlockSpec(a.shape, lambda i, nd=a.ndim: (0,) * nd)
                  for a in args],
        out_specs=tuple(pl.BlockSpec(s.shape, lambda i, nd=len(s.shape): (0,) * nd)
                        for s in out_shape),
    )(*args)


# ---------------------------------------------------------------------------
# Parameter init (deterministic, synthetic)
# ---------------------------------------------------------------------------
def init_layer(key, in_dim):
    ks = jax.random.split(key, 4)
    return dict(
        wc=jax.random.normal(ks[0], (in_dim, HIDDEN), jnp.float32) * 0.1,
        bc=jnp.zeros((1, HIDDEN), jnp.float32),          # GCNConv bias init = 0
        wf=jax.random.normal(ks[1], (HIDDEN, HIDDEN), jnp.float32) * 0.1,
        bf=jax.random.normal(ks[2], (1, HIDDEN), jnp.float32) * 0.1,
        gamma=jnp.ones((1, HIDDEN), jnp.float32),        # BatchNorm1d default init
        beta=jnp.zeros((1, HIDDEN), jnp.float32),
        w2=jax.random.normal(ks[3], (HIDDEN, 2), jnp.float32) * 0.1,  # [wroot | wrel]
        brel=jnp.zeros((1, 1), jnp.float32),
    )


# ---------------------------------------------------------------------------
# Forward: 4 fused layer kernels; only per-graph top-k + final mean stay in JAX.
# ---------------------------------------------------------------------------
@partial(jax.jit, static_argnames=("num_graphs", "nodes_per_graph"))
def gcn_forward(x, adj, layers, num_graphs, nodes_per_graph):
    n = x.shape[0]
    h, a = x, adj
    perm = jnp.arange(n, dtype=jnp.int32)        # layer-1 "selection" = identity
    npg = nodes_per_graph
    for p in layers:
        k_sel = perm.shape[0]
        h, score, a = gcn_sag_layer(perm.reshape(-1, 1), perm.reshape(1, -1),
                                    a, h, p, k_sel)
        # SAGPooling top-k (ratio = 0.5), per graph, descending score
        kk = math.ceil(0.5 * npg)
        _, order = jax.lax.top_k(score.reshape(num_graphs, npg), kk)
        perm = (order + (jnp.arange(num_graphs, dtype=jnp.int32) * npg)[:, None]
                ).reshape(-1).astype(jnp.int32)
        npg = kk
    # final SAGPool selection + global_mean_pool (graphs contiguous, equal counts)
    return h[perm].reshape(num_graphs, npg, HIDDEN).mean(axis=1)


if __name__ == "__main__":
    key = jax.random.PRNGKey(0)
    nodes_per_graph = 16
    num_graphs = 2
    n_total = nodes_per_graph * num_graphs

    # node features
    key, k_x = jax.random.split(key)
    x = jax.random.normal(k_x, (n_total, IN_FEAT), jnp.float32)

    # block-diagonal undirected adjacency: ring + chord(+5) within each graph
    def graph_adj(n):
        i = jnp.arange(n)
        a = jnp.zeros((n, n), jnp.float32)
        for off in (1, 5):
            a = a.at[i, (i + off) % n].set(1.0)
            a = a.at[(i + off) % n, i].set(1.0)
        return a

    ga = graph_adj(nodes_per_graph)
    adj = jax.scipy.linalg.block_diag(*([ga] * num_graphs)).astype(jnp.float32)

    layers = []
    in_dim = IN_FEAT
    for _ in range(4):
        key, sub = jax.random.split(key)
        layers.append(init_layer(sub, in_dim))
        in_dim = HIDDEN

    out = gcn_forward(x, adj, layers, num_graphs, nodes_per_graph)
    out = jax.block_until_ready(out)
    assert out.shape == (num_graphs, HIDDEN)
    assert bool(jnp.all(jnp.isfinite(out)))
    print("KERNEL_OK")
</pallas_src>

<mosaic_0001>
module attributes {stable_mosaic.version = 11 : i64} {
  func.func @gcn_sag_layer_kernel(%arg0: i32, %arg1: memref<32x1xi32, #tpu.memory_space<vmem>>, %arg2: memref<1x32xi32, #tpu.memory_space<vmem>>, %arg3: memref<32x32xf32, #tpu.memory_space<vmem>>, %arg4: memref<32x7xf32, #tpu.memory_space<vmem>>, %arg5: memref<7x128xf32, #tpu.memory_space<vmem>>, %arg6: memref<1x128xf32, #tpu.memory_space<vmem>>, %arg7: memref<128x128xf32, #tpu.memory_space<vmem>>, %arg8: memref<1x128xf32, #tpu.memory_space<vmem>>, %arg9: memref<1x128xf32, #tpu.memory_space<vmem>>, %arg10: memref<1x128xf32, #tpu.memory_space<vmem>>, %arg11: memref<128x2xf32, #tpu.memory_space<vmem>>, %arg12: memref<1x1xf32, #tpu.memory_space<vmem>>, %arg13: memref<32x128xf32, #tpu.memory_space<vmem>>, %arg14: memref<1x32xf32, #tpu.memory_space<vmem>>, %arg15: memref<32x32xf32, #tpu.memory_space<vmem>>) attributes {dimension_semantics = [#tpu.dimension_semantics<arbitrary>], iteration_bounds = array<i64: 1>, scalar_prefetch = 0 : i64, scratch_operands = 0 : i64, tpu.core_type = #tpu.core_type<tc>, window_params = [{pipeline_mode = #tpu.pipeline_mode<synchronous>, transform_indices = @transform_0, window_bounds = array<i64: 32, 1>}, {pipeline_mode = #tpu.pipeline_mode<synchronous>, transform_indices = @transform_1, window_bounds = array<i64: 1, 32>}, {pipeline_mode = #tpu.pipeline_mode<synchronous>, transform_indices = @transform_2, window_bounds = array<i64: 32, 32>}, {pipeline_mode = #tpu.pipeline_mode<synchronous>, transform_indices = @transform_3, window_bounds = array<i64: 32, 7>}, {pipeline_mode = #tpu.pipeline_mode<synchronous>, transform_indices = @transform_4, window_bounds = array<i64: 7, 128>}, {pipeline_mode = #tpu.pipeline_mode<synchronous>, transform_indices = @transform_5, window_bounds = array<i64: 1, 128>}, {pipeline_mode = #tpu.pipeline_mode<synchronous>, transform_indices = @transform_6, window_bounds = array<i64: 128, 128>}, {pipeline_mode = #tpu.pipeline_mode<synchronous>, transform_indices = @transform_7, window_bounds = array<i64: 1, 128>}, {pipeline_mode = #tpu.pipeline_mode<synchronous>, transform_indices = @transform_8, window_bounds = array<i64: 1, 128>}, {pipeline_mode = #tpu.pipeline_mode<synchronous>, transform_indices = @transform_9, window_bounds = array<i64: 1, 128>}, {pipeline_mode = #tpu.pipeline_mode<synchronous>, transform_indices = @transform_10, window_bounds = array<i64: 128, 2>}, {pipeline_mode = #tpu.pipeline_mode<synchronous>, transform_indices = @transform_11, window_bounds = array<i64: 1, 1>}, {pipeline_mode = #tpu.pipeline_mode<synchronous>, transform_indices = @transform_12, window_bounds = array<i64: 32, 128>}, {pipeline_mode = #tpu.pipeline_mode<synchronous>, transform_indices = @transform_13, window_bounds = array<i64: 1, 32>}, {pipeline_mode = #tpu.pipeline_mode<synchronous>, transform_indices = @transform_14, window_bounds = array<i64: 32, 32>}]} {
    %0 = tpu.iota {dimensions = array<i32: 1>} : vector<32x32xi32>
    %1 = tpu.iota {dimensions = array<i32: 0>} : vector<32x32xi32>
    %c0 = arith.constant 0 : index
    %c0_0 = arith.constant 0 : index
    %2 = vector.load %arg1[%c0, %c0_0] : memref<32x1xi32, #tpu.memory_space<vmem>>, vector<32x1xi32>
    %3 = vector.broadcast %2 : vector<32x1xi32> to vector<32x32xi32>
    %4 = arith.cmpi eq, %0, %3 : vector<32x32xi32>
    %5 = arith.extui %4 : vector<32x32xi1> to vector<32x32xi32>
    %6 = arith.sitofp %5 : vector<32x32xi32> to vector<32x32xf32>
    %c0_1 = arith.constant 0 : index
    %c0_2 = arith.constant 0 : index
    %7 = vector.load %arg2[%c0_1, %c0_2] : memref<1x32xi32, #tpu.memory_space<vmem>>, vector<1x32xi32>
    %8 = vector.broadcast %7 : vector<1x32xi32> to vector<32x32xi32>
    %9 = arith.cmpi eq, %1, %8 : vector<32x32xi32>
    %10 = arith.extui %9 : vector<32x32xi1> to vector<32x32xi32>
    %11 = arith.sitofp %10 : vector<32x32xi32> to vector<32x32xf32>
    %c0_3 = arith.constant 0 : index
    %c0_4 = arith.constant 0 : index
    %12 = vector.load %arg4[%c0_3, %c0_4] : memref<32x7xf32, #tpu.memory_space<vmem>>, vector<32x7xf32>
    %cst = arith.constant dense<0.000000e+00> : vector<32x7xf32>
    %13 = tpu.matmul %6, %12, %cst {dimension_numbers = #tpu.dot_dimension_numbers<[1], [0], [0], [1], [0, 0, 1, 1], [], []>} : vector<32x32xf32>, vector<32x7xf32>, vector<32x7xf32> -> vector<32x7xf32>
    %c0_5 = arith.constant 0 : index
    %c0_6 = arith.constant 0 : index
    %14 = vector.load %arg3[%c0_5, %c0_6] : memref<32x32xf32, #tpu.memory_space<vmem>>, vector<32x32xf32>
    %cst_7 = arith.constant dense<0.000000e+00> : vector<32x32xf32>
    %15 = tpu.matmul %6, %14, %cst_7 {dimension_numbers = #tpu.dot_dimension_numbers<[1], [0], [0], [1], [0, 0, 1, 1], [], []>} : vector<32x32xf32>, vector<32x32xf32>, vector<32x32xf32> -> vector<32x32xf32>
    %cst_8 = arith.constant dense<0.000000e+00> : vector<32x32xf32>
    %16 = tpu.matmul %15, %11, %cst_8 {dimension_numbers = #tpu.dot_dimension_numbers<[1], [0], [0], [1], [0, 0, 1, 1], [], []>} : vector<32x32xf32>, vector<32x32xf32>, vector<32x32xf32> -> vector<32x32xf32>
    %c0_9 = arith.constant 0 : index
    %c0_10 = arith.constant 0 : index
    %17 = vector.load %arg15[%c0_9, %c0_10] : memref<32x32xf32, #tpu.memory_space<vmem>>, vector<32x32xf32>
    tpu.vector_store %arg15[%c0_9, %c0_10], %16 {strides = array<i32>} : memref<32x32xf32, #tpu.memory_space<vmem>>, vector<32x32xf32>,
    %cst_11 = arith.constant dense<0.000000e+00> : vector<32xf32>
    %18 = vector.multi_reduction <add>, %16, %cst_11 [1] : vector<32x32xf32> to vector<32xf32>
    %19 = vector.shape_cast %18 : vector<32xf32> to vector<32x1xf32>
    %cst_12 = arith.constant 1.000000e+00 : f32
    %20 = vector.broadcast %cst_12 : f32 to vector<32x1xf32>
    %21 = arith.addf %19, %20 : vector<32x1xf32>
    %22 = math.rsqrt %21 : vector<32x1xf32>
    %c0_13 = arith.constant 0 : index
    %c0_14 = arith.constant 0 : index
    %23 = vector.load %arg5[%c0_13, %c0_14] : memref<7x128xf32, #tpu.memory_space<vmem>>, vector<7x128xf32>
    %cst_15 = arith.constant dense<0.000000e+00> : vector<32x128xf32>
    %24 = tpu.matmul %13, %23, %cst_15 {dimension_numbers = #tpu.dot_dimension_numbers<[1], [0], [0], [1], [0, 0, 1, 1], [], []>} : vector<32x7xf32>, vector<7x128xf32>, vector<32x128xf32> -> vector<32x128xf32>
    %25 = vector.broadcast %22 : vector<32x1xf32> to vector<32x128xf32>
    %26 = arith.mulf %25, %24 : vector<32x128xf32>
    %cst_16 = arith.constant dense<0.000000e+00> : vector<32x128xf32>
    %27 = tpu.matmul %16, %26, %cst_16 {dimension_numbers = #tpu.dot_dimension_numbers<[1], [0], [0], [1], [0, 0, 1, 1], [], []>} : vector<32x32xf32>, vector<32x128xf32>, vector<32x128xf32> -> vector<32x128xf32>
    %28 = arith.addf %27, %26 : vector<32x128xf32>
    %29 = vector.broadcast %22 : vector<32x1xf32> to vector<32x128xf32>
    %30 = arith.mulf %29, %28 : vector<32x128xf32>
    %c0_17 = arith.constant 0 : index
    %c0_18 = arith.constant 0 : index
    %31 = vector.load %arg6[%c0_17, %c0_18] : memref<1x128xf32, #tpu.memory_space<vmem>>, vector<1x128xf32>
    %32 = vector.broadcast %31 : vector<1x128xf32> to vector<32x128xf32>
    %33 = arith.addf %30, %32 : vector<32x128xf32>
    %c0_19 = arith.constant 0 : index
    %c0_20 = arith.constant 0 : index
    %34 = vector.load %arg7[%c0_19, %c0_20] : memref<128x128xf32, #tpu.memory_space<vmem>>, vector<128x128xf32>
    %cst_21 = arith.constant dense<0.000000e+00> : vector<32x128xf32>
    %35 = tpu.matmul %33, %34, %cst_21 {dimension_numbers = #tpu.dot_dimension_numbers<[1], [0], [0], [1], [0, 0, 1, 1], [], []>} : vector<32x128xf32>, vector<128x128xf32>, vector<32x128xf32> -> vector<32x128xf32>
    %c0_22 = arith.constant 0 : index
    %c0_23 = arith.constant 0 : index
    %36 = vector.load %arg8[%c0_22, %c0_23] : memref<1x128xf32, #tpu.memory_space<vmem>>, vector<1x128xf32>
    %37 = vector.broadcast %36 : vector<1x128xf32> to vector<32x128xf32>
    %38 = arith.addf %35, %37 : vector<32x128xf32>
    %cst_24 = arith.constant 0.000000e+00 : f32
    %39 = vector.broadcast %cst_24 : f32 to vector<32x128xf32>
    %40 = arith.maximumf %38, %39 : vector<32x128xf32>
    %cst_25 = arith.constant dense<0.000000e+00> : vector<128xf32>
    %41 = vector.multi_reduction <add>, %40, %cst_25 [0] : vector<32x128xf32> to vector<128xf32>
    %42 = vector.shape_cast %41 : vector<128xf32> to vector<1x128xf32>
    %cst_26 = arith.constant 3.200000e+01 : f32
    %43 = vector.broadcast %cst_26 : f32 to vector<1x128xf32>
    %44 = arith.divf %42, %43 : vector<1x128xf32>
    %45 = vector.broadcast %44 : vector<1x128xf32> to vector<32x128xf32>
    %46 = arith.subf %40, %45 : vector<32x128xf32>
    %47 = vector.broadcast %44 : vector<1x128xf32> to vector<32x128xf32>
    %48 = arith.subf %40, %47 : vector<32x128xf32>
    %49 = arith.mulf %46, %48 : vector<32x128xf32>
    %cst_27 = arith.constant dense<0.000000e+00> : vector<128xf32>
    %50 = vector.multi_reduction <add>, %49, %cst_27 [0] : vector<32x128xf32> to vector<128xf32>
    %51 = vector.shape_cast %50 : vector<128xf32> to vector<1x128xf32>
    %cst_28 = arith.constant 3.200000e+01 : f32
    %52 = vector.broadcast %cst_28 : f32 to vector<1x128xf32>
    %53 = arith.divf %51, %52 : vector<1x128xf32>
    %54 = vector.broadcast %44 : vector<1x128xf32> to vector<32x128xf32>
    %55 = arith.subf %40, %54 : vector<32x128xf32>
    %cst_29 = arith.constant 9.99999974E-6 : f32
    %56 = vector.broadcast %cst_29 : f32 to vector<1x128xf32>
    %57 = arith.addf %53, %56 : vector<1x128xf32>
    %58 = math.rsqrt %57 : vector<1x128xf32>
    %59 = vector.broadcast %58 : vector<1x128xf32> to vector<32x128xf32>
    %60 = arith.mulf %55, %59 : vector<32x128xf32>
    %c0_30 = arith.constant 0 : index
    %c0_31 = arith.constant 0 : index
    %61 = vector.load %arg9[%c0_30, %c0_31] : memref<1x128xf32, #tpu.memory_space<vmem>>, vector<1x128xf32>
    %62 = vector.broadcast %61 : vector<1x128xf32> to vector<32x128xf32>
    %63 = arith.mulf %60, %62 : vector<32x128xf32>
    %c0_32 = arith.constant 0 : index
    %c0_33 = arith.constant 0 : index
    %64 = vector.load %arg10[%c0_32, %c0_33] : memref<1x128xf32, #tpu.memory_space<vmem>>, vector<1x128xf32>
    %65 = vector.broadcast %64 : vector<1x128xf32> to vector<32x128xf32>
    %66 = arith.addf %63, %65 : vector<32x128xf32>
    %c0_34 = arith.constant 0 : index
    %c0_35 = arith.constant 0 : index
    %67 = vector.load %arg11[%c0_34, %c0_35] : memref<128x2xf32, #tpu.memory_space<vmem>>, vector<128x2xf32>
    %cst_36 = arith.constant dense<0.000000e+00> : vector<32x2xf32>
    %68 = tpu.matmul %66, %67, %cst_36 {dimension_numbers = #tpu.dot_dimension_numbers<[1], [0], [0], [1], [0, 0, 1, 1], [], []>} : vector<32x128xf32>, vector<128x2xf32>, vector<32x2xf32> -> vector<32x2xf32>
    %cst_37 = arith.constant dense<0.000000e+00> : vector<32x2xf32>
    %69 = tpu.matmul %16, %68, %cst_37 {dimension_numbers = #tpu.dot_dimension_numbers<[1], [0], [0], [1], [0, 0, 1, 1], [], []>} : vector<32x32xf32>, vector<32x2xf32>, vector<32x2xf32> -> vector<32x2xf32>
    %70 = vector.extract_strided_slice %68 {offsets = [0, 0], sizes = [32, 1], strides = [1, 1]} : vector<32x2xf32> to vector<32x1xf32>
    %71 = vector.extract_strided_slice %69 {offsets = [0, 1], sizes = [32, 1], strides = [1, 1]} : vector<32x2xf32> to vector<32x1xf32>
    %72 = arith.addf %70, %71 : vector<32x1xf32>
    %c0_38 = arith.constant 0 : index
    %c0_39 = arith.constant 0 : index
    %73 = vector.load %arg12[%c0_38, %c0_39] : memref<1x1xf32, #tpu.memory_space<vmem>>, vector<1x1xf32>
    %74 = vector.broadcast %73 : vector<1x1xf32> to vector<32x1xf32>
    %75 = arith.addf %72, %74 : vector<32x1xf32>
    %76 = math.tanh %75 : vector<32x1xf32>
    %77 = vector.broadcast %76 : vector<32x1xf32> to vector<32x128xf32>
    %78 = arith.mulf %66, %77 : vector<32x128xf32>
    %c0_40 = arith.constant 0 : index
    %c0_41 = arith.constant 0 : index
    %79 = vector.load %arg13[%c0_40, %c0_41] : memref<32x128xf32, #tpu.memory_space<vmem>>, vector<32x128xf32>
    tpu.vector_store %arg13[%c0_40, %c0_41], %78 {strides = array<i32>} : memref<32x128xf32, #tpu.memory_space<vmem>>, vector<32x128xf32>,
    %80 = tpu.iota {dimensions = array<i32: 0>} : vector<32x32xi32>
    %81 = tpu.iota {dimensions = array<i32: 1>} : vector<32x32xi32>
    %82 = arith.cmpi eq, %80, %81 : vector<32x32xi32>
    %cst_42 = arith.constant 0.000000e+00 : f32
    %83 = vector.shape_cast %76 : vector<32x1xf32> to vector<32x1xf32>
    %84 = vector.broadcast %83 : vector<32x1xf32> to vector<32x32xf32>
    %85 = vector.broadcast %cst_42 : f32 to vector<32x32xf32>
    %86 = arith.select %82, %84, %85 : vector<32x32xi1>, vector<32x32xf32>
    %cst_43 = arith.constant dense<0.000000e+00> : vector<32xf32>
    %87 = vector.multi_reduction <add>, %86, %cst_43 [0] : vector<32x32xf32> to vector<32xf32>
    %88 = vector.shape_cast %87 : vector<32xf32> to vector<1x32xf32>
    %c0_44 = arith.constant 0 : index
    %c0_45 = arith.constant 0 : index
    %89 = vector.load %arg14[%c0_44, %c0_45] : memref<1x32xf32, #tpu.memory_space<vmem>>, vector<1x32xf32>
    tpu.vector_store %arg14[%c0_44, %c0_45], %88 {strides = array<i32>} : memref<1x32xf32, #tpu.memory_space<vmem>>, vector<1x32xf32>,
    return
  }
  func.func @transform_0(%arg0: i32) -> (i32, i32) {
    %c0_i32 = arith.constant 0 : i32
    %c0_i32_0 = arith.constant 0 : i32
    %c0_i32_1 = arith.constant 0 : i32
    return %c0_i32, %c0_i32_0 : i32, i32
  }
  func.func @transform_1(%arg0: i32) -> (i32, i32) {
    %c0_i32 = arith.constant 0 : i32
    %c0_i32_0 = arith.constant 0 : i32
    %c0_i32_1 = arith.constant 0 : i32
    return %c0_i32, %c0_i32_0 : i32, i32
  }
  func.func @transform_2(%arg0: i32) -> (i32, i32) {
    %c0_i32 = arith.constant 0 : i32
    %c0_i32_0 = arith.constant 0 : i32
    %c0_i32_1 = arith.constant 0 : i32
    return %c0_i32, %c0_i32_0 : i32, i32
  }
  func.func @transform_3(%arg0: i32) -> (i32, i32) {
    %c0_i32 = arith.constant 0 : i32
    %c0_i32_0 = arith.constant 0 : i32
    %c0_i32_1 = arith.constant 0 : i32
    return %c0_i32, %c0_i32_0 : i32, i32
  }
  func.func @transform_4(%arg0: i32) -> (i32, i32) {
    %c0_i32 = arith.constant 0 : i32
    %c0_i32_0 = arith.constant 0 : i32
    %c0_i32_1 = arith.constant 0 : i32
    return %c0_i32, %c0_i32_0 : i32, i32
  }
  func.func @transform_5(%arg0: i32) -> (i32, i32) {
    %c0_i32 = arith.constant 0 : i32
    %c0_i32_0 = arith.constant 0 : i32
    %c0_i32_1 = arith.constant 0 : i32
    return %c0_i32, %c0_i32_0 : i32, i32
  }
  func.func @transform_6(%arg0: i32) -> (i32, i32) {
    %c0_i32 = arith.constant 0 : i32
    %c0_i32_0 = arith.constant 0 : i32
    %c0_i32_1 = arith.constant 0 : i32
    return %c0_i32, %c0_i32_0 : i32, i32
  }
  func.func @transform_7(%arg0: i32) -> (i32, i32) {
    %c0_i32 = arith.constant 0 : i32
    %c0_i32_0 = arith.constant 0 : i32
    %c0_i32_1 = arith.constant 0 : i32
    return %c0_i32, %c0_i32_0 : i32, i32
  }
  func.func @transform_8(%arg0: i32) -> (i32, i32) {
    %c0_i32 = arith.constant 0 : i32
    %c0_i32_0 = arith.constant 0 : i32
    %c0_i32_1 = arith.constant 0 : i32
    return %c0_i32, %c0_i32_0 : i32, i32
  }
  func.func @transform_9(%arg0: i32) -> (i32, i32) {
    %c0_i32 = arith.constant 0 : i32
    %c0_i32_0 = arith.constant 0 : i32
    %c0_i32_1 = arith.constant 0 : i32
    return %c0_i32, %c0_i32_0 : i32, i32
  }
  func.func @transform_10(%arg0: i32) -> (i32, i32) {
    %c0_i32 = arith.constant 0 : i32
    %c0_i32_0 = arith.constant 0 : i32
    %c0_i32_1 = arith.constant 0 : i32
    return %c0_i32, %c0_i32_0 : i32, i32
  }
  func.func @transform_11(%arg0: i32) -> (i32, i32) {
    %c0_i32 = arith.constant 0 : i32
    %c0_i32_0 = arith.constant 0 : i32
    %c0_i32_1 = arith.constant 0 : i32
    return %c0_i32, %c0_i32_0 : i32, i32
  }
  func.func @transform_12(%arg0: i32) -> (i32, i32) {
    %c0_i32 = arith.constant 0 : i32
    %c0_i32_0 = arith.constant 0 : i32
    %c0_i32_1 = arith.constant 0 : i32
    return %c0_i32, %c0_i32_0 : i32, i32
  }
  func.func @transform_13(%arg0: i32) -> (i32, i32) {
    %c0_i32 = arith.constant 0 : i32
    %c0_i32_0 = arith.constant 0 : i32
    %c0_i32_1 = arith.constant 0 : i32
    return %c0_i32, %c0_i32_0 : i32, i32
  }
  func.func @transform_14(%arg0: i32) -> (i32, i32) {
    %c0_i32 = arith.constant 0 : i32
    %c0_i32_0 = arith.constant 0 : i32
    %c0_i32_1 = arith.constant 0 : i32
    return %c0_i32, %c0_i32_0 : i32, i32
  }
}

module attributes {stable_mosaic.version = 11 : i64} {
  func.func @gcn_sag_layer_kernel(%arg0: i32, %arg1: memref<16x1xi32, #tpu.memory_space<vmem>>, %arg2: memref<1x16xi32, #tpu.memory_space<vmem>>, %arg3: memref<32x32xf32, #tpu.memory_space<vmem>>, %arg4: memref<32x128xf32, #tpu.memory_space<vmem>>, %arg5: memref<128x128xf32, #tpu.memory_space<vmem>>, %arg6: memref<1x128xf32, #tpu.memory_space<vmem>>, %arg7: memref<128x128xf32, #tpu.memory_space<vmem>>, %arg8: memref<1x128xf32, #tpu.memory_space<vmem>>, %arg9: memref<1x128xf32, #tpu.memory_space<vmem>>, %arg10: memref<1x128xf32, #tpu.memory_space<vmem>>, %arg11: memref<128x2xf32, #tpu.memory_space<vmem>>, %arg12: memref<1x1xf32, #tpu.memory_space<vmem>>, %arg13: memref<16x128xf32, #tpu.memory_space<vmem>>, %arg14: memref<1x16xf32, #tpu.memory_space<vmem>>, %arg15: memref<16x16xf32, #tpu.memory_space<vmem>>) attributes {dimension_semantics = [#tpu.dimension_semantics<arbitrary>], iteration_bounds = array<i64: 1>, scalar_prefetch = 0 : i64, scratch_operands = 0 : i64, tpu.core_type = #tpu.core_type<tc>, window_params = [{pipeline_mode = #tpu.pipeline_mode<synchronous>, transform_indices = @transform_0, window_bounds = array<i64: 16, 1>}, {pipeline_mode = #tpu.pipeline_mode<synchronous>, transform_indices = @transform_1, window_bounds = array<i64: 1, 16>}, {pipeline_mode = #tpu.pipeline_mode<synchronous>, transform_indices = @transform_2, window_bounds = array<i64: 32, 32>}, {pipeline_mode = #tpu.pipeline_mode<synchronous>, transform_indices = @transform_3, window_bounds = array<i64: 32, 128>}, {pipeline_mode = #tpu.pipeline_mode<synchronous>, transform_indices = @transform_4, window_bounds = array<i64: 128, 128>}, {pipeline_mode = #tpu.pipeline_mode<synchronous>, transform_indices = @transform_5, window_bounds = array<i64: 1, 128>}, {pipeline_mode = #tpu.pipeline_mode<synchronous>, transform_indices = @transform_6, window_bounds = array<i64: 128, 128>}, {pipeline_mode = #tpu.pipeline_mode<synchronous>, transform_indices = @transform_7, window_bounds = array<i64: 1, 128>}, {pipeline_mode = #tpu.pipeline_mode<synchronous>, transform_indices = @transform_8, window_bounds = array<i64: 1, 128>}, {pipeline_mode = #tpu.pipeline_mode<synchronous>, transform_indices = @transform_9, window_bounds = array<i64: 1, 128>}, {pipeline_mode = #tpu.pipeline_mode<synchronous>, transform_indices = @transform_10, window_bounds = array<i64: 128, 2>}, {pipeline_mode = #tpu.pipeline_mode<synchronous>, transform_indices = @transform_11, window_bounds = array<i64: 1, 1>}, {pipeline_mode = #tpu.pipeline_mode<synchronous>, transform_indices = @transform_12, window_bounds = array<i64: 16, 128>}, {pipeline_mode = #tpu.pipeline_mode<synchronous>, transform_indices = @transform_13, window_bounds = array<i64: 1, 16>}, {pipeline_mode = #tpu.pipeline_mode<synchronous>, transform_indices = @transform_14, window_bounds = array<i64: 16, 16>}]} {
    %0 = tpu.iota {dimensions = array<i32: 1>} : vector<16x32xi32>
    %1 = tpu.iota {dimensions = array<i32: 0>} : vector<32x16xi32>
    %c0 = arith.constant 0 : index
    %c0_0 = arith.constant 0 : index
    %2 = vector.load %arg1[%c0, %c0_0] : memref<16x1xi32, #tpu.memory_space<vmem>>, vector<16x1xi32>
    %3 = vector.broadcast %2 : vector<16x1xi32> to vector<16x32xi32>
    %4 = arith.cmpi eq, %0, %3 : vector<16x32xi32>
    %5 = arith.extui %4 : vector<16x32xi1> to vector<16x32xi32>
    %6 = arith.sitofp %5 : vector<16x32xi32> to vector<16x32xf32>
    %c0_1 = arith.constant 0 : index
    %c0_2 = arith.constant 0 : index
    %7 = vector.load %arg2[%c0_1, %c0_2] : memref<1x16xi32, #tpu.memory_space<vmem>>, vector<1x16xi32>
    %8 = vector.broadcast %7 : vector<1x16xi32> to vector<32x16xi32>
    %9 = arith.cmpi eq, %1, %8 : vector<32x16xi32>
    %10 = arith.extui %9 : vector<32x16xi1> to vector<32x16xi32>
    %11 = arith.sitofp %10 : vector<32x16xi32> to vector<32x16xf32>
    %c0_3 = arith.constant 0 : index
    %c0_4 = arith.constant 0 : index
    %12 = vector.load %arg4[%c0_3, %c0_4] : memref<32x128xf32, #tpu.memory_space<vmem>>, vector<32x128xf32>
    %cst = arith.constant dense<0.000000e+00> : vector<16x128xf32>
    %13 = tpu.matmul %6, %12, %cst {dimension_numbers = #tpu.dot_dimension_numbers<[1], [0], [0], [1], [0, 0, 1, 1], [], []>} : vector<16x32xf32>, vector<32x128xf32>, vector<16x128xf32> -> vector<16x128xf32>
    %c0_5 = arith.constant 0 : index
    %c0_6 = arith.constant 0 : index
    %14 = vector.load %arg3[%c0_5, %c0_6] : memref<32x32xf32, #tpu.memory_space<vmem>>, vector<32x32xf32>
    %cst_7 = arith.constant dense<0.000000e+00> : vector<16x32xf32>
    %15 = tpu.matmul %6, %14, %cst_7 {dimension_numbers = #tpu.dot_dimension_numbers<[1], [0], [0], [1], [0, 0, 1, 1], [], []>} : vector<16x32xf32>, vector<32x32xf32>, vector<16x32xf32> -> vector<16x32xf32>
    %cst_8 = arith.constant dense<0.000000e+00> : vector<16x16xf32>
    %16 = tpu.matmul %15, %11, %cst_8 {dimension_numbers = #tpu.dot_dimension_numbers<[1], [0], [0], [1], [0, 0, 1, 1], [], []>} : vector<16x32xf32>, vector<32x16xf32>, vector<16x16xf32> -> vector<16x16xf32>
    %c0_9 = arith.constant 0 : index
    %c0_10 = arith.constant 0 : index
    %17 = vector.load %arg15[%c0_9, %c0_10] : memref<16x16xf32, #tpu.memory_space<vmem>>, vector<16x16xf32>
    tpu.vector_store %arg15[%c0_9, %c0_10], %16 {strides = array<i32>} : memref<16x16xf32, #tpu.memory_space<vmem>>, vector<16x16xf32>,
    %cst_11 = arith.constant dense<0.000000e+00> : vector<16xf32>
    %18 = vector.multi_reduction <add>, %16, %cst_11 [1] : vector<16x16xf32> to vector<16xf32>
    %19 = vector.shape_cast %18 : vector<16xf32> to vector<16x1xf32>
    %cst_12 = arith.constant 1.000000e+00 : f32
    %20 = vector.broadcast %cst_12 : f32 to vector<16x1xf32>
    %21 = arith.addf %19, %20 : vector<16x1xf32>
    %22 = math.rsqrt %21 : vector<16x1xf32>
    %c0_13 = arith.constant 0 : index
    %c0_14 = arith.constant 0 : index
    %23 = vector.load %arg5[%c0_13, %c0_14] : memref<128x128xf32, #tpu.memory_space<vmem>>, vector<128x128xf32>
    %cst_15 = arith.constant dense<0.000000e+00> : vector<16x128xf32>
    %24 = tpu.matmul %13, %23, %cst_15 {dimension_numbers = #tpu.dot_dimension_numbers<[1], [0], [0], [1], [0, 0, 1, 1], [], []>} : vector<16x128xf32>, vector<128x128xf32>, vector<16x128xf32> -> vector<16x128xf32>
    %25 = vector.broadcast %22 : vector<16x1xf32> to vector<16x128xf32>
    %26 = arith.mulf %25, %24 : vector<16x128xf32>
    %cst_16 = arith.constant dense<0.000000e+00> : vector<16x128xf32>
    %27 = tpu.matmul %16, %26, %cst_16 {dimension_numbers = #tpu.dot_dimension_numbers<[1], [0], [0], [1], [0, 0, 1, 1], [], []>} : vector<16x16xf32>, vector<16x128xf32>, vector<16x128xf32> -> vector<16x128xf32>
    %28 = arith.addf %27, %26 : vector<16x128xf32>
    %29 = vector.broadcast %22 : vector<16x1xf32> to vector<16x128xf32>
    %30 = arith.mulf %29, %28 : vector<16x128xf32>
    %c0_17 = arith.constant 0 : index
    %c0_18 = arith.constant 0 : index
    %31 = vector.load %arg6[%c0_17, %c0_18] : memref<1x128xf32, #tpu.memory_space<vmem>>, vector<1x128xf32>
    %32 = vector.broadcast %31 : vector<1x128xf32> to vector<16x128xf32>
    %33 = arith.addf %30, %32 : vector<16x128xf32>
    %c0_19 = arith.constant 0 : index
    %c0_20 = arith.constant 0 : index
    %34 = vector.load %arg7[%c0_19, %c0_20] : memref<128x128xf32, #tpu.memory_space<vmem>>, vector<128x128xf32>
    %cst_21 = arith.constant dense<0.000000e+00> : vector<16x128xf32>
    %35 = tpu.matmul %33, %34, %cst_21 {dimension_numbers = #tpu.dot_dimension_numbers<[1], [0], [0], [1], [0, 0, 1, 1], [], []>} : vector<16x128xf32>, vector<128x128xf32>, vector<16x128xf32> -> vector<16x128xf32>
    %c0_22 = arith.constant 0 : index
    %c0_23 = arith.constant 0 : index
    %36 = vector.load %arg8[%c0_22, %c0_23] : memref<1x128xf32, #tpu.memory_space<vmem>>, vector<1x128xf32>
    %37 = vector.broadcast %36 : vector<1x128xf32> to vector<16x128xf32>
    %38 = arith.addf %35, %37 : vector<16x128xf32>
    %cst_24 = arith.constant 0.000000e+00 : f32
    %39 = vector.broadcast %cst_24 : f32 to vector<16x128xf32>
    %40 = arith.maximumf %38, %39 : vector<16x128xf32>
    %cst_25 = arith.constant dense<0.000000e+00> : vector<128xf32>
    %41 = vector.multi_reduction <add>, %40, %cst_25 [0] : vector<16x128xf32> to vector<128xf32>
    %42 = vector.shape_cast %41 : vector<128xf32> to vector<1x128xf32>
    %cst_26 = arith.constant 1.600000e+01 : f32
    %43 = vector.broadcast %cst_26 : f32 to vector<1x128xf32>
    %44 = arith.divf %42, %43 : vector<1x128xf32>
    %45 = vector.broadcast %44 : vector<1x128xf32> to vector<16x128xf32>
    %46 = arith.subf %40, %45 : vector<16x128xf32>
    %47 = vector.broadcast %44 : vector<1x128xf32> to vector<16x128xf32>
    %48 = arith.subf %40, %47 : vector<16x128xf32>
    %49 = arith.mulf %46, %48 : vector<16x128xf32>
    %cst_27 = arith.constant dense<0.000000e+00> : vector<128xf32>
    %50 = vector.multi_reduction <add>, %49, %cst_27 [0] : vector<16x128xf32> to vector<128xf32>
    %51 = vector.shape_cast %50 : vector<128xf32> to vector<1x128xf32>
    %cst_28 = arith.constant 1.600000e+01 : f32
    %52 = vector.broadcast %cst_28 : f32 to vector<1x128xf32>
    %53 = arith.divf %51, %52 : vector<1x128xf32>
    %54 = vector.broadcast %44 : vector<1x128xf32> to vector<16x128xf32>
    %55 = arith.subf %40, %54 : vector<16x128xf32>
    %cst_29 = arith.constant 9.99999974E-6 : f32
    %56 = vector.broadcast %cst_29 : f32 to vector<1x128xf32>
    %57 = arith.addf %53, %56 : vector<1x128xf32>
    %58 = math.rsqrt %57 : vector<1x128xf32>
    %59 = vector.broadcast %58 : vector<1x128xf32> to vector<16x128xf32>
    %60 = arith.mulf %55, %59 : vector<16x128xf32>
    %c0_30 = arith.constant 0 : index
    %c0_31 = arith.constant 0 : index
    %61 = vector.load %arg9[%c0_30, %c0_31] : memref<1x128xf32, #tpu.memory_space<vmem>>, vector<1x128xf32>
    %62 = vector.broadcast %61 : vector<1x128xf32> to vector<16x128xf32>
    %63 = arith.mulf %60, %62 : vector<16x128xf32>
    %c0_32 = arith.constant 0 : index
    %c0_33 = arith.constant 0 : index
    %64 = vector.load %arg10[%c0_32, %c0_33] : memref<1x128xf32, #tpu.memory_space<vmem>>, vector<1x128xf32>
    %65 = vector.broadcast %64 : vector<1x128xf32> to vector<16x128xf32>
    %66 = arith.addf %63, %65 : vector<16x128xf32>
    %c0_34 = arith.constant 0 : index
    %c0_35 = arith.constant 0 : index
    %67 = vector.load %arg11[%c0_34, %c0_35] : memref<128x2xf32, #tpu.memory_space<vmem>>, vector<128x2xf32>
    %cst_36 = arith.constant dense<0.000000e+00> : vector<16x2xf32>
    %68 = tpu.matmul %66, %67, %cst_36 {dimension_numbers = #tpu.dot_dimension_numbers<[1], [0], [0], [1], [0, 0, 1, 1], [], []>} : vector<16x128xf32>, vector<128x2xf32>, vector<16x2xf32> -> vector<16x2xf32>
    %cst_37 = arith.constant dense<0.000000e+00> : vector<16x2xf32>
    %69 = tpu.matmul %16, %68, %cst_37 {dimension_numbers = #tpu.dot_dimension_numbers<[1], [0], [0], [1], [0, 0, 1, 1], [], []>} : vector<16x16xf32>, vector<16x2xf32>, vector<16x2xf32> -> vector<16x2xf32>
    %70 = vector.extract_strided_slice %68 {offsets = [0, 0], sizes = [16, 1], strides = [1, 1]} : vector<16x2xf32> to vector<16x1xf32>
    %71 = vector.extract_strided_slice %69 {offsets = [0, 1], sizes = [16, 1], strides = [1, 1]} : vector<16x2xf32> to vector<16x1xf32>
    %72 = arith.addf %70, %71 : vector<16x1xf32>
    %c0_38 = arith.constant 0 : index
    %c0_39 = arith.constant 0 : index
    %73 = vector.load %arg12[%c0_38, %c0_39] : memref<1x1xf32, #tpu.memory_space<vmem>>, vector<1x1xf32>
    %74 = vector.broadcast %73 : vector<1x1xf32> to vector<16x1xf32>
    %75 = arith.addf %72, %74 : vector<16x1xf32>
    %76 = math.tanh %75 : vector<16x1xf32>
    %77 = vector.broadcast %76 : vector<16x1xf32> to vector<16x128xf32>
    %78 = arith.mulf %66, %77 : vector<16x128xf32>
    %c0_40 = arith.constant 0 : index
    %c0_41 = arith.constant 0 : index
    %79 = vector.load %arg13[%c0_40, %c0_41] : memref<16x128xf32, #tpu.memory_space<vmem>>, vector<16x128xf32>
    tpu.vector_store %arg13[%c0_40, %c0_41], %78 {strides = array<i32>} : memref<16x128xf32, #tpu.memory_space<vmem>>, vector<16x128xf32>,
    %80 = tpu.iota {dimensions = array<i32: 0>} : vector<16x16xi32>
    %81 = tpu.iota {dimensions = array<i32: 1>} : vector<16x16xi32>
    %82 = arith.cmpi eq, %80, %81 : vector<16x16xi32>
    %cst_42 = arith.constant 0.000000e+00 : f32
    %83 = vector.shape_cast %76 : vector<16x1xf32> to vector<16x1xf32>
    %84 = vector.broadcast %83 : vector<16x1xf32> to vector<16x16xf32>
    %85 = vector.broadcast %cst_42 : f32 to vector<16x16xf32>
    %86 = arith.select %82, %84, %85 : vector<16x16xi1>, vector<16x16xf32>
    %cst_43 = arith.constant dense<0.000000e+00> : vector<16xf32>
    %87 = vector.multi_reduction <add>, %86, %cst_43 [0] : vector<16x16xf32> to vector<16xf32>
    %88 = vector.shape_cast %87 : vector<16xf32> to vector<1x16xf32>
    %c0_44 = arith.constant 0 : index
    %c0_45 = arith.constant 0 : index
    %89 = vector.load %arg14[%c0_44, %c0_45] : memref<1x16xf32, #tpu.memory_space<vmem>>, vector<1x16xf32>
    tpu.vector_store %arg14[%c0_44, %c0_45], %88 {strides = array<i32>} : memref<1x16xf32, #tpu.memory_space<vmem>>, vector<1x16xf32>,
    return
  }
  func.func @transform_0(%arg0: i32) -> (i32, i32) {
    %c0_i32 = arith.constant 0 : i32
    %c0_i32_0 = arith.constant 0 : i32
    %c0_i32_1 = arith.constant 0 : i32
    return %c0_i32, %c0_i32_0 : i32, i32
  }
  func.func @transform_1(%arg0: i32) -> (i32, i32) {
    %c0_i32 = arith.constant 0 : i32
    %c0_i32_0 = arith.constant 0 : i32
    %c0_i32_1 = arith.constant 0 : i32
    return %c0_i32, %c0_i32_0 : i32, i32
  }
  func.func @transform_2(%arg0: i32) -> (i32, i32) {
    %c0_i32 = arith.constant 0 : i32
    %c0_i32_0 = arith.constant 0 : i32
    %c0_i32_1 = arith.constant 0 : i32
    return %c0_i32, %c0_i32_0 : i32, i32
  }
  func.func @transform_3(%arg0: i32) -> (i32, i32) {
    %c0_i32 = arith.constant 0 : i32
    %c0_i32_0 = arith.constant 0 : i32
    %c0_i32_1 = arith.constant 0 : i32
    return %c0_i32, %c0_i32_0 : i32, i32
  }
  func.func @transform_4(%arg0: i32) -> (i32, i32) {
    %c0_i32 = arith.constant 0 : i32
    %c0_i32_0 = arith.constant 0 : i32
    %c0_i32_1 = arith.constant 0 : i32
    return %c0_i32, %c0_i32_0 : i32, i32
  }
  func.func @transform_5(%arg0: i32) -> (i32, i32) {
    %c0_i32 = arith.constant 0 : i32
    %c0_i32_0 = arith.constant 0 : i32
    %c0_i32_1 = arith.constant 0 : i32
    return %c0_i32, %c0_i32_0 : i32, i32
  }
  func.func @transform_6(%arg0: i32) -> (i32, i32) {
    %c0_i32 = arith.constant 0 : i32
    %c0_i32_0 = arith.constant 0 : i32
    %c0_i32_1 = arith.constant 0 : i32
    return %c0_i32, %c0_i32_0 : i32, i32
  }
  func.func @transform_7(%arg0: i32) -> (i32, i32) {
    %c0_i32 = arith.constant 0 : i32
    %c0_i32_0 = arith.constant 0 : i32
    %c0_i32_1 = arith.constant 0 : i32
    return %c0_i32, %c0_i32_0 : i32, i32
  }
  func.func @transform_8(%arg0: i32) -> (i32, i32) {
    %c0_i32 = arith.constant 0 : i32
    %c0_i32_0 = arith.constant 0 : i32
    %c0_i32_1 = arith.constant 0 : i32
    return %c0_i32, %c0_i32_0 : i32, i32
  }
  func.func @transform_9(%arg0: i32) -> (i32, i32) {
    %c0_i32 = arith.constant 0 : i32
    %c0_i32_0 = arith.constant 0 : i32
    %c0_i32_1 = arith.constant 0 : i32
    return %c0_i32, %c0_i32_0 : i32, i32
  }
  func.func @transform_10(%arg0: i32) -> (i32, i32) {
    %c0_i32 = arith.constant 0 : i32
    %c0_i32_0 = arith.constant 0 : i32
    %c0_i32_1 = arith.constant 0 : i32
    return %c0_i32, %c0_i32_0 : i32, i32
  }
  func.func @transform_11(%arg0: i32) -> (i32, i32) {
    %c0_i32 = arith.constant 0 : i32
    %c0_i32_0 = arith.constant 0 : i32
    %c0_i32_1 = arith.constant 0 : i32
    return %c0_i32, %c0_i32_0 : i32, i32
  }
  func.func @transform_12(%arg0: i32) -> (i32, i32) {
    %c0_i32 = arith.constant 0 : i32
    %c0_i32_0 = arith.constant 0 : i32
    %c0_i32_1 = arith.constant 0 : i32
    return %c0_i32, %c0_i32_0 : i32, i32
  }
  func.func @transform_13(%arg0: i32) -> (i32, i32) {
    %c0_i32 = arith.constant 0 : i32
    %c0_i32_0 = arith.constant 0 : i32
    %c0_i32_1 = arith.constant 0 : i32
    return %c0_i32, %c0_i32_0 : i32, i32
  }
  func.func @transform_14(%arg0: i32) -> (i32, i32) {
    %c0_i32 = arith.constant 0 : i32
    %c0_i32_0 = arith.constant 0 : i32
    %c0_i32_1 = arith.constant 0 : i32
    return %c0_i32, %c0_i32_0 : i32, i32
  }
}

module attributes {stable_mosaic.version = 11 : i64} {
  func.func @gcn_sag_layer_kernel(%arg0: i32, %arg1: memref<8x1xi32, #tpu.memory_space<vmem>>, %arg2: memref<1x8xi32, #tpu.memory_space<vmem>>, %arg3: memref<16x16xf32, #tpu.memory_space<vmem>>, %arg4: memref<16x128xf32, #tpu.memory_space<vmem>>, %arg5: memref<128x128xf32, #tpu.memory_space<vmem>>, %arg6: memref<1x128xf32, #tpu.memory_space<vmem>>, %arg7: memref<128x128xf32, #tpu.memory_space<vmem>>, %arg8: memref<1x128xf32, #tpu.memory_space<vmem>>, %arg9: memref<1x128xf32, #tpu.memory_space<vmem>>, %arg10: memref<1x128xf32, #tpu.memory_space<vmem>>, %arg11: memref<128x2xf32, #tpu.memory_space<vmem>>, %arg12: memref<1x1xf32, #tpu.memory_space<vmem>>, %arg13: memref<8x128xf32, #tpu.memory_space<vmem>>, %arg14: memref<1x8xf32, #tpu.memory_space<vmem>>, %arg15: memref<8x8xf32, #tpu.memory_space<vmem>>) attributes {dimension_semantics = [#tpu.dimension_semantics<arbitrary>], iteration_bounds = array<i64: 1>, scalar_prefetch = 0 : i64, scratch_operands = 0 : i64, tpu.core_type = #tpu.core_type<tc>, window_params = [{pipeline_mode = #tpu.pipeline_mode<synchronous>, transform_indices = @transform_0, window_bounds = array<i64: 8, 1>}, {pipeline_mode = #tpu.pipeline_mode<synchronous>, transform_indices = @transform_1, window_bounds = array<i64: 1, 8>}, {pipeline_mode = #tpu.pipeline_mode<synchronous>, transform_indices = @transform_2, window_bounds = array<i64: 16, 16>}, {pipeline_mode = #tpu.pipeline_mode<synchronous>, transform_indices = @transform_3, window_bounds = array<i64: 16, 128>}, {pipeline_mode = #tpu.pipeline_mode<synchronous>, transform_indices = @transform_4, window_bounds = array<i64: 128, 128>}, {pipeline_mode = #tpu.pipeline_mode<synchronous>, transform_indices = @transform_5, window_bounds = array<i64: 1, 128>}, {pipeline_mode = #tpu.pipeline_mode<synchronous>, transform_indices = @transform_6, window_bounds = array<i64: 128, 128>}, {pipeline_mode = #tpu.pipeline_mode<synchronous>, transform_indices = @transform_7, window_bounds = array<i64: 1, 128>}, {pipeline_mode = #tpu.pipeline_mode<synchronous>, transform_indices = @transform_8, window_bounds = array<i64: 1, 128>}, {pipeline_mode = #tpu.pipeline_mode<synchronous>, transform_indices = @transform_9, window_bounds = array<i64: 1, 128>}, {pipeline_mode = #tpu.pipeline_mode<synchronous>, transform_indices = @transform_10, window_bounds = array<i64: 128, 2>}, {pipeline_mode = #tpu.pipeline_mode<synchronous>, transform_indices = @transform_11, window_bounds = array<i64: 1, 1>}, {pipeline_mode = #tpu.pipeline_mode<synchronous>, transform_indices = @transform_12, window_bounds = array<i64: 8, 128>}, {pipeline_mode = #tpu.pipeline_mode<synchronous>, transform_indices = @transform_13, window_bounds = array<i64: 1, 8>}, {pipeline_mode = #tpu.pipeline_mode<synchronous>, transform_indices = @transform_14, window_bounds = array<i64: 8, 8>}]} {
    %0 = tpu.iota {dimensions = array<i32: 1>} : vector<8x16xi32>
    %1 = tpu.iota {dimensions = array<i32: 0>} : vector<16x8xi32>
    %c0 = arith.constant 0 : index
    %c0_0 = arith.constant 0 : index
    %2 = vector.load %arg1[%c0, %c0_0] : memref<8x1xi32, #tpu.memory_space<vmem>>, vector<8x1xi32>
    %3 = vector.broadcast %2 : vector<8x1xi32> to vector<8x16xi32>
    %4 = arith.cmpi eq, %0, %3 : vector<8x16xi32>
    %5 = arith.extui %4 : vector<8x16xi1> to vector<8x16xi32>
    %6 = arith.sitofp %5 : vector<8x16xi32> to vector<8x16xf32>
    %c0_1 = arith.constant 0 : index
    %c0_2 = arith.constant 0 : index
    %7 = vector.load %arg2[%c0_1, %c0_2] : memref<1x8xi32, #tpu.memory_space<vmem>>, vector<1x8xi32>
    %8 = vector.broadcast %7 : vector<1x8xi32> to vector<16x8xi32>
    %9 = arith.cmpi eq, %1, %8 : vector<16x8xi32>
    %10 = arith.extui %9 : vector<16x8xi1> to vector<16x8xi32>
    %11 = arith.sitofp %10 : vector<16x8xi32> to vector<16x8xf32>
    %c0_3 = arith.constant 0 : index
    %c0_4 = arith.constant 0 : index
    %12 = vector.load %arg4[%c0_3, %c0_4] : memref<16x128xf32, #tpu.memory_space<vmem>>, vector<16x128xf32>
    %cst = arith.constant dense<0.000000e+00> : vector<8x128xf32>
    %13 = tpu.matmul %6, %12, %cst {dimension_numbers = #tpu.dot_dimension_numbers<[1], [0], [0], [1], [0, 0, 1, 1], [], []>} : vector<8x16xf32>, vector<16x128xf32>, vector<8x128xf32> -> vector<8x128xf32>
    %c0_5 = arith.constant 0 : index
    %c0_6 = arith.constant 0 : index
    %14 = vector.load %arg3[%c0_5, %c0_6] : memref<16x16xf32, #tpu.memory_space<vmem>>, vector<16x16xf32>
    %cst_7 = arith.constant dense<0.000000e+00> : vector<8x16xf32>
    %15 = tpu.matmul %6, %14, %cst_7 {dimension_numbers = #tpu.dot_dimension_numbers<[1], [0], [0], [1], [0, 0, 1, 1], [], []>} : vector<8x16xf32>, vector<16x16xf32>, vector<8x16xf32> -> vector<8x16xf32>
    %cst_8 = arith.constant dense<0.000000e+00> : vector<8x8xf32>
    %16 = tpu.matmul %15, %11, %cst_8 {dimension_numbers = #tpu.dot_dimension_numbers<[1], [0], [0], [1], [0, 0, 1, 1], [], []>} : vector<8x16xf32>, vector<16x8xf32>, vector<8x8xf32> -> vector<8x8xf32>
    %c0_9 = arith.constant 0 : index
    %c0_10 = arith.constant 0 : index
    %17 = vector.load %arg15[%c0_9, %c0_10] : memref<8x8xf32, #tpu.memory_space<vmem>>, vector<8x8xf32>
    tpu.vector_store %arg15[%c0_9, %c0_10], %16 {strides = array<i32>} : memref<8x8xf32, #tpu.memory_space<vmem>>, vector<8x8xf32>,
    %cst_11 = arith.constant dense<0.000000e+00> : vector<8xf32>
    %18 = vector.multi_reduction <add>, %16, %cst_11 [1] : vector<8x8xf32> to vector<8xf32>
    %19 = vector.shape_cast %18 : vector<8xf32> to vector<8x1xf32>
    %cst_12 = arith.constant 1.000000e+00 : f32
    %20 = vector.broadcast %cst_12 : f32 to vector<8x1xf32>
    %21 = arith.addf %19, %20 : vector<8x1xf32>
    %22 = math.rsqrt %21 : vector<8x1xf32>
    %c0_13 = arith.constant 0 : index
    %c0_14 = arith.constant 0 : index
    %23 = vector.load %arg5[%c0_13, %c0_14] : memref<128x128xf32, #tpu.memory_space<vmem>>, vector<128x128xf32>
    %cst_15 = arith.constant dense<0.000000e+00> : vector<8x128xf32>
    %24 = tpu.matmul %13, %23, %cst_15 {dimension_numbers = #tpu.dot_dimension_numbers<[1], [0], [0], [1], [0, 0, 1, 1], [], []>} : vector<8x128xf32>, vector<128x128xf32>, vector<8x128xf32> -> vector<8x128xf32>
    %25 = vector.broadcast %22 : vector<8x1xf32> to vector<8x128xf32>
    %26 = arith.mulf %25, %24 : vector<8x128xf32>
    %cst_16 = arith.constant dense<0.000000e+00> : vector<8x128xf32>
    %27 = tpu.matmul %16, %26, %cst_16 {dimension_numbers = #tpu.dot_dimension_numbers<[1], [0], [0], [1], [0, 0, 1, 1], [], []>} : vector<8x8xf32>, vector<8x128xf32>, vector<8x128xf32> -> vector<8x128xf32>
    %28 = arith.addf %27, %26 : vector<8x128xf32>
    %29 = vector.broadcast %22 : vector<8x1xf32> to vector<8x128xf32>
    %30 = arith.mulf %29, %28 : vector<8x128xf32>
    %c0_17 = arith.constant 0 : index
    %c0_18 = arith.constant 0 : index
    %31 = vector.load %arg6[%c0_17, %c0_18] : memref<1x128xf32, #tpu.memory_space<vmem>>, vector<1x128xf32>
    %32 = vector.broadcast %31 : vector<1x128xf32> to vector<8x128xf32>
    %33 = arith.addf %30, %32 : vector<8x128xf32>
    %c0_19 = arith.constant 0 : index
    %c0_20 = arith.constant 0 : index
    %34 = vector.load %arg7[%c0_19, %c0_20] : memref<128x128xf32, #tpu.memory_space<vmem>>, vector<128x128xf32>
    %cst_21 = arith.constant dense<0.000000e+00> : vector<8x128xf32>
    %35 = tpu.matmul %33, %34, %cst_21 {dimension_numbers = #tpu.dot_dimension_numbers<[1], [0], [0], [1], [0, 0, 1, 1], [], []>} : vector<8x128xf32>, vector<128x128xf32>, vector<8x128xf32> -> vector<8x128xf32>
    %c0_22 = arith.constant 0 : index
    %c0_23 = arith.constant 0 : index
    %36 = vector.load %arg8[%c0_22, %c0_23] : memref<1x128xf32, #tpu.memory_space<vmem>>, vector<1x128xf32>
    %37 = vector.broadcast %36 : vector<1x128xf32> to vector<8x128xf32>
    %38 = arith.addf %35, %37 : vector<8x128xf32>
    %cst_24 = arith.constant 0.000000e+00 : f32
    %39 = vector.broadcast %cst_24 : f32 to vector<8x128xf32>
    %40 = arith.maximumf %38, %39 : vector<8x128xf32>
    %cst_25 = arith.constant dense<0.000000e+00> : vector<128xf32>
    %41 = vector.multi_reduction <add>, %40, %cst_25 [0] : vector<8x128xf32> to vector<128xf32>
    %42 = vector.shape_cast %41 : vector<128xf32> to vector<1x128xf32>
    %cst_26 = arith.constant 8.000000e+00 : f32
    %43 = vector.broadcast %cst_26 : f32 to vector<1x128xf32>
    %44 = arith.divf %42, %43 : vector<1x128xf32>
    %45 = vector.broadcast %44 : vector<1x128xf32> to vector<8x128xf32>
    %46 = arith.subf %40, %45 : vector<8x128xf32>
    %47 = vector.broadcast %44 : vector<1x128xf32> to vector<8x128xf32>
    %48 = arith.subf %40, %47 : vector<8x128xf32>
    %49 = arith.mulf %46, %48 : vector<8x128xf32>
    %cst_27 = arith.constant dense<0.000000e+00> : vector<128xf32>
    %50 = vector.multi_reduction <add>, %49, %cst_27 [0] : vector<8x128xf32> to vector<128xf32>
    %51 = vector.shape_cast %50 : vector<128xf32> to vector<1x128xf32>
    %cst_28 = arith.constant 8.000000e+00 : f32
    %52 = vector.broadcast %cst_28 : f32 to vector<1x128xf32>
    %53 = arith.divf %51, %52 : vector<1x128xf32>
    %54 = vector.broadcast %44 : vector<1x128xf32> to vector<8x128xf32>
    %55 = arith.subf %40, %54 : vector<8x128xf32>
    %cst_29 = arith.constant 9.99999974E-6 : f32
    %56 = vector.broadcast %cst_29 : f32 to vector<1x128xf32>
    %57 = arith.addf %53, %56 : vector<1x128xf32>
    %58 = math.rsqrt %57 : vector<1x128xf32>
    %59 = vector.broadcast %58 : vector<1x128xf32> to vector<8x128xf32>
    %60 = arith.mulf %55, %59 : vector<8x128xf32>
    %c0_30 = arith.constant 0 : index
    %c0_31 = arith.constant 0 : index
    %61 = vector.load %arg9[%c0_30, %c0_31] : memref<1x128xf32, #tpu.memory_space<vmem>>, vector<1x128xf32>
    %62 = vector.broadcast %61 : vector<1x128xf32> to vector<8x128xf32>
    %63 = arith.mulf %60, %62 : vector<8x128xf32>
    %c0_32 = arith.constant 0 : index
    %c0_33 = arith.constant 0 : index
    %64 = vector.load %arg10[%c0_32, %c0_33] : memref<1x128xf32, #tpu.memory_space<vmem>>, vector<1x128xf32>
    %65 = vector.broadcast %64 : vector<1x128xf32> to vector<8x128xf32>
    %66 = arith.addf %63, %65 : vector<8x128xf32>
    %c0_34 = arith.constant 0 : index
    %c0_35 = arith.constant 0 : index
    %67 = vector.load %arg11[%c0_34, %c0_35] : memref<128x2xf32, #tpu.memory_space<vmem>>, vector<128x2xf32>
    %cst_36 = arith.constant dense<0.000000e+00> : vector<8x2xf32>
    %68 = tpu.matmul %66, %67, %cst_36 {dimension_numbers = #tpu.dot_dimension_numbers<[1], [0], [0], [1], [0, 0, 1, 1], [], []>} : vector<8x128xf32>, vector<128x2xf32>, vector<8x2xf32> -> vector<8x2xf32>
    %cst_37 = arith.constant dense<0.000000e+00> : vector<8x2xf32>
    %69 = tpu.matmul %16, %68, %cst_37 {dimension_numbers = #tpu.dot_dimension_numbers<[1], [0], [0], [1], [0, 0, 1, 1], [], []>} : vector<8x8xf32>, vector<8x2xf32>, vector<8x2xf32> -> vector<8x2xf32>
    %70 = vector.extract_strided_slice %68 {offsets = [0, 0], sizes = [8, 1], strides = [1, 1]} : vector<8x2xf32> to vector<8x1xf32>
    %71 = vector.extract_strided_slice %69 {offsets = [0, 1], sizes = [8, 1], strides = [1, 1]} : vector<8x2xf32> to vector<8x1xf32>
    %72 = arith.addf %70, %71 : vector<8x1xf32>
    %c0_38 = arith.constant 0 : index
    %c0_39 = arith.constant 0 : index
    %73 = vector.load %arg12[%c0_38, %c0_39] : memref<1x1xf32, #tpu.memory_space<vmem>>, vector<1x1xf32>
    %74 = vector.broadcast %73 : vector<1x1xf32> to vector<8x1xf32>
    %75 = arith.addf %72, %74 : vector<8x1xf32>
    %76 = math.tanh %75 : vector<8x1xf32>
    %77 = vector.broadcast %76 : vector<8x1xf32> to vector<8x128xf32>
    %78 = arith.mulf %66, %77 : vector<8x128xf32>
    %c0_40 = arith.constant 0 : index
    %c0_41 = arith.constant 0 : index
    %79 = vector.load %arg13[%c0_40, %c0_41] : memref<8x128xf32, #tpu.memory_space<vmem>>, vector<8x128xf32>
    tpu.vector_store %arg13[%c0_40, %c0_41], %78 {strides = array<i32>} : memref<8x128xf32, #tpu.memory_space<vmem>>, vector<8x128xf32>,
    %80 = tpu.iota {dimensions = array<i32: 0>} : vector<8x8xi32>
    %81 = tpu.iota {dimensions = array<i32: 1>} : vector<8x8xi32>
    %82 = arith.cmpi eq, %80, %81 : vector<8x8xi32>
    %cst_42 = arith.constant 0.000000e+00 : f32
    %83 = vector.shape_cast %76 : vector<8x1xf32> to vector<8x1xf32>
    %84 = vector.broadcast %83 : vector<8x1xf32> to vector<8x8xf32>
    %85 = vector.broadcast %cst_42 : f32 to vector<8x8xf32>
    %86 = arith.select %82, %84, %85 : vector<8x8xi1>, vector<8x8xf32>
    %cst_43 = arith.constant dense<0.000000e+00> : vector<8xf32>
    %87 = vector.multi_reduction <add>, %86, %cst_43 [0] : vector<8x8xf32> to vector<8xf32>
    %88 = vector.shape_cast %87 : vector<8xf32> to vector<1x8xf32>
    %c0_44 = arith.constant 0 : index
    %c0_45 = arith.constant 0 : index
    %89 = vector.load %arg14[%c0_44, %c0_45] : memref<1x8xf32, #tpu.memory_space<vmem>>, vector<1x8xf32>
    tpu.vector_store %arg14[%c0_44, %c0_45], %88 {strides = array<i32>} : memref<1x8xf32, #tpu.memory_space<vmem>>, vector<1x8xf32>,
    return
  }
  func.func @transform_0(%arg0: i32) -> (i32, i32) {
    %c0_i32 = arith.constant 0 : i32
    %c0_i32_0 = arith.constant 0 : i32
    %c0_i32_1 = arith.constant 0 : i32
    return %c0_i32, %c0_i32_0 : i32, i32
  }
  func.func @transform_1(%arg0: i32) -> (i32, i32) {
    %c0_i32 = arith.constant 0 : i32
    %c0_i32_0 = arith.constant 0 : i32
    %c0_i32_1 = arith.constant 0 : i32
    return %c0_i32, %c0_i32_0 : i32, i32
  }
  func.func @transform_2(%arg0: i32) -> (i32, i32) {
    %c0_i32 = arith.constant 0 : i32
    %c0_i32_0 = arith.constant 0 : i32
    %c0_i32_1 = arith.constant 0 : i32
    return %c0_i32, %c0_i32_0 : i32, i32
  }
  func.func @transform_3(%arg0: i32) -> (i32, i32) {
    %c0_i32 = arith.constant 0 : i32
    %c0_i32_0 = arith.constant 0 : i32
    %c0_i32_1 = arith.constant 0 : i32
    return %c0_i32, %c0_i32_0 : i32, i32
  }
  func.func @transform_4(%arg0: i32) -> (i32, i32) {
    %c0_i32 = arith.constant 0 : i32
    %c0_i32_0 = arith.constant 0 : i32
    %c0_i32_1 = arith.constant 0 : i32
    return %c0_i32, %c0_i32_0 : i32, i32
  }
  func.func @transform_5(%arg0: i32) -> (i32, i32) {
    %c0_i32 = arith.constant 0 : i32
    %c0_i32_0 = arith.constant 0 : i32
    %c0_i32_1 = arith.constant 0 : i32
    return %c0_i32, %c0_i32_0 : i32, i32
  }
  func.func @transform_6(%arg0: i32) -> (i32, i32) {
    %c0_i32 = arith.constant 0 : i32
    %c0_i32_0 = arith.constant 0 : i32
    %c0_i32_1 = arith.constant 0 : i32
    return %c0_i32, %c0_i32_0 : i32, i32
  }
  func.func @transform_7(%arg0: i32) -> (i32, i32) {
    %c0_i32 = arith.constant 0 : i32
    %c0_i32_0 = arith.constant 0 : i32
    %c0_i32_1 = arith.constant 0 : i32
    return %c0_i32, %c0_i32_0 : i32, i32
  }
  func.func @transform_8(%arg0: i32) -> (i32, i32) {
    %c0_i32 = arith.constant 0 : i32
    %c0_i32_0 = arith.constant 0 : i32
    %c0_i32_1 = arith.constant 0 : i32
    return %c0_i32, %c0_i32_0 : i32, i32
  }
  func.func @transform_9(%arg0: i32) -> (i32, i32) {
    %c0_i32 = arith.constant 0 : i32
    %c0_i32_0 = arith.constant 0 : i32
    %c0_i32_1 = arith.constant 0 : i32
    return %c0_i32, %c0_i32_0 : i32, i32
  }
  func.func @transform_10(%arg0: i32) -> (i32, i32) {
    %c0_i32 = arith.constant 0 : i32
    %c0_i32_0 = arith.constant 0 : i32
    %c0_i32_1 = arith.constant 0 : i32
    return %c0_i32, %c0_i32_0 : i32, i32
  }
  func.func @transform_11(%arg0: i32) -> (i32, i32) {
    %c0_i32 = arith.constant 0 : i32
    %c0_i32_0 = arith.constant 0 : i32
    %c0_i32_1 = arith.constant 0 : i32
    return %c0_i32, %c0_i32_0 : i32, i32
  }
  func.func @transform_12(%arg0: i32) -> (i32, i32) {
    %c0_i32 = arith.constant 0 : i32
    %c0_i32_0 = arith.constant 0 : i32
    %c0_i32_1 = arith.constant 0 : i32
    return %c0_i32, %c0_i32_0 : i32, i32
  }
  func.func @transform_13(%arg0: i32) -> (i32, i32) {
    %c0_i32 = arith.constant 0 : i32
    %c0_i32_0 = arith.constant 0 : i32
    %c0_i32_1 = arith.constant 0 : i32
    return %c0_i32, %c0_i32_0 : i32, i32
  }
  func.func @transform_14(%arg0: i32) -> (i32, i32) {
    %c0_i32 = arith.constant 0 : i32
    %c0_i32_0 = arith.constant 0 : i32
    %c0_i32_1 = arith.constant 0 : i32
    return %c0_i32, %c0_i32_0 : i32, i32
  }
}

module attributes {stable_mosaic.version = 11 : i64} {
  func.func @gcn_sag_layer_kernel(%arg0: i32, %arg1: memref<4x1xi32, #tpu.memory_space<vmem>>, %arg2: memref<1x4xi32, #tpu.memory_space<vmem>>, %arg3: memref<8x8xf32, #tpu.memory_space<vmem>>, %arg4: memref<8x128xf32, #tpu.memory_space<vmem>>, %arg5: memref<128x128xf32, #tpu.memory_space<vmem>>, %arg6: memref<1x128xf32, #tpu.memory_space<vmem>>, %arg7: memref<128x128xf32, #tpu.memory_space<vmem>>, %arg8: memref<1x128xf32, #tpu.memory_space<vmem>>, %arg9: memref<1x128xf32, #tpu.memory_space<vmem>>, %arg10: memref<1x128xf32, #tpu.memory_space<vmem>>, %arg11: memref<128x2xf32, #tpu.memory_space<vmem>>, %arg12: memref<1x1xf32, #tpu.memory_space<vmem>>, %arg13: memref<4x128xf32, #tpu.memory_space<vmem>>, %arg14: memref<1x4xf32, #tpu.memory_space<vmem>>, %arg15: memref<4x4xf32, #tpu.memory_space<vmem>>) attributes {dimension_semantics = [#tpu.dimension_semantics<arbitrary>], iteration_bounds = array<i64: 1>, scalar_prefetch = 0 : i64, scratch_operands = 0 : i64, tpu.core_type = #tpu.core_type<tc>, window_params = [{pipeline_mode = #tpu.pipeline_mode<synchronous>, transform_indices = @transform_0, window_bounds = array<i64: 4, 1>}, {pipeline_mode = #tpu.pipeline_mode<synchronous>, transform_indices = @transform_1, window_bounds = array<i64: 1, 4>}, {pipeline_mode = #tpu.pipeline_mode<synchronous>, transform_indices = @transform_2, window_bounds = array<i64: 8, 8>}, {pipeline_mode = #tpu.pipeline_mode<synchronous>, transform_indices = @transform_3, window_bounds = array<i64: 8, 128>}, {pipeline_mode = #tpu.pipeline_mode<synchronous>, transform_indices = @transform_4, window_bounds = array<i64: 128, 128>}, {pipeline_mode = #tpu.pipeline_mode<synchronous>, transform_indices = @transform_5, window_bounds = array<i64: 1, 128>}, {pipeline_mode = #tpu.pipeline_mode<synchronous>, transform_indices = @transform_6, window_bounds = array<i64: 128, 128>}, {pipeline_mode = #tpu.pipeline_mode<synchronous>, transform_indices = @transform_7, window_bounds = array<i64: 1, 128>}, {pipeline_mode = #tpu.pipeline_mode<synchronous>, transform_indices = @transform_8, window_bounds = array<i64: 1, 128>}, {pipeline_mode = #tpu.pipeline_mode<synchronous>, transform_indices = @transform_9, window_bounds = array<i64: 1, 128>}, {pipeline_mode = #tpu.pipeline_mode<synchronous>, transform_indices = @transform_10, window_bounds = array<i64: 128, 2>}, {pipeline_mode = #tpu.pipeline_mode<synchronous>, transform_indices = @transform_11, window_bounds = array<i64: 1, 1>}, {pipeline_mode = #tpu.pipeline_mode<synchronous>, transform_indices = @transform_12, window_bounds = array<i64: 4, 128>}, {pipeline_mode = #tpu.pipeline_mode<synchronous>, transform_indices = @transform_13, window_bounds = array<i64: 1, 4>}, {pipeline_mode = #tpu.pipeline_mode<synchronous>, transform_indices = @transform_14, window_bounds = array<i64: 4, 4>}]} {
    %0 = tpu.iota {dimensions = array<i32: 1>} : vector<4x8xi32>
    %1 = tpu.iota {dimensions = array<i32: 0>} : vector<8x4xi32>
    %c0 = arith.constant 0 : index
    %c0_0 = arith.constant 0 : index
    %2 = vector.load %arg1[%c0, %c0_0] : memref<4x1xi32, #tpu.memory_space<vmem>>, vector<4x1xi32>
    %3 = vector.broadcast %2 : vector<4x1xi32> to vector<4x8xi32>
    %4 = arith.cmpi eq, %0, %3 : vector<4x8xi32>
    %5 = arith.extui %4 : vector<4x8xi1> to vector<4x8xi32>
    %6 = arith.sitofp %5 : vector<4x8xi32> to vector<4x8xf32>
    %c0_1 = arith.constant 0 : index
    %c0_2 = arith.constant 0 : index
    %7 = vector.load %arg2[%c0_1, %c0_2] : memref<1x4xi32, #tpu.memory_space<vmem>>, vector<1x4xi32>
    %8 = vector.broadcast %7 : vector<1x4xi32> to vector<8x4xi32>
    %9 = arith.cmpi eq, %1, %8 : vector<8x4xi32>
    %10 = arith.extui %9 : vector<8x4xi1> to vector<8x4xi32>
    %11 = arith.sitofp %10 : vector<8x4xi32> to vector<8x4xf32>
    %c0_3 = arith.constant 0 : index
    %c0_4 = arith.constant 0 : index
    %12 = vector.load %arg4[%c0_3, %c0_4] : memref<8x128xf32, #tpu.memory_space<vmem>>, vector<8x128xf32>
    %cst = arith.constant dense<0.000000e+00> : vector<4x128xf32>
    %13 = tpu.matmul %6, %12, %cst {dimension_numbers = #tpu.dot_dimension_numbers<[1], [0], [0], [1], [0, 0, 1, 1], [], []>} : vector<4x8xf32>, vector<8x128xf32>, vector<4x128xf32> -> vector<4x128xf32>
    %c0_5 = arith.constant 0 : index
    %c0_6 = arith.constant 0 : index
    %14 = vector.load %arg3[%c0_5, %c0_6] : memref<8x8xf32, #tpu.memory_space<vmem>>, vector<8x8xf32>
    %cst_7 = arith.constant dense<0.000000e+00> : vector<4x8xf32>
    %15 = tpu.matmul %6, %14, %cst_7 {dimension_numbers = #tpu.dot_dimension_numbers<[1], [0], [0], [1], [0, 0, 1, 1], [], []>} : vector<4x8xf32>, vector<8x8xf32>, vector<4x8xf32> -> vector<4x8xf32>
    %cst_8 = arith.constant dense<0.000000e+00> : vector<4x4xf32>
    %16 = tpu.matmul %15, %11, %cst_8 {dimension_numbers = #tpu.dot_dimension_numbers<[1], [0], [0], [1], [0, 0, 1, 1], [], []>} : vector<4x8xf32>, vector<8x4xf32>, vector<4x4xf32> -> vector<4x4xf32>
    %c0_9 = arith.constant 0 : index
    %c0_10 = arith.constant 0 : index
    %17 = vector.load %arg15[%c0_9, %c0_10] : memref<4x4xf32, #tpu.memory_space<vmem>>, vector<4x4xf32>
    tpu.vector_store %arg15[%c0_9, %c0_10], %16 {strides = array<i32>} : memref<4x4xf32, #tpu.memory_space<vmem>>, vector<4x4xf32>,
    %cst_11 = arith.constant dense<0.000000e+00> : vector<4xf32>
    %18 = vector.multi_reduction <add>, %16, %cst_11 [1] : vector<4x4xf32> to vector<4xf32>
    %19 = vector.shape_cast %18 : vector<4xf32> to vector<4x1xf32>
    %cst_12 = arith.constant 1.000000e+00 : f32
    %20 = vector.broadcast %cst_12 : f32 to vector<4x1xf32>
    %21 = arith.addf %19, %20 : vector<4x1xf32>
    %22 = math.rsqrt %21 : vector<4x1xf32>
    %c0_13 = arith.constant 0 : index
    %c0_14 = arith.constant 0 : index
    %23 = vector.load %arg5[%c0_13, %c0_14] : memref<128x128xf32, #tpu.memory_space<vmem>>, vector<128x128xf32>
    %cst_15 = arith.constant dense<0.000000e+00> : vector<4x128xf32>
    %24 = tpu.matmul %13, %23, %cst_15 {dimension_numbers = #tpu.dot_dimension_numbers<[1], [0], [0], [1], [0, 0, 1, 1], [], []>} : vector<4x128xf32>, vector<128x128xf32>, vector<4x128xf32> -> vector<4x128xf32>
    %25 = vector.broadcast %22 : vector<4x1xf32> to vector<4x128xf32>
    %26 = arith.mulf %25, %24 : vector<4x128xf32>
    %cst_16 = arith.constant dense<0.000000e+00> : vector<4x128xf32>
    %27 = tpu.matmul %16, %26, %cst_16 {dimension_numbers = #tpu.dot_dimension_numbers<[1], [0], [0], [1], [0, 0, 1, 1], [], []>} : vector<4x4xf32>, vector<4x128xf32>, vector<4x128xf32> -> vector<4x128xf32>
    %28 = arith.addf %27, %26 : vector<4x128xf32>
    %29 = vector.broadcast %22 : vector<4x1xf32> to vector<4x128xf32>
    %30 = arith.mulf %29, %28 : vector<4x128xf32>
    %c0_17 = arith.constant 0 : index
    %c0_18 = arith.constant 0 : index
    %31 = vector.load %arg6[%c0_17, %c0_18] : memref<1x128xf32, #tpu.memory_space<vmem>>, vector<1x128xf32>
    %32 = vector.broadcast %31 : vector<1x128xf32> to vector<4x128xf32>
    %33 = arith.addf %30, %32 : vector<4x128xf32>
    %c0_19 = arith.constant 0 : index
    %c0_20 = arith.constant 0 : index
    %34 = vector.load %arg7[%c0_19, %c0_20] : memref<128x128xf32, #tpu.memory_space<vmem>>, vector<128x128xf32>
    %cst_21 = arith.constant dense<0.000000e+00> : vector<4x128xf32>
    %35 = tpu.matmul %33, %34, %cst_21 {dimension_numbers = #tpu.dot_dimension_numbers<[1], [0], [0], [1], [0, 0, 1, 1], [], []>} : vector<4x128xf32>, vector<128x128xf32>, vector<4x128xf32> -> vector<4x128xf32>
    %c0_22 = arith.constant 0 : index
    %c0_23 = arith.constant 0 : index
    %36 = vector.load %arg8[%c0_22, %c0_23] : memref<1x128xf32, #tpu.memory_space<vmem>>, vector<1x128xf32>
    %37 = vector.broadcast %36 : vector<1x128xf32> to vector<4x128xf32>
    %38 = arith.addf %35, %37 : vector<4x128xf32>
    %cst_24 = arith.constant 0.000000e+00 : f32
    %39 = vector.broadcast %cst_24 : f32 to vector<4x128xf32>
    %40 = arith.maximumf %38, %39 : vector<4x128xf32>
    %cst_25 = arith.constant dense<0.000000e+00> : vector<128xf32>
    %41 = vector.multi_reduction <add>, %40, %cst_25 [0] : vector<4x128xf32> to vector<128xf32>
    %42 = vector.shape_cast %41 : vector<128xf32> to vector<1x128xf32>
    %cst_26 = arith.constant 4.000000e+00 : f32
    %43 = vector.broadcast %cst_26 : f32 to vector<1x128xf32>
    %44 = arith.divf %42, %43 : vector<1x128xf32>
    %45 = vector.broadcast %44 : vector<1x128xf32> to vector<4x128xf32>
    %46 = arith.subf %40, %45 : vector<4x128xf32>
    %47 = vector.broadcast %44 : vector<1x128xf32> to vector<4x128xf32>
    %48 = arith.subf %40, %47 : vector<4x128xf32>
    %49 = arith.mulf %46, %48 : vector<4x128xf32>
    %cst_27 = arith.constant dense<0.000000e+00> : vector<128xf32>
    %50 = vector.multi_reduction <add>, %49, %cst_27 [0] : vector<4x128xf32> to vector<128xf32>
    %51 = vector.shape_cast %50 : vector<128xf32> to vector<1x128xf32>
    %cst_28 = arith.constant 4.000000e+00 : f32
    %52 = vector.broadcast %cst_28 : f32 to vector<1x128xf32>
    %53 = arith.divf %51, %52 : vector<1x128xf32>
    %54 = vector.broadcast %44 : vector<1x128xf32> to vector<4x128xf32>
    %55 = arith.subf %40, %54 : vector<4x128xf32>
    %cst_29 = arith.constant 9.99999974E-6 : f32
    %56 = vector.broadcast %cst_29 : f32 to vector<1x128xf32>
    %57 = arith.addf %53, %56 : vector<1x128xf32>
    %58 = math.rsqrt %57 : vector<1x128xf32>
    %59 = vector.broadcast %58 : vector<1x128xf32> to vector<4x128xf32>
    %60 = arith.mulf %55, %59 : vector<4x128xf32>
    %c0_30 = arith.constant 0 : index
    %c0_31 = arith.constant 0 : index
    %61 = vector.load %arg9[%c0_30, %c0_31] : memref<1x128xf32, #tpu.memory_space<vmem>>, vector<1x128xf32>
    %62 = vector.broadcast %61 : vector<1x128xf32> to vector<4x128xf32>
    %63 = arith.mulf %60, %62 : vector<4x128xf32>
    %c0_32 = arith.constant 0 : index
    %c0_33 = arith.constant 0 : index
    %64 = vector.load %arg10[%c0_32, %c0_33] : memref<1x128xf32, #tpu.memory_space<vmem>>, vector<1x128xf32>
    %65 = vector.broadcast %64 : vector<1x128xf32> to vector<4x128xf32>
    %66 = arith.addf %63, %65 : vector<4x128xf32>
    %c0_34 = arith.constant 0 : index
    %c0_35 = arith.constant 0 : index
    %67 = vector.load %arg11[%c0_34, %c0_35] : memref<128x2xf32, #tpu.memory_space<vmem>>, vector<128x2xf32>
    %cst_36 = arith.constant dense<0.000000e+00> : vector<4x2xf32>
    %68 = tpu.matmul %66, %67, %cst_36 {dimension_numbers = #tpu.dot_dimension_numbers<[1], [0], [0], [1], [0, 0, 1, 1], [], []>} : vector<4x128xf32>, vector<128x2xf32>, vector<4x2xf32> -> vector<4x2xf32>
    %cst_37 = arith.constant dense<0.000000e+00> : vector<4x2xf32>
    %69 = tpu.matmul %16, %68, %cst_37 {dimension_numbers = #tpu.dot_dimension_numbers<[1], [0], [0], [1], [0, 0, 1, 1], [], []>} : vector<4x4xf32>, vector<4x2xf32>, vector<4x2xf32> -> vector<4x2xf32>
    %70 = vector.extract_strided_slice %68 {offsets = [0, 0], sizes = [4, 1], strides = [1, 1]} : vector<4x2xf32> to vector<4x1xf32>
    %71 = vector.extract_strided_slice %69 {offsets = [0, 1], sizes = [4, 1], strides = [1, 1]} : vector<4x2xf32> to vector<4x1xf32>
    %72 = arith.addf %70, %71 : vector<4x1xf32>
    %c0_38 = arith.constant 0 : index
    %c0_39 = arith.constant 0 : index
    %73 = vector.load %arg12[%c0_38, %c0_39] : memref<1x1xf32, #tpu.memory_space<vmem>>, vector<1x1xf32>
    %74 = vector.broadcast %73 : vector<1x1xf32> to vector<4x1xf32>
    %75 = arith.addf %72, %74 : vector<4x1xf32>
    %76 = math.tanh %75 : vector<4x1xf32>
    %77 = vector.broadcast %76 : vector<4x1xf32> to vector<4x128xf32>
    %78 = arith.mulf %66, %77 : vector<4x128xf32>
    %c0_40 = arith.constant 0 : index
    %c0_41 = arith.constant 0 : index
    %79 = vector.load %arg13[%c0_40, %c0_41] : memref<4x128xf32, #tpu.memory_space<vmem>>, vector<4x128xf32>
    tpu.vector_store %arg13[%c0_40, %c0_41], %78 {strides = array<i32>} : memref<4x128xf32, #tpu.memory_space<vmem>>, vector<4x128xf32>,
    %80 = tpu.iota {dimensions = array<i32: 0>} : vector<4x4xi32>
    %81 = tpu.iota {dimensions = array<i32: 1>} : vector<4x4xi32>
    %82 = arith.cmpi eq, %80, %81 : vector<4x4xi32>
    %cst_42 = arith.constant 0.000000e+00 : f32
    %83 = vector.shape_cast %76 : vector<4x1xf32> to vector<4x1xf32>
    %84 = vector.broadcast %83 : vector<4x1xf32> to vector<4x4xf32>
    %85 = vector.broadcast %cst_42 : f32 to vector<4x4xf32>
    %86 = arith.select %82, %84, %85 : vector<4x4xi1>, vector<4x4xf32>
    %cst_43 = arith.constant dense<0.000000e+00> : vector<4xf32>
    %87 = vector.multi_reduction <add>, %86, %cst_43 [0] : vector<4x4xf32> to vector<4xf32>
    %88 = vector.shape_cast %87 : vector<4xf32> to vector<1x4xf32>
    %c0_44 = arith.constant 0 : index
    %c0_45 = arith.constant 0 : index
    %89 = vector.load %arg14[%c0_44, %c0_45] : memref<1x4xf32, #tpu.memory_space<vmem>>, vector<1x4xf32>
    tpu.vector_store %arg14[%c0_44, %c0_45], %88 {strides = array<i32>} : memref<1x4xf32, #tpu.memory_space<vmem>>, vector<1x4xf32>,
    return
  }
  func.func @transform_0(%arg0: i32) -> (i32, i32) {
    %c0_i32 = arith.constant 0 : i32
    %c0_i32_0 = arith.constant 0 : i32
    %c0_i32_1 = arith.constant 0 : i32
    return %c0_i32, %c0_i32_0 : i32, i32
  }
  func.func @transform_1(%arg0: i32) -> (i32, i32) {
    %c0_i32 = arith.constant 0 : i32
    %c0_i32_0 = arith.constant 0 : i32
    %c0_i32_1 = arith.constant 0 : i32
    return %c0_i32, %c0_i32_0 : i32, i32
  }
  func.func @transform_2(%arg0: i32) -> (i32, i32) {
    %c0_i32 = arith.constant 0 : i32
    %c0_i32_0 = arith.constant 0 : i32
    %c0_i32_1 = arith.constant 0 : i32
    return %c0_i32, %c0_i32_0 : i32, i32
  }
  func.func @transform_3(%arg0: i32) -> (i32, i32) {
    %c0_i32 = arith.constant 0 : i32
    %c0_i32_0 = arith.constant 0 : i32
    %c0_i32_1 = arith.constant 0 : i32
    return %c0_i32, %c0_i32_0 : i32, i32
  }
  func.func @transform_4(%arg0: i32) -> (i32, i32) {
    %c0_i32 = arith.constant 0 : i32
    %c0_i32_0 = arith.constant 0 : i32
    %c0_i32_1 = arith.constant 0 : i32
    return %c0_i32, %c0_i32_0 : i32, i32
  }
  func.func @transform_5(%arg0: i32) -> (i32, i32) {
    %c0_i32 = arith.constant 0 : i32
    %c0_i32_0 = arith.constant 0 : i32
    %c0_i32_1 = arith.constant 0 : i32
    return %c0_i32, %c0_i32_0 : i32, i32
  }
  func.func @transform_6(%arg0: i32) -> (i32, i32) {
    %c0_i32 = arith.constant 0 : i32
    %c0_i32_0 = arith.constant 0 : i32
    %c0_i32_1 = arith.constant 0 : i32
    return %c0_i32, %c0_i32_0 : i32, i32
  }
  func.func @transform_7(%arg0: i32) -> (i32, i32) {
    %c0_i32 = arith.constant 0 : i32
    %c0_i32_0 = arith.constant 0 : i32
    %c0_i32_1 = arith.constant 0 : i32
    return %c0_i32, %c0_i32_0 : i32, i32
  }
  func.func @transform_8(%arg0: i32) -> (i32, i32) {
    %c0_i32 = arith.constant 0 : i32
    %c0_i32_0 = arith.constant 0 : i32
    %c0_i32_1 = arith.constant 0 : i32
    return %c0_i32, %c0_i32_0 : i32, i32
  }
  func.func @transform_9(%arg0: i32) -> (i32, i32) {
    %c0_i32 = arith.constant 0 : i32
    %c0_i32_0 = arith.constant 0 : i32
    %c0_i32_1 = arith.constant 0 : i32
    return %c0_i32, %c0_i32_0 : i32, i32
  }
  func.func @transform_10(%arg0: i32) -> (i32, i32) {
    %c0_i32 = arith.constant 0 : i32
    %c0_i32_0 = arith.constant 0 : i32
    %c0_i32_1 = arith.constant 0 : i32
    return %c0_i32, %c0_i32_0 : i32, i32
  }
  func.func @transform_11(%arg0: i32) -> (i32, i32) {
    %c0_i32 = arith.constant 0 : i32
    %c0_i32_0 = arith.constant 0 : i32
    %c0_i32_1 = arith.constant 0 : i32
    return %c0_i32, %c0_i32_0 : i32, i32
  }
  func.func @transform_12(%arg0: i32) -> (i32, i32) {
    %c0_i32 = arith.constant 0 : i32
    %c0_i32_0 = arith.constant 0 : i32
    %c0_i32_1 = arith.constant 0 : i32
    return %c0_i32, %c0_i32_0 : i32, i32
  }
  func.func @transform_13(%arg0: i32) -> (i32, i32) {
    %c0_i32 = arith.constant 0 : i32
    %c0_i32_0 = arith.constant 0 : i32
    %c0_i32_1 = arith.constant 0 : i32
    return %c0_i32, %c0_i32_0 : i32, i32
  }
  func.func @transform_14(%arg0: i32) -> (i32, i32) {
    %c0_i32 = arith.constant 0 : i32
    %c0_i32_0 = arith.constant 0 : i32
    %c0_i32_1 = arith.constant 0 : i32
    return %c0_i32, %c0_i32_0 : i32, i32
  }
}

</mosaic_0001>

<bundles_post_ra>
// kernel: gcn_forward.6
= control target key start
LH: loop header
LB: loop body
LE: loop exit
PB: predicated region body
PF: predicated region fallthrough
CT: control target
= control target key end

     0   :  { %v1107_v0 = vmov 0   ;;  %v1108_v2 = vmov 0.0|0.0   ;;  %vm1109_vm0 = vmmov 0   ;;  %v1110_v6 = vmov 0.0   ;;  %s1443_s0 = inlined_call_operand.vmem [shape: s32[8,1], index: 0, kind: input, shape index: {}]   ;;  %s1444_s3 = inlined_call_operand.vmem [shape: f32[16,128], index: 3, kind: input, shape index: {}]   ;;  %s1445_s4 = inlined_call_operand.vmem [shape: f32[128,128], index: 4, kind: input, shape index: {}]   ;;  %s1446_s2 = inlined_call_operand.vmem [shape: f32[16,16], index: 2, kind: input, shape index: {}]   ;;  %s1447_s1 = inlined_call_operand.vmem [shape: s32[1,8], index: 1, kind: input, shape index: {}]   ;;  %s1448_s14 = inlined_call_operand.vmem [shape: f32[8,8], index: 14, kind: output, shape index: {2}]   ;;  %s1449_s6 = inlined_call_operand.vmem [shape: f32[128,128], index: 6, kind: input, shape index: {}]   ;;  %s1450_s5 = inlined_call_operand.vmem [shape: f32[1,128], index: 5, kind: input, shape index: {}]   ;;  %s1451_s10 = inlined_call_operand.vmem [shape: f32[128,2], index: 10, kind: input, shape index: {}]   ;;  %s1452_s7 = inlined_call_operand.vmem [shape: f32[1,128], index: 7, kind: input, shape index: {}]   ;;  %s1453_s8 = inlined_call_operand.vmem [shape: f32[1,128], index: 8, kind: input, shape index: {}]   ;;  %s1454_s9 = inlined_call_operand.vmem [shape: f32[1,128], index: 9, kind: input, shape index: {}]   ;;  %s1455_s11 = inlined_call_operand.<no memory space> [shape: f32[1,1], index: 11, kind: input, shape index: {}]   ;;  %s1456_s12 = inlined_call_operand.vmem [shape: f32[8,128], index: 12, kind: output, shape index: {0}]   ;;  %s1457_s13 = inlined_call_operand.vmem [shape: f32[1,8], index: 13, kind: output, shape index: {1}]  }
   0x1   :  { %1099 = vset.pattern.permute.xlu0 %v1107_v0  ;;  %v51_v1 = vld [vmem:[%s1443_s0] sm:$0xff]  ;;  %1012 = vmatprep.subr.bf16.mxu0 %v1108_v2  ;;  %v70_v4 = vld [vmem:[%s1444_s3 + $0x8] sm:$0xff]  ;;  %v299_v9 = vld [vmem:[%s1445_s4 + $0x10] sm:$0xff]  ;;  %v46_v31 = vlaneseq  ;;  %vm71_vm1 = vcmask 130048   ;;  %v1111_v41 = vmov 1.0|1.0  }
   0x2   :  { %v69_v3 = vld [vmem:[%s1444_s3] sm:$0xff]  ;;  %53 = vperm.xlu0 %1099, %v51_v1   ;;  %1021 = vmatprep.subr.bf16.mxu1 %v1108_v2  ;;  %v298_v8 = vld [vmem:[%s1445_s4 + $0x8] sm:$0xff]  ;;  %v300_v11 = vld [vmem:[%s1445_s4 + $0x18] sm:$0xff]  ;;  %vm290_vm6 = vcmask 64512   ;;  %vm782_vm8 = vcmask 57344  }
   0x3   :  { %v1013_v5 = vpack.c.bf16 %v70_v4, %v69_v3  ;;  %880 = vmatprep.mubr.msk.f32.mxu0 %vm1109_vm0, %v1110_v6  ;;  %929 = vmatprep.mubr.msk.f32.mxu1 %vm1109_vm0, %v1110_v6  ;;  %v297_v7 = vld [vmem:[%s1445_s4] sm:$0xff]  ;;  %v1025_v12 = vpack.c.bf16 %v300_v11, %v299_v9  ;;  %v302_v14 = vld [vmem:[%s1445_s4 + $0x28] sm:$0xff]  ;;  %v303_v16 = vld [vmem:[%s1445_s4 + $0x30] sm:$0xff]  ;;  %v1260_v32 = vand.u32 127, %v46_v31  ;;  %v1277_v38 = vshrl.u32 %v46_v31, 7 }
   0x4   :  { %1100 = vset.pattern.permute.xlu1 %v1107_v0  ;;  %v1022_v10 = vpack.c.bf16 %v298_v8, %v297_v7  ;;  %v301_v13 = vld [vmem:[%s1445_s4 + $0x20] sm:$0xff]  ;;  %v304_v17 = vld [vmem:[%s1445_s4 + $0x38] sm:$0xff]  ;;  %v306_v20 = vld [vmem:[%s1445_s4 + $0x48] sm:$0xff] }
   0x5   :  { %1014 = vmatpush3.bf16.msra.mxu0 %v1013_v5  ;;  %v1028_v15 = vpack.c.bf16 %v302_v14, %v301_v13  ;;  %v1031_v18 = vpack.c.bf16 %v304_v17, %v303_v16  ;;  %v305_v19 = vld [vmem:[%s1445_s4 + $0x40] sm:$0xff]  ;;  %v307_v22 = vld [vmem:[%s1445_s4 + $0x50] sm:$0xff]  ;;  %v308_v23 = vld [vmem:[%s1445_s4 + $0x58] sm:$0xff]  ;;  %v50_v39 = vadd.s32 8, %v1277_v38  ;;  %vm773_vm7 = vcmp.eq.s32.totalorder %v1277_v38, %v1260_v32 }
   0x6   :  { %1015 = vmatprep.subr.bf16.mxu0 %v1108_v2  ;;  %1023 = vmatpush3.bf16.msra.mxu1 %v1022_v10  ;;  %v1034_v21 = vpack.c.bf16 %v306_v20, %v305_v19  ;;  %v1037_v24 = vpack.c.bf16 %v308_v23, %v307_v22  ;;  %v309_v25 = vld [vmem:[%s1445_s4 + $0x60] sm:$0xff]  ;;  %v310_v26 = vld [vmem:[%s1445_s4 + $0x68] sm:$0xff]  ;;  %v311_v28 = vld [vmem:[%s1445_s4 + $0x70] sm:$0xff] }
   0x7   :  { %1024 = vmatprep.subr.bf16.mxu1 %v1108_v2  ;;  %v1040_v27 = vpack.c.bf16 %v310_v26, %v309_v25  ;;  %v312_v29 = vld [vmem:[%s1445_s4 + $0x78] sm:$0xff]  ;;  %v145_v33 = vld [vmem:[%s1446_s2] sm:$0xff]  ;;  %v146_v34 = vld [vmem:[%s1446_s2 + $0x8] sm:$0xff] }
   0x8   :  { %v1043_v30 = vpack.c.bf16 %v312_v29, %v311_v28  ;;  %v1016_v36 = vpack.c.bf16 %v146_v34, %v145_v33  ;;  %v797_v40 = vld [vmem:[%s1447_s1] ss:$0 sm:$0xff]  ;;  %v467_v54 = vld [vmem:[%s1449_s6 + $0x8] sm:$0xff]  ;;  %v468_v58 = vld [vmem:[%s1449_s6 + $0x10] sm:$0xff] }
   0x9   :  { %vm63_vm3 = vcmp.eq.s32.totalorder %v1277_v38, %v797_v40  ;;  %vm64_vm4 = vcmp.eq.s32.totalorder %v50_v39, %v797_v40  ;;  %v466_v53 = vld [vmem:[%s1449_s6] sm:$0xff]  ;;  %v469_v59 = vld [vmem:[%s1449_s6 + $0x18] sm:$0xff]  ;;  %v471_v62 = vld [vmem:[%s1449_s6 + $0x28] sm:$0xff] }
   0xa   :  { %1026 = vmatpush3.bf16.msra.mxu1 %v1025_v12  ;;  %vm1019_vm5 = vmpackc.low %vm64_vm4, %vm63_vm3  ;;  %v1046_v57 = vpack.c.bf16 %v467_v54, %v466_v53  ;;  %v1049_v60 = vpack.c.bf16 %v469_v59, %v468_v58  ;;  %v470_v61 = vld [vmem:[%s1449_s6 + $0x20] sm:$0xff]  ;;  %v472_v0 = vld [vmem:[%s1449_s6 + $0x30] sm:$0xff] }
   0xb   :  { %1027 = vmatprep.subr.bf16.mxu1 %v1108_v2  ;;  %v1052_v63 = vpack.c.bf16 %v471_v62, %v470_v61  ;;  %v473_v1 = vld [vmem:[%s1449_s6 + $0x38] sm:$0xff]  ;;  %v474_v4 = vld [vmem:[%s1449_s6 + $0x40] sm:$0xff]  ;;  %v475_v5 = vld [vmem:[%s1449_s6 + $0x48] sm:$0xff] }
   0xc   :  { %v1055_v3 = vpack.c.bf16 %v473_v1, %v472_v0  ;;  %v1058_v7 = vpack.c.bf16 %v475_v5, %v474_v4  ;;  %v476_v8 = vld [vmem:[%s1449_s6 + $0x50] sm:$0xff]  ;;  %v477_v9 = vld [vmem:[%s1449_s6 + $0x58] sm:$0xff]  ;;  %v478_v11 = vld [vmem:[%s1449_s6 + $0x60] sm:$0xff] }
   0xd   :  { %v1061_v10 = vpack.c.bf16 %v477_v9, %v476_v8  ;;  %v479_v12 = vld [vmem:[%s1449_s6 + $0x68] sm:$0xff]  ;;  %v480_v14 = vld [vmem:[%s1449_s6 + $0x70] sm:$0xff]  ;;  %v806_v20 = vld [vmem:[%s1450_s5] ss:$0 sm:$0xff] }
   0xe   :  { %1029 = vmatpush3.bf16.msra.mxu1 %v1028_v15  ;;  %v1064_v13 = vpack.c.bf16 %v479_v12, %v478_v11  ;;  %v481_v15 = vld [vmem:[%s1449_s6 + $0x78] sm:$0xff]  ;;  %v596_v23 = vld [vmem:[%s1451_s10] sm:$0xff]  ;;  %v598_v26 = vld [vmem:[%s1451_s10 + $0x10] sm:$0xff] }
   0xf   :  { %1030 = vmatprep.subr.bf16.mxu1 %v1108_v2  ;;  %v1067_v16 = vpack.c.bf16 %v481_v15, %v480_v14  ;;  %v600_v28 = vld [vmem:[%s1451_s10 + $0x20] sm:$0xff]  ;;  %v601_v29 = vld [vmem:[%s1451_s10 + $0x28] sm:$0xff]  ;;  %v602_v31 = vld [vmem:[%s1451_s10 + $0x30] sm:$0xff] }
  0x10   :  { %v603_v33 = vld [vmem:[%s1451_s10 + $0x38] sm:$0xff]  ;;  %v606_v39 = vld [vmem:[%s1451_s10 + $0x50] sm:$0xff]  ;;  %v808_v9 = vld [vmem:[%s1453_s8] ss:$0 sm:$0xff]  ;;  %s1112_s8 = smov 127  }
  0x11   :  { %v1079_v34 = vpack.c.bf16 %v603_v33, %v602_v31  ;;  %v607_v40 = vld [vmem:[%s1451_s10 + $0x58] sm:$0xff]  ;;  %v809_v11 = vld [vmem:[%s1454_s9] ss:$0 sm:$0xff] }
  0x12   :  { %1032 = vmatpush3.bf16.msra.mxu1 %v1031_v18 }
  0x13   :  { %1033 = vmatprep.subr.bf16.mxu1 %v1108_v2 }
  0x16   :  { %1035 = vmatpush3.bf16.msra.mxu1 %v1034_v21 }
  0x17   :  { %1036 = vmatprep.subr.bf16.mxu1 %v1108_v2 }
  0x1a   :  { %1038 = vmatpush3.bf16.msra.mxu1 %v1037_v24  ;;  %v597_v24 = vld [vmem:[%s1451_s10 + $0x8] sm:$0xff] }
  0x1b   :  { %1039 = vmatprep.subr.bf16.mxu1 %v1108_v2  ;;  %v1070_v25 = vpack.c.bf16 %v597_v24, %v596_v23 }
  0x1e   :  { %1041 = vmatpush3.bf16.msra.mxu1 %v1040_v27 }
  0x1f   :  { %1042 = vmatprep.subr.bf16.mxu1 %v1108_v2 }
  0x22   :  { %1044 = vmatpush3.bf16.msra.mxu1 %v1043_v30  ;;  %v1076_v30 = vpack.c.bf16 %v601_v29, %v600_v28 }
  0x23   :  { %1069 = vmatprep.subr.bf16.mxu1 %v1108_v2 }
  0x81   :  { %v54_v35 = vpop.permute.xlu0 %53 }
  0x82   :  { %vm55_vm2 = vcmp.eq.s32.totalorder %v1260_v32, %v54_v35  ;;  %v604_v35 = vld [vmem:[%s1451_s10 + $0x40] sm:$0xff] }
  0x83   :  { %v796_v37 = vsel %vm55_vm2, 1.0, %v1110_v6 }
  0x84   :  { %881 = vmatmul.mubr.msk.f32.vlgmr.msra.gmra.mrb[0].mxu0 %vm71_vm1, %v796_v37 }
  0x85   :  { %1017 = vmatpush3.bf16.msra.mxu0 %v1016_v36  ;;  %887 = vmatprep.mubr.msk.f32.mxu0 %vm1109_vm0, %v1110_v6  ;;  %v605_v36 = vld [vmem:[%s1451_s10 + $0x48] sm:$0xff] }
  0x86   :  { %1018 = vmatprep.subr.bf16.mxu0 %v1108_v2 }
  0x88   :  { %888 = vmatmul.mubr.msk.f32.vlgmr.msra.gmra.mrb[2].mxu0 %vm71_vm1, %v796_v37  ;;  %v1082_v37 = vpack.c.bf16 %v605_v36, %v604_v35 }
  0x89   :  { %894 = vmatprep.mubr.msk.f32.mxu0 %vm1109_vm0, %v1110_v6  ;;  %1020 = vmatpush3.bf16.msk.msra.mxu0 %vm1019_vm5, %v1111_v41  ;;  %v1085_v41 = vpack.c.bf16 %v607_v40, %v606_v39 }
  0x8a   :  { %932 = vmatprep.subr.mxu0 %v1110_v6 }
 0x157   :  { %v141_v42 = vpop.f32.mrb[0].mxu0 }
 0x158   :  { %v882_v43 = vpop.f32.mrb[1].mxu0  ;;  %930 = vmatmul.mubr.f32.vlgmr.msra.gmra.mrb[0].mxu1 %v141_v42  ;;  %v608_v42 = vld [vmem:[%s1451_s10 + $0x60] sm:$0xff] }
 0x159   :  { %1004 = vmatprep.mubr.msk.f32.mxu1 %vm1109_vm0, %v1110_v6  ;;  %1071 = vmatpush3.bf16.msra.mxu1 %v1070_v25  ;;  %v609_v43 = vld [vmem:[%s1451_s10 + $0x68] sm:$0xff] }
 0x15a   :  { %1072 = vmatprep.subr.bf16.mxu1 %v1108_v2 }
 0x15b   :  { %v213_v44 = vpop.f32.mrb[2].mxu0 }
 0x15c   :  { %v889_v45 = vpop.f32.mrb[3].mxu0  ;;  %895 = vmatmul.mubr.msk.f32.vlgmr.msra.gmra.mrb[4].mxu0 %vm71_vm1, %v213_v44  ;;  %v1088_v44 = vpack.c.bf16 %v609_v43, %v608_v42 }
 0x15d   :  { %934 = vmatprep.mubr.msk.f32.mxu0 %vm1109_vm0, %v1110_v6  ;;  %v610_v45 = vld [vmem:[%s1451_s10 + $0x70] sm:$0xff] }
 0x22b   :  { %v379_v46 = vpop.f32.mrb[0].mxu1 }
 0x22c   :  { %v931_v47 = vpop.f32.mrb[1].mxu1 }
 0x22f   :  { %v1290_v48 = vpop.f32.mrb[4].mxu0 }
 0x230   :  { %291 = vst.msk [vmem:[%s1448_s14] sm:$0xff] %vm290_vm6, %v1290_v48  ;;  %v896_v49 = vpop.f32.mrb[5].mxu0  ;;  %v292_v50 = vsel %vm290_vm6, %v1290_v48, 0.0 }
 0x231   :  { %293 = vadd.xlane.f32.xlu0 %v292_v50  ;;  %v807_v49 = vld [vmem:[%s1452_s7] ss:$0 sm:$0xff] }
 0x2be   :  { %v294_v51 = vpop.xlane.xlu0 %293 }
 0x2bf   :  { %v295_v52 = vadd.f32 1.0, %v294_v51 }
 0x2c1   :  { %1101 = vrsqrt.f32 %v295_v52 }
 0x2cb   :  { %v1102_v55 = vpop.eup %1101 }
 0x2cc   :  { %v383_v56 = vmul.f32 %v1102_v55, %v379_v46  ;;  %v611_v46 = vld [vmem:[%s1451_s10 + $0x78] sm:$0xff] }
 0x2cd   :  { %v1091_v47 = vpack.c.bf16 %v611_v46, %v610_v45 }
 0x2ce   :  { %933 = vmatpush3.msra.mxu0 %v383_v56 }
 0x2cf   :  { %935 = vmatmul.mubr.msk.f32.vlgmr.msra.gmra.mrb[6].mxu0 %vm290_vm6, %v1290_v48  ;;  %1045 = vmatprep.subr.bf16.mxu0 %v1108_v2 }
 0x2d0   :  { %1047 = vmatpush3.bf16.msra.mxu0 %v1046_v57  ;;  %969 = vmatprep.mubr.msk.f32.mxu0 %vm1109_vm0, %v1110_v6 }
 0x2d1   :  { %1048 = vmatprep.subr.bf16.mxu0 %v1108_v2 }
 0x2d4   :  { %1050 = vmatpush3.bf16.msra.mxu0 %v1049_v60 }
 0x2d5   :  { %1051 = vmatprep.subr.bf16.mxu0 %v1108_v2 }
 0x2d8   :  { %1053 = vmatpush3.bf16.msra.mxu0 %v1052_v63 }
 0x2d9   :  { %1054 = vmatprep.subr.bf16.mxu0 %v1108_v2 }
 0x2dc   :  { %1056 = vmatpush3.bf16.msra.mxu0 %v1055_v3 }
 0x2dd   :  { %1057 = vmatprep.subr.bf16.mxu0 %v1108_v2 }
 0x2e0   :  { %1059 = vmatpush3.bf16.msra.mxu0 %v1058_v7 }
 0x2e1   :  { %1060 = vmatprep.subr.bf16.mxu0 %v1108_v2 }
 0x2e4   :  { %1062 = vmatpush3.bf16.msra.mxu0 %v1061_v10 }
 0x2e5   :  { %1063 = vmatprep.subr.bf16.mxu0 %v1108_v2 }
 0x2e8   :  { %1065 = vmatpush3.bf16.msra.mxu0 %v1064_v13 }
 0x2e9   :  { %1066 = vmatprep.subr.bf16.mxu0 %v1108_v2 }
 0x2ec   :  { %1068 = vmatpush3.bf16.msra.mxu0 %v1067_v16  ;;  %v20_v16 = vstv %s1455_s11 }
 0x2ed   :  { %1007 = vmatprep.subr.mxu0 %v1110_v6  ;;  %21 = vst [vmem:[#allocation2] sm:$0x1] %v20_v16 }
 0x3a2   :  { %v453_v17 = vpop.f32.mrb[6].mxu0 }
 0x3a3   :  { %v454_v18 = vadd.f32 %v453_v17, %v383_v56  ;;  %v936_v19 = vpop.f32.mrb[7].mxu0 }
 0x3a4   :  { %v811_v19 = vld [vmem:[#allocation2] ss:$0 sm:$0xff] }
 0x3a5   :  { %v457_v21 = vmul.f32 %v1102_v55, %v454_v18 }
 0x3a7   :  { %v465_v22 = vadd.f32 %v806_v20, %v457_v21 }
 0x3a9   :  { %970 = vmatmul.mubr.f32.vlgmr.msra.gmra.mrb[8].mxu0 %v465_v22 }
 0x3aa   :  { %1009 = vmatprep.mubr.msk.f32.mxu0 %vm1109_vm0, %v1110_v6  ;;  %v599_v6 = vld [vmem:[%s1451_s10 + $0x18] sm:$0xff] }
 0x3ab   :  { %v1073_v27 = vpack.c.bf16 %v599_v6, %v598_v26 }
 0x3ad   :  { %1074 = vmatpush3.bf16.msra.mxu1 %v1073_v27 }
 0x3ae   :  { %1075 = vmatprep.subr.bf16.mxu1 %v1108_v2 }
 0x3b1   :  { %1077 = vmatpush3.bf16.msra.mxu1 %v1076_v30 }
 0x3b2   :  { %1078 = vmatprep.subr.bf16.mxu1 %v1108_v2 }
 0x3b5   :  { %1080 = vmatpush3.bf16.msra.mxu1 %v1079_v34 }
 0x3b6   :  { %1081 = vmatprep.subr.bf16.mxu1 %v1108_v2 }
 0x3b9   :  { %1083 = vmatpush3.bf16.msra.mxu1 %v1082_v37 }
 0x3ba   :  { %1084 = vmatprep.subr.bf16.mxu1 %v1108_v2 }
 0x3bd   :  { %1086 = vmatpush3.bf16.msra.mxu1 %v1085_v41 }
 0x3be   :  { %1087 = vmatprep.subr.bf16.mxu1 %v1108_v2 }
 0x3c1   :  { %1089 = vmatpush3.bf16.msra.mxu1 %v1088_v44 }
 0x3c2   :  { %1090 = vmatprep.subr.bf16.mxu1 %v1108_v2 }
 0x3c5   :  { %1092 = vmatpush3.bf16.msra.mxu1 %v1091_v47 }
 0x47c   :  { %v555_v50 = vpop.f32.mrb[8].mxu0 }
 0x47d   :  { %v556_v51 = vadd.f32 %v807_v49, %v555_v50  ;;  %v971_v52 = vpop.f32.mrb[9].mxu0 }
 0x47f   :  { %v559_v53 = vmax.f32 %v556_v51, 0.0 }
 0x481   :  { %v560_v54 = vrot.slane %v559_v53, 4 }
 0x483   :  { %v561_v2 = vadd.f32 %v560_v54, %v559_v53 }
 0x485   :  { %v562_v55 = vrot.slane %v561_v2, 2 }
 0x487   :  { %v563_v56 = vadd.f32 %v562_v55, %v561_v2 }
 0x489   :  { %v564_v57 = vrot.slane %v563_v56, 1 }
 0x48b   :  { %v565_v58 = vadd.f32 %v564_v57, %v563_v56 }
 0x48d   :  { %v567_v59 = vmul.f32 0.125, %v565_v58 }
 0x48f   :  { %v568_v60 = vsub.f32 %v559_v53, %v567_v59 }
 0x491   :  { %v569_v61 = vmul.f32 %v568_v60, %v568_v60 }
 0x493   :  { %v570_v62 = vrot.slane %v569_v61, 4 }
 0x495   :  { %v571_v63 = vadd.f32 %v570_v62, %v569_v61 }
 0x497   :  { %v572_v0 = vrot.slane %v571_v63, 2 }
 0x499   :  { %v573_v1 = vadd.f32 %v572_v0, %v571_v63 }
 0x49b   :  { %v574_v3 = vrot.slane %v573_v1, 1 }
 0x49d   :  { %v575_v4 = vadd.f32 %v574_v3, %v573_v1 }
 0x49f   :  { %v576_v5 = vmul.f32 0.125, %v575_v4 }
 0x4a1   :  { %v577_v7 = vadd.f32 1e-05, %v576_v5 }
 0x4a3   :  { %1103 = vrsqrt.f32 %v577_v7 }
 0x4ad   :  { %v1104_v8 = vpop.eup %1103 }
 0x4ae   :  { %v579_v10 = vmul.f32 %v1104_v8, %v568_v60 }
 0x4b0   :  { %v587_v12 = vmul.f32 %v808_v9, %v579_v10 }
 0x4b2   :  { %v595_v13 = vadd.f32 %v809_v11, %v587_v12 }
 0x4b4   :  { %1005 = vmatmul.mubr.f32.vlgmr.msra.gmra.mrb[2].mxu1 %v595_v13 }
 0x587   :  { %v678_v14 = vpop.f32.mrb[2].mxu1 }
 0x588   :  { %v1006_v15 = vpop.f32.mrb[3].mxu1  ;;  %1008 = vmatpush3.msra.mxu0 %v678_v14 }
 0x589   :  { %1010 = vmatmul.mubr.msk.f32.vlgmr.msra.gmra.mrb[10].mxu0 %vm290_vm6, %v1290_v48 }
 0x65c   :  { %v748_v17 = vpop.f32.mrb[10].mxu0 }
 0x65d   :  { %753 = vrot.lane.b32.xlu1 %v748_v17, %s1112_s8  ;;  %v1011_v18 = vpop.f32.mrb[11].mxu0 }
 0x6cf   :  { %v754_v20 = vpop.permute.xlu1 %753 }
 0x6d0   :  { %v756_v21 = vadd.f32 %v754_v20, %v678_v14 }
 0x6d2   :  { %v764_v22 = vadd.f32 %v811_v19, %v756_v21 }
 0x6d4   :  { %1105 = vtanh.f32 %v764_v22 }
 0x6de   :  { %v1106_v23 = vpop.eup %1105 }
 0x6df   :  { %768 = vperm.xlu1 %1100, %v1106_v23  }
 0x75e   :  { %v769_v48 = vpop.permute.xlu1 %768 }
 0x75f   :  { %v771_v24 = vmul.f32 %v769_v48, %v595_v13  ;;  %v774_v25 = vsel %vm773_vm7, %v769_v48, 0.0 }
 0x760   :  { %v775_v26 = vsel %vm290_vm6, %v774_v25, 0.0 }
 0x761   :  { %772 = vst [vmem:[%s1456_s12] sm:$0xff] %v771_v24  ;;  %v776_v6 = vrot.slane %v775_v26, 4 }
 0x763   :  { %v777_v27 = vadd.f32 %v776_v6, %v775_v26 }
 0x765   :  { %v778_v28 = vrot.slane %v777_v27, 2 }
 0x767   :  { %v779_v29 = vadd.f32 %v778_v28, %v777_v27 }
 0x769   :  { %v780_v30 = vrot.slane %v779_v29, 1 }
 0x76b   :  { %v781_v31 = vadd.f32 %v780_v30, %v779_v29 }
 0x76d   :  { %783 = vst.msk [vmem:[%s1457_s13] sm:$0x1] %vm782_vm8, %v781_v31 }

// kernel: gcn_forward.5
= control target key start
LH: loop header
LB: loop body
LE: loop exit
PB: predicated region body
PF: predicated region fallthrough
CT: control target
= control target key end

     0   :  { %v1300_v0 = vmov 0   ;;  %v46_v36 = vlaneseq  ;;  %vm88_vm0 = vcmask 261120   ;;  %v1301_v39 = vmov 0.0   ;;  %s1631_s0 = inlined_call_operand.vmem [shape: s32[16,1], index: 0, kind: input, shape index: {}]   ;;  %s1632_s3 = inlined_call_operand.vmem [shape: f32[32,128], index: 3, kind: input, shape index: {}]   ;;  %s1633_s2 = inlined_call_operand.vmem [shape: f32[32,32], index: 2, kind: input, shape index: {}]   ;;  %s1634_s4 = inlined_call_operand.vmem [shape: f32[128,128], index: 4, kind: input, shape index: {}]   ;;  %s1635_s1 = inlined_call_operand.vmem [shape: s32[1,16], index: 1, kind: input, shape index: {}]   ;;  %s1636_s14 = inlined_call_operand.vmem [shape: f32[16,16], index: 14, kind: output, shape index: {2}]   ;;  %s1637_s6 = inlined_call_operand.vmem [shape: f32[128,128], index: 6, kind: input, shape index: {}]   ;;  %s1638_s5 = inlined_call_operand.vmem [shape: f32[1,128], index: 5, kind: input, shape index: {}]   ;;  %s1639_s10 = inlined_call_operand.vmem [shape: f32[128,2], index: 10, kind: input, shape index: {}]   ;;  %s1640_s7 = inlined_call_operand.vmem [shape: f32[1,128], index: 7, kind: input, shape index: {}]   ;;  %s1641_s8 = inlined_call_operand.vmem [shape: f32[1,128], index: 8, kind: input, shape index: {}]   ;;  %s1642_s9 = inlined_call_operand.vmem [shape: f32[1,128], index: 9, kind: input, shape index: {}]   ;;  %s1643_s11 = inlined_call_operand.<no memory space> [shape: f32[1,1], index: 11, kind: input, shape index: {}]   ;;  %s1644_s12 = inlined_call_operand.vmem [shape: f32[16,128], index: 12, kind: output, shape index: {0}]   ;;  %s1645_s13 = inlined_call_operand.vmem [shape: f32[1,16], index: 13, kind: output, shape index: {1}]  }
   0x1   :  { %1289 = vset.pattern.permute.xlu0 %v1300_v0  ;;  %v53_v1 = vld [vmem:[%s1631_s0] sm:$0xff]  ;;  %v85_v3 = vld [vmem:[%s1632_s3 + $0x8] sm:$0xff]  ;;  %v86_v4 = vld [vmem:[%s1632_s3 + $0x10] sm:$0xff]  ;;  %v1302_v49 = vmov 1.0|1.0   ;;  %vm330_vm9 = vcmask 130048  }
   0x2   :  { %v84_v2 = vld [vmem:[%s1632_s3] sm:$0xff]  ;;  %56 = vperm.xlu0 %1289, %v53_v1   ;;  %v87_v5 = vld [vmem:[%s1632_s3 + $0x18] sm:$0xff]  ;;  %v54_v6 = vld [vmem:[%s1631_s0 + $0x8] sm:$0xff]  ;;  %v1451_v37 = vand.u32 127, %v46_v36  ;;  %v1465_v46 = vshrl.u32 %v46_v36, 7  ;;  %vm885_vm12 = vcmask 122880  }
   0x3   :  { %v1157_v7 = vpack.c.bf16 %v85_v3, %v84_v2  ;;  %v1161_v8 = vpack.c.bf16 %v87_v5, %v86_v4  ;;  %v170_v9 = vld [vmem:[%s1633_s2] sm:$0xff]  ;;  %v171_v10 = vld [vmem:[%s1633_s2 + $0x8] sm:$0xff]  ;;  %v345_v14 = vld [vmem:[%s1634_s4 + $0x10] sm:$0xff] }
   0x4   :  { %v1165_v11 = vpack.c.bf16 %v171_v10, %v170_v9  ;;  %v343_v12 = vld [vmem:[%s1634_s4] sm:$0xff]  ;;  %v344_v13 = vld [vmem:[%s1634_s4 + $0x8] sm:$0xff]  ;;  %v346_v16 = vld [vmem:[%s1634_s4 + $0x18] sm:$0xff]  ;;  %v1468_v47 = vadd.s32 8, %v1465_v46  ;;  %v51_v50 = vadd.s32 16, %v1465_v46  ;;  %v52_v51 = vadd.s32 24, %v1465_v46 }
   0x5   :  { %1158 = vmatprep.subr.bf16.mxu0 %v1157_v7  ;;  %v1181_v15 = vpack.c.bf16 %v344_v13, %v343_v12  ;;  %v1185_v17 = vpack.c.bf16 %v346_v16, %v345_v14  ;;  %v347_v18 = vld [vmem:[%s1634_s4 + $0x20] sm:$0xff]  ;;  %v348_v19 = vld [vmem:[%s1634_s4 + $0x28] sm:$0xff]  ;;  %v349_v21 = vld [vmem:[%s1634_s4 + $0x30] sm:$0xff]  ;;  %vm872_vm10 = vcmp.eq.s32.totalorder %v1465_v46, %v1451_v37 }
   0x6   :  { %59 = vperm.xlu0 %1289, %v54_v6   ;;  %1160 = vmatpush3.bf16.msra.mxu0 %v1157_v7  ;;  %v1189_v20 = vpack.c.bf16 %v348_v19, %v347_v18  ;;  %v350_v22 = vld [vmem:[%s1634_s4 + $0x38] sm:$0xff]  ;;  %v351_v24 = vld [vmem:[%s1634_s4 + $0x40] sm:$0xff]  ;;  %v352_v25 = vld [vmem:[%s1634_s4 + $0x48] sm:$0xff]  ;;  %vm873_vm11 = vcmp.eq.s32.totalorder %v1468_v47, %v1451_v37 }
   0x7   :  { %1162 = vmatprep.subr.bf16.mxu0 %v1161_v8  ;;  %1182 = vmatprep.subr.bf16.mxu1 %v1181_v15  ;;  %v1193_v23 = vpack.c.bf16 %v350_v22, %v349_v21  ;;  %v1197_v26 = vpack.c.bf16 %v352_v25, %v351_v24  ;;  %v353_v27 = vld [vmem:[%s1634_s4 + $0x50] sm:$0xff]  ;;  %v354_v28 = vld [vmem:[%s1634_s4 + $0x58] sm:$0xff]  ;;  %v355_v30 = vld [vmem:[%s1634_s4 + $0x60] sm:$0xff] }
   0x8   :  { %1184 = vmatpush3.bf16.msra.mxu1 %v1181_v15  ;;  %v1201_v29 = vpack.c.bf16 %v354_v28, %v353_v27  ;;  %v356_v31 = vld [vmem:[%s1634_s4 + $0x68] sm:$0xff]  ;;  %v357_v33 = vld [vmem:[%s1634_s4 + $0x70] sm:$0xff]  ;;  %v358_v34 = vld [vmem:[%s1634_s4 + $0x78] sm:$0xff] }
   0x9   :  { %1186 = vmatprep.subr.bf16.mxu1 %v1185_v17  ;;  %v1205_v32 = vpack.c.bf16 %v356_v31, %v355_v30  ;;  %v1209_v35 = vpack.c.bf16 %v358_v34, %v357_v33  ;;  %v172_v41 = vld [vmem:[%s1633_s2 + $0x10] sm:$0xff]  ;;  %v173_v42 = vld [vmem:[%s1633_s2 + $0x18] sm:$0xff]  ;;  %v901_v48 = vld [vmem:[%s1635_s1] ss:$0 sm:$0xff] }
   0xa   :  { %1164 = vmatpush3.bf16.msra.mxu0 %v1161_v8  ;;  %v1169_v44 = vpack.c.bf16 %v173_v42, %v172_v41  ;;  %vm72_vm3 = vcmp.eq.s32.totalorder %v1465_v46, %v901_v48  ;;  %vm73_vm4 = vcmp.eq.s32.totalorder %v1468_v47, %v901_v48  ;;  %vm74_vm6 = vcmp.eq.s32.totalorder %v51_v50, %v901_v48  ;;  %v528_v4 = vld [vmem:[%s1637_s6] sm:$0xff]  ;;  %v529_v5 = vld [vmem:[%s1637_s6 + $0x8] sm:$0xff]  ;;  %v530_v10 = vld [vmem:[%s1637_s6 + $0x10] sm:$0xff] }
   0xb   :  { %1166 = vmatprep.subr.bf16.mxu0 %v1165_v11  ;;  %vm1173_vm5 = vmpackc.low %vm73_vm4, %vm72_vm3  ;;  %vm75_vm7 = vcmp.eq.s32.totalorder %v52_v51, %v901_v48  ;;  %v1217_v9 = vpack.c.bf16 %v529_v5, %v528_v4  ;;  %v532_v13 = vld [vmem:[%s1637_s6 + $0x20] sm:$0xff]  ;;  %v533_v14 = vld [vmem:[%s1637_s6 + $0x28] sm:$0xff] }
   0xc   :  { %1188 = vmatpush3.bf16.msra.mxu1 %v1185_v17  ;;  %vm1177_vm8 = vmpackc.low %vm75_vm7, %vm74_vm6  ;;  %v1225_v15 = vpack.c.bf16 %v533_v14, %v532_v13  ;;  %v534_v16 = vld [vmem:[%s1637_s6 + $0x30] sm:$0xff]  ;;  %v535_v17 = vld [vmem:[%s1637_s6 + $0x38] sm:$0xff] }
   0xd   :  { %1190 = vmatprep.subr.bf16.mxu1 %v1189_v20  ;;  %v1229_v18 = vpack.c.bf16 %v535_v17, %v534_v16  ;;  %v536_v19 = vld [vmem:[%s1637_s6 + $0x40] sm:$0xff]  ;;  %v538_v22 = vld [vmem:[%s1637_s6 + $0x50] sm:$0xff]  ;;  %v672_v42 = vld [vmem:[%s1639_s10 + $0x8] sm:$0xff] }
   0xe   :  { %v540_v25 = vld [vmem:[%s1637_s6 + $0x60] sm:$0xff]  ;;  %v542_v28 = vld [vmem:[%s1637_s6 + $0x70] sm:$0xff]  ;;  %v676_v50 = vld [vmem:[%s1639_s10 + $0x28] sm:$0xff] }
   0xf   :  { %v918_v36 = vld [vmem:[%s1638_s5] ss:$0 sm:$0xff] }
  0x10   :  { %1192 = vmatpush3.bf16.msra.mxu1 %v1189_v20  ;;  %v537_v20 = vld [vmem:[%s1637_s6 + $0x48] sm:$0xff]  ;;  %v671_v41 = vld [vmem:[%s1639_s10] sm:$0xff] }
  0x11   :  { %1194 = vmatprep.subr.bf16.mxu1 %v1193_v23  ;;  %v1233_v21 = vpack.c.bf16 %v537_v20, %v536_v19  ;;  %v919_v4 = vld [vmem:[%s1640_s7] ss:$0 sm:$0xff] }
  0x14   :  { %1196 = vmatpush3.bf16.msra.mxu1 %v1193_v23  ;;  %v539_v23 = vld [vmem:[%s1637_s6 + $0x58] sm:$0xff] }
  0x15   :  { %1198 = vmatprep.subr.bf16.mxu1 %v1197_v26  ;;  %v1237_v24 = vpack.c.bf16 %v539_v23, %v538_v22 }
  0x18   :  { %1200 = vmatpush3.bf16.msra.mxu1 %v1197_v26  ;;  %v541_v26 = vld [vmem:[%s1637_s6 + $0x68] sm:$0xff] }
  0x19   :  { %1202 = vmatprep.subr.bf16.mxu1 %v1201_v29  ;;  %v1241_v27 = vpack.c.bf16 %v541_v26, %v540_v25 }
  0x1c   :  { %1204 = vmatpush3.bf16.msra.mxu1 %v1201_v29  ;;  %v543_v29 = vld [vmem:[%s1637_s6 + $0x78] sm:$0xff] }
  0x1d   :  { %1206 = vmatprep.subr.bf16.mxu1 %v1205_v32  ;;  %v1245_v30 = vpack.c.bf16 %v543_v29, %v542_v28 }
  0x20   :  { %1208 = vmatpush3.bf16.msra.mxu1 %v1205_v32 }
  0x21   :  { %1210 = vmatprep.subr.bf16.mxu1 %v1209_v35 }
  0x24   :  { %1212 = vmatpush3.bf16.msra.mxu1 %v1209_v35 }
  0x81   :  { %v57_v38 = vpop.permute.xlu0 %56 }
  0x82   :  { %vm61_vm1 = vcmp.eq.s32.totalorder %v1451_v37, %v57_v38 }
  0x83   :  { %v899_v40 = vsel %vm61_vm1, 1.0, %v1301_v39 }
  0x84   :  { %1013 = vmatprep.mubr.msk.f32.mxu0 %vm88_vm0, %v899_v40 }
  0x85   :  { %v60_v43 = vpop.permute.xlu0 %59 }
  0x86   :  { %vm62_vm2 = vcmp.eq.s32.totalorder %v1451_v37, %v60_v43  ;;  %v1249_v43 = vpack.c.bf16 %v672_v42, %v671_v41 }
  0x87   :  { %v900_v45 = vsel %vm62_vm2, 1.0, %v1301_v39 }
  0x88   :  { %1014 = vmatmul.mubr.msk.f32.vlgmr.msra.gmra.mrb[0].mxu0 %vm88_vm0, %v900_v45  ;;  %1250 = vmatprep.subr.bf16.mxu1 %v1249_v43 }
  0x89   :  { %1168 = vmatpush3.bf16.msra.mxu0 %v1165_v11  ;;  %1024 = vmatprep.mubr.msk.f32.mxu0 %vm88_vm0, %v899_v40  ;;  %v531_v11 = vld [vmem:[%s1637_s6 + $0x18] sm:$0xff] }
  0x8a   :  { %1170 = vmatprep.subr.bf16.mxu0 %v1169_v44  ;;  %v1221_v12 = vpack.c.bf16 %v531_v11, %v530_v10 }
  0x8d   :  { %1172 = vmatpush3.bf16.msra.mxu0 %v1169_v44  ;;  %v673_v44 = vld [vmem:[%s1639_s10 + $0x10] sm:$0xff] }
  0x8e   :  { %1174 = vmatprep.subr.msk.bf16.mxu0 %vm1173_vm5, %v1302_v49 }
  0x90   :  { %1025 = vmatmul.mubr.msk.f32.vlgmr.msra.gmra.mrb[2].mxu0 %vm88_vm0, %v900_v45  ;;  %v674_v45 = vld [vmem:[%s1639_s10 + $0x18] sm:$0xff] }
  0x91   :  { %1176 = vmatpush3.bf16.msk.msra.mxu0 %vm1173_vm5, %v1302_v49  ;;  %v1253_v48 = vpack.c.bf16 %v674_v45, %v673_v44  ;;  %v20_v45 = vstv %s1643_s11 }
  0x92   :  { %1178 = vmatprep.subr.msk.bf16.mxu0 %vm1177_vm8, %v1302_v49  ;;  %21 = vst [vmem:[#allocation2] sm:$0x1] %v20_v45 }
  0x95   :  { %1180 = vmatpush3.bf16.msk.msra.mxu0 %vm1177_vm8, %v1302_v49  ;;  %v675_v49 = vld [vmem:[%s1639_s10 + $0x20] sm:$0xff] }
  0x96   :  { %v1257_v51 = vpack.c.bf16 %v676_v50, %v675_v49 }
 0x15b   :  { %v1015_v52 = vpop.f32.mrb[0].mxu0 }
 0x15c   :  { %v161_v53 = vpop.f32.mrb[1].mxu0 }
 0x15d   :  { %1070 = vmatprep.mubr.f32.mxu1 %v161_v53  ;;  %v678_v53 = vld [vmem:[%s1639_s10 + $0x38] sm:$0xff] }
 0x15e   :  { %1071 = vmatmul.mubr.f32.vlgmr.msra.gmra.mrb[0].mxu1 %v1015_v52  ;;  %v677_v52 = vld [vmem:[%s1639_s10 + $0x30] sm:$0xff] }
 0x15f   :  { %1252 = vmatpush3.bf16.msra.mxu1 %v1249_v43 }
 0x160   :  { %1254 = vmatprep.subr.bf16.mxu1 %v1253_v48 }
 0x163   :  { %v1026_v54 = vpop.f32.mrb[2].mxu0  ;;  %1256 = vmatpush3.bf16.msra.mxu1 %v1253_v48 }
 0x164   :  { %v240_v55 = vpop.f32.mrb[3].mxu0  ;;  %1258 = vmatprep.subr.bf16.mxu1 %v1257_v51 }
 0x165   :  { %1035 = vmatprep.mubr.msk.f32.mxu0 %vm88_vm0, %v240_v55  ;;  %v679_v55 = vld [vmem:[%s1639_s10 + $0x40] sm:$0xff] }
 0x166   :  { %1036 = vmatmul.mubr.msk.f32.vlgmr.msra.gmra.mrb[4].mxu0 %vm88_vm0, %v1026_v54  ;;  %v1261_v54 = vpack.c.bf16 %v678_v53, %v677_v52 }
 0x167   :  { %1260 = vmatpush3.bf16.msra.mxu1 %v1257_v51  ;;  %v924_v51 = vld [vmem:[#allocation2] ss:$0 sm:$0xff] }
 0x168   :  { %1262 = vmatprep.subr.bf16.mxu1 %v1261_v54 }
 0x16b   :  { %1264 = vmatpush3.bf16.msra.mxu1 %v1261_v54 }
 0x231   :  { %v1072_v56 = vpop.f32.mrb[0].mxu1 }
 0x232   :  { %v425_v57 = vpop.f32.mrb[1].mxu1 }
 0x239   :  { %v1479_v58 = vpop.f32.mrb[4].mxu0 }
 0x23a   :  { %332 = vst.msk [vmem:[%s1636_s14 + $0x8] sm:$0xff] %vm330_vm9, %v1479_v58  ;;  %v1486_v59 = vpop.f32.mrb[5].mxu0  ;;  %v336_v61 = vsel %vm330_vm9, %v1479_v58, 0.0 }
 0x23b   :  { %331 = vst.msk [vmem:[%s1636_s14] sm:$0xff] %vm330_vm9, %v1486_v59  ;;  %1077 = vmatprep.mubr.msk.f32.mxu0 %vm330_vm9, %v1486_v59  ;;  %v333_v60 = vsel %vm330_vm9, %v1486_v59, 0.0 }
 0x23c   :  { %334 = vadd.xlane.f32.xlu1 %v333_v60  ;;  %v682_v60 = vld [vmem:[%s1639_s10 + $0x58] sm:$0xff] }
 0x240   :  { %337 = vadd.xlane.f32.xlu1 %v336_v61 }
 0x2c9   :  { %v335_v62 = vpop.xlane.xlu1 %334 }
 0x2ca   :  { %v339_v63 = vadd.f32 1.0, %v335_v62  ;;  %v683_v62 = vld [vmem:[%s1639_s10 + $0x60] sm:$0xff] }
 0x2cc   :  { %1290 = vrsqrt.f32 %v339_v63  ;;  %v684_v63 = vld [vmem:[%s1639_s10 + $0x68] sm:$0xff] }
 0x2cd   :  { %v338_v0 = vpop.xlane.xlu1 %337 }
 0x2ce   :  { %v340_v1 = vadd.f32 1.0, %v338_v0  ;;  %v1273_v0 = vpack.c.bf16 %v684_v63, %v683_v62 }
 0x2d0   :  { %1292 = vrsqrt.f32 %v340_v1  ;;  %v685_v1 = vld [vmem:[%s1639_s10 + $0x70] sm:$0xff] }
 0x2d6   :  { %v1291_v2 = vpop.eup %1290 }
 0x2d7   :  { %v434_v6 = vmul.f32 %v1291_v2, %v425_v57 }
 0x2da   :  { %v1293_v3 = vpop.eup %1292 }
 0x2db   :  { %v435_v7 = vmul.f32 %v1293_v3, %v1072_v56  ;;  %v680_v56 = vld [vmem:[%s1639_s10 + $0x48] sm:$0xff] }
 0x2dc   :  { %v1265_v57 = vpack.c.bf16 %v680_v56, %v679_v55 }
 0x2dd   :  { %v1213_v8 = vpack.c.bf16 %v435_v7, %v434_v6 }
 0x2de   :  { %1266 = vmatprep.subr.bf16.mxu1 %v1265_v57 }
 0x2df   :  { %1214 = vmatprep.subr.bf16.mxu0 %v1213_v8  ;;  %1268 = vmatpush3.bf16.msra.mxu1 %v1265_v57 }
 0x2e0   :  { %1216 = vmatpush3.bf16.msra.mxu0 %v1213_v8 }
 0x2e1   :  { %1218 = vmatprep.subr.bf16.mxu0 %v1217_v9 }
 0x2e3   :  { %1078 = vmatmul.mubr.msk.f32.vlgmr.msra.gmra.mrb[6].mxu0 %vm330_vm9, %v1479_v58 }
 0x2e4   :  { %1220 = vmatpush3.bf16.msra.mxu0 %v1217_v9 }
 0x2e5   :  { %1222 = vmatprep.subr.bf16.mxu0 %v1221_v12 }
 0x2e8   :  { %1224 = vmatpush3.bf16.msra.mxu0 %v1221_v12 }
 0x2e9   :  { %1226 = vmatprep.subr.bf16.mxu0 %v1225_v15 }
 0x2ec   :  { %1228 = vmatpush3.bf16.msra.mxu0 %v1225_v15 }
 0x2ed   :  { %1230 = vmatprep.subr.bf16.mxu0 %v1229_v18 }
 0x2f0   :  { %1232 = vmatpush3.bf16.msra.mxu0 %v1229_v18 }
 0x2f1   :  { %1234 = vmatprep.subr.bf16.mxu0 %v1233_v21 }
 0x2f4   :  { %1236 = vmatpush3.bf16.msra.mxu0 %v1233_v21 }
 0x2f5   :  { %1238 = vmatprep.subr.bf16.mxu0 %v1237_v24 }
 0x2f8   :  { %1240 = vmatpush3.bf16.msra.mxu0 %v1237_v24 }
 0x2f9   :  { %1242 = vmatprep.subr.bf16.mxu0 %v1241_v27 }
 0x2fc   :  { %1244 = vmatpush3.bf16.msra.mxu0 %v1241_v27 }
 0x2fd   :  { %1246 = vmatprep.subr.bf16.mxu0 %v1245_v30 }
 0x300   :  { %1248 = vmatpush3.bf16.msra.mxu0 %v1245_v30 }
 0x3b6   :  { %v1079_v31 = vpop.f32.mrb[6].mxu0 }
 0x3b7   :  { %v514_v32 = vadd.f32 %v1079_v31, %v435_v7  ;;  %v508_v33 = vpop.f32.mrb[7].mxu0 }
 0x3b8   :  { %v509_v34 = vadd.f32 %v508_v33, %v434_v6  ;;  %v920_v33 = vld [vmem:[%s1641_s8] ss:$0 sm:$0xff] }
 0x3b9   :  { %v518_v35 = vmul.f32 %v1293_v3, %v514_v32 }
 0x3ba   :  { %v517_v38 = vmul.f32 %v1291_v2, %v509_v34  ;;  %v686_v2 = vld [vmem:[%s1639_s10 + $0x78] sm:$0xff] }
 0x3bb   :  { %v527_v40 = vadd.f32 %v918_v36, %v518_v35  ;;  %v1277_v3 = vpack.c.bf16 %v686_v2, %v685_v1 }
 0x3bc   :  { %v526_v39 = vadd.f32 %v918_v36, %v517_v38  ;;  %v921_v36 = vld [vmem:[%s1642_s9] ss:$0 sm:$0xff]  ;;  %s1303_s9 = smov 127  }
 0x3be   :  { %1112 = vmatprep.mubr.f32.mxu0 %v526_v39 }
 0x3bf   :  { %1113 = vmatmul.mubr.f32.vlgmr.msra.gmra.mrb[8].mxu0 %v527_v40 }
 0x3c0   :  { %1154 = vmatprep.mubr.msk.f32.mxu0 %vm330_vm9, %v1486_v59  ;;  %v681_v59 = vld [vmem:[%s1639_s10 + $0x50] sm:$0xff] }
 0x3c1   :  { %v1269_v61 = vpack.c.bf16 %v682_v60, %v681_v59 }
 0x3c3   :  { %1270 = vmatprep.subr.bf16.mxu1 %v1269_v61 }
 0x3c4   :  { %1272 = vmatpush3.bf16.msra.mxu1 %v1269_v61 }
 0x3c5   :  { %1274 = vmatprep.subr.bf16.mxu1 %v1273_v0 }
 0x3c8   :  { %1276 = vmatpush3.bf16.msra.mxu1 %v1273_v0 }
 0x3c9   :  { %1278 = vmatprep.subr.bf16.mxu1 %v1277_v3 }
 0x3cc   :  { %1280 = vmatpush3.bf16.msra.mxu1 %v1277_v3 }
 0x492   :  { %v1114_v5 = vpop.f32.mrb[8].mxu0 }
 0x493   :  { %v623_v6 = vadd.f32 %v1114_v5, %v919_v4  ;;  %v617_v7 = vpop.f32.mrb[9].mxu0 }
 0x494   :  { %v618_v8 = vadd.f32 %v919_v4, %v617_v7 }
 0x495   :  { %v627_v9 = vmax.f32 %v623_v6, 0.0 }
 0x496   :  { %v626_v10 = vmax.f32 %v618_v8, 0.0 }
 0x498   :  { %v628_v11 = vadd.f32 %v627_v9, %v626_v10 }
 0x49a   :  { %v629_v12 = vrot.slane %v628_v11, 4 }
 0x49c   :  { %v630_v13 = vadd.f32 %v629_v12, %v628_v11 }
 0x49e   :  { %v631_v14 = vrot.slane %v630_v13, 2 }
 0x4a0   :  { %v632_v15 = vadd.f32 %v631_v14, %v630_v13 }
 0x4a2   :  { %v633_v16 = vrot.slane %v632_v15, 1 }
 0x4a4   :  { %v634_v17 = vadd.f32 %v633_v16, %v632_v15 }
 0x4a6   :  { %v636_v18 = vmul.f32 0.0625, %v634_v17 }
 0x4a8   :  { %v637_v19 = vsub.f32 %v626_v10, %v636_v18  ;;  %v638_v20 = vsub.f32 %v627_v9, %v636_v18 }
 0x4aa   :  { %v639_v21 = vmul.f32 %v637_v19, %v637_v19  ;;  %v640_v22 = vmul.f32 %v638_v20, %v638_v20 }
 0x4ac   :  { %v641_v23 = vadd.f32 %v640_v22, %v639_v21 }
 0x4ae   :  { %v642_v24 = vrot.slane %v641_v23, 4 }
 0x4b0   :  { %v643_v25 = vadd.f32 %v642_v24, %v641_v23 }
 0x4b2   :  { %v644_v26 = vrot.slane %v643_v25, 2 }
 0x4b4   :  { %v645_v27 = vadd.f32 %v644_v26, %v643_v25 }
 0x4b6   :  { %v646_v28 = vrot.slane %v645_v27, 1 }
 0x4b8   :  { %v647_v29 = vadd.f32 %v646_v28, %v645_v27 }
 0x4ba   :  { %v648_v30 = vmul.f32 0.0625, %v647_v29 }
 0x4bc   :  { %v649_v31 = vadd.f32 1e-05, %v648_v30 }
 0x4be   :  { %1294 = vrsqrt.f32 %v649_v31 }
 0x4c8   :  { %v1295_v32 = vpop.eup %1294 }
 0x4c9   :  { %v651_v34 = vmul.f32 %v1295_v32, %v637_v19  ;;  %v652_v35 = vmul.f32 %v1295_v32, %v638_v20 }
 0x4cb   :  { %v660_v38 = vmul.f32 %v920_v33, %v651_v34  ;;  %v661_v39 = vmul.f32 %v920_v33, %v652_v35 }
 0x4cd   :  { %v669_v40 = vadd.f32 %v921_v36, %v660_v38  ;;  %v670_v41 = vadd.f32 %v921_v36, %v661_v39 }
 0x4cf   :  { %1147 = vmatprep.mubr.f32.mxu1 %v669_v40 }
 0x4d0   :  { %1148 = vmatmul.mubr.f32.vlgmr.msra.gmra.mrb[2].mxu1 %v670_v41 }
 0x5a3   :  { %v1149_v42 = vpop.f32.mrb[2].mxu1 }
 0x5a4   :  { %v753_v43 = vpop.f32.mrb[3].mxu1 }
 0x5a5   :  { %v1281_v44 = vpack.c.bf16 %v1149_v42, %v753_v43 }
 0x5a7   :  { %1282 = vmatprep.subr.bf16.mxu0 %v1281_v44 }
 0x5a8   :  { %1284 = vmatpush3.bf16.msra.mxu0 %v1281_v44 }
 0x5ab   :  { %1155 = vmatmul.mubr.msk.f32.vlgmr.msra.gmra.mrb[10].mxu0 %vm330_vm9, %v1479_v58 }
 0x67e   :  { %v1156_v48 = vpop.f32.mrb[10].mxu0 }
 0x67f   :  { %841 = vrot.lane.b32.xlu1 %v1156_v48, %s1303_s9  ;;  %v828_v49 = vpop.f32.mrb[11].mxu0 }
 0x680   :  { %839 = vrot.lane.b32.xlu0 %v828_v49, %s1303_s9 }
 0x6f1   :  { %v842_v50 = vpop.permute.xlu1 %841 }
 0x6f2   :  { %v840_v52 = vpop.permute.xlu0 %839  ;;  %v846_v53 = vadd.f32 %v1149_v42, %v842_v50 }
 0x6f3   :  { %v845_v54 = vadd.f32 %v840_v52, %v753_v43 }
 0x6f4   :  { %v855_v56 = vadd.f32 %v924_v51, %v846_v53 }
 0x6f5   :  { %v854_v55 = vadd.f32 %v924_v51, %v845_v54 }
 0x6f7   :  { %1296 = vtanh.f32 %v854_v55 }
 0x6f8   :  { %1298 = vtanh.f32 %v855_v56 }
 0x701   :  { %v1297_v58 = vpop.eup %1296 }
 0x702   :  { %860 = vperm.xlu0 %1289, %v1297_v58   ;;  %v1299_v57 = vpop.eup %1298 }
 0x706   :  { %865 = vperm.xlu0 %1289, %v1299_v57  }
 0x781   :  { %v861_v59 = vpop.permute.xlu0 %860 }
 0x782   :  { %v868_v60 = vmul.f32 %v861_v59, %v669_v40  ;;  %v874_v61 = vsel %vm872_vm10, %v861_v59, 0.0 }
 0x783   :  { %v876_v1 = vsel %vm330_vm9, %v874_v61, 0.0 }
 0x784   :  { %870 = vst [vmem:[%s1644_s12] sm:$0xff] %v868_v60 }
 0x785   :  { %v866_v62 = vpop.permute.xlu0 %865 }
 0x786   :  { %v869_v63 = vmul.f32 %v866_v62, %v670_v41  ;;  %v875_v0 = vsel %vm873_vm11, %v866_v62, 0.0 }
 0x787   :  { %v877_v2 = vsel %vm330_vm9, %v875_v0, 0.0 }
 0x788   :  { %871 = vst [vmem:[%s1644_s12 + $0x8] sm:$0xff] %v869_v63  ;;  %v878_v46 = vadd.f32 %v877_v2, %v876_v1 }
 0x78a   :  { %v879_v3 = vrot.slane %v878_v46, 4 }
 0x78c   :  { %v880_v4 = vadd.f32 %v879_v3, %v878_v46 }
 0x78e   :  { %v881_v37 = vrot.slane %v880_v4, 2 }
 0x790   :  { %v882_v47 = vadd.f32 %v881_v37, %v880_v4 }
 0x792   :  { %v883_v5 = vrot.slane %v882_v47, 1 }
 0x794   :  { %v884_v6 = vadd.f32 %v883_v5, %v882_v47 }
 0x796   :  { %886 = vst.msk [vmem:[%s1645_s13] sm:$0x1] %vm885_vm12, %v884_v6 }

// kernel: gcn_forward.4
= control target key start
LH: loop header
LB: loop body
LE: loop exit
PB: predicated region body
PF: predicated region fallthrough
CT: control target
= control target key end

     0   :  { %v1492_v0 = vmov 0   ;;  %v46_v17 = vlaneseq  ;;  %v1493_v22 = vmov 1.0|1.0   ;;  %vm102_vm3 = vcmask 261120   ;;  %s1495_s28 = smov 127   ;;  %s1866_s0 = inlined_call_operand.vmem [shape: s32[32,1], index: 0, kind: input, shape index: {}]   ;;  %s1867_s3 = inlined_call_operand.vmem [shape: f32[32,7], index: 3, kind: input, shape index: {}]   ;;  %s1868_s2 = inlined_call_operand.vmem [shape: f32[32,32], index: 2, kind: input, shape index: {}]   ;;  %s1869_s1 = inlined_call_operand.vmem [shape: s32[1,32], index: 1, kind: input, shape index: {}]   ;;  %s1870_s4 = inlined_call_operand.vmem [shape: f32[7,128], index: 4, kind: input, shape index: {}]   ;;  %s1871_s14 = inlined_call_operand.vmem [shape: f32[32,32], index: 14, kind: output, shape index: {2}]   ;;  %s1872_s6 = inlined_call_operand.vmem [shape: f32[128,128], index: 6, kind: input, shape index: {}]   ;;  %s1873_s5 = inlined_call_operand.vmem [shape: f32[1,128], index: 5, kind: input, shape index: {}]   ;;  %s1874_s10 = inlined_call_operand.vmem [shape: f32[128,2], index: 10, kind: input, shape index: {}]   ;;  %s1875_s7 = inlined_call_operand.vmem [shape: f32[1,128], index: 7, kind: input, shape index: {}]   ;;  %s1876_s8 = inlined_call_operand.vmem [shape: f32[1,128], index: 8, kind: input, shape index: {}]   ;;  %s1877_s9 = inlined_call_operand.vmem [shape: f32[1,128], index: 9, kind: input, shape index: {}]   ;;  %s1878_s11 = inlined_call_operand.<no memory space> [shape: f32[1,1], index: 11, kind: input, shape index: {}]   ;;  %s1879_s12 = inlined_call_operand.vmem [shape: f32[32,128], index: 12, kind: output, shape index: {0}]   ;;  %s1880_s13 = inlined_call_operand.vmem [shape: f32[1,32], index: 13, kind: output, shape index: {1}]  }
   0x1   :  { %1473 = vset.pattern.permute.xlu1 %v1492_v0  ;;  %1472 = vset.pattern.permute.xlu0 %v1492_v0  ;;  %v55_v1 = vld [vmem:[%s1866_s0 + $0x10] sm:$0xff]  ;;  %v53_v2 = vld [vmem:[%s1866_s0] sm:$0xff]  ;;  %v56_v3 = vld [vmem:[%s1866_s0 + $0x18] sm:$0xff]  ;;  %v1494_v28 = vmov 0.0   ;;  %vm424_vm11 = vcmask 1046528   ;;  %vm411_vm12 = vcmask 56320  }
   0x2   :  { %64 = vperm.xlu1 %1473, %v55_v1   ;;  %58 = vperm.xlu0 %1472, %v53_v2   ;;  %v54_v4 = vld [vmem:[%s1866_s0 + $0x8] sm:$0xff]  ;;  %v98_v5 = vld [vmem:[%s1867_s3] sm:$0xff]  ;;  %v100_v10 = vld [vmem:[%s1867_s3 + $0x10] sm:$0xff]  ;;  %v1607_v18 = vshrl.u32 %v46_v17, 7  ;;  %v1623_v23 = vand.u32 127, %v46_v17 }
   0x3   :  { %v99_v6 = vld [vmem:[%s1867_s3 + $0x8] sm:$0xff]  ;;  %v200_v8 = vld [vmem:[%s1868_s2] sm:$0xff]  ;;  %v101_v12 = vld [vmem:[%s1867_s3 + $0x18] sm:$0xff] }
   0x4   :  { %v1364_v7 = vpack.c.bf16 %v99_v6, %v98_v5  ;;  %v201_v9 = vld [vmem:[%s1868_s2 + $0x8] sm:$0xff]  ;;  %v202_v13 = vld [vmem:[%s1868_s2 + $0x10] sm:$0xff]  ;;  %v203_v14 = vld [vmem:[%s1868_s2 + $0x18] sm:$0xff]  ;;  %v1368_v15 = vpack.c.bf16 %v101_v12, %v100_v10  ;;  %v1613_v20 = vadd.s32 8, %v1607_v18  ;;  %v1626_v26 = vadd.s32 16, %v1607_v18 }
   0x5   :  { %v1372_v11 = vpack.c.bf16 %v201_v9, %v200_v8  ;;  %v1376_v16 = vpack.c.bf16 %v203_v14, %v202_v13  ;;  %v1086_v19 = vld [vmem:[%s1869_s1] ss:$0 sm:$0xff]  ;;  %v1629_v27 = vadd.s32 24, %v1607_v18  ;;  %v630_v57 = vld [vmem:[%s1872_s6 + $0x8] sm:$0xff]  ;;  %v631_v58 = vld [vmem:[%s1872_s6 + $0x10] sm:$0xff]  ;;  %vm1047_vm14 = vcmp.eq.s32.totalorder %v1607_v18, %v1623_v23 }
   0x6   :  { %1365 = vmatprep.subr.bf16.mxu0 %v1364_v7  ;;  %67 = vperm.xlu1 %1473, %v56_v3   ;;  %vm86_vm0 = vcmp.eq.s32.totalorder %v1607_v18, %v1086_v19  ;;  %vm87_vm1 = vcmp.eq.s32.totalorder %v1613_v20, %v1086_v19  ;;  %vm88_vm6 = vcmp.eq.s32.totalorder %v1626_v26, %v1086_v19  ;;  %v410_v35 = vld [vmem:[%s1870_s4] sm:$0x7f]  ;;  %v632_v60 = vld [vmem:[%s1872_s6 + $0x18] sm:$0xff]  ;;  %v634_v63 = vld [vmem:[%s1872_s6 + $0x28] sm:$0xff] }
   0x7   :  { %61 = vperm.xlu0 %1472, %v54_v4   ;;  %1373 = vmatprep.subr.bf16.mxu1 %v1372_v11  ;;  %vm1617_vm2 = vmpackc.low %vm87_vm1, %vm86_vm0  ;;  %vm89_vm7 = vcmp.eq.s32.totalorder %v1629_v27, %v1086_v19  ;;  %v629_v56 = vld [vmem:[%s1872_s6] sm:$0xff]  ;;  %v1400_v61 = vpack.c.bf16 %v632_v60, %v631_v58  ;;  %v635_v1 = vld [vmem:[%s1872_s6 + $0x30] sm:$0xff]  ;;  %vm1048_vm13 = vcmp.eq.s32.totalorder %v1613_v20, %v1623_v23  ;;  %vm1068_vm1 = vcmask 253952  }
   0x8   :  { %1367 = vmatpush3.bf16.msra.mxu0 %v1364_v7  ;;  %1375 = vmatpush3.bf16.msra.mxu1 %v1372_v11  ;;  %vm1384_vm10 = vmpackc.low %vm89_vm7, %vm88_vm6  ;;  %v1396_v59 = vpack.c.bf16 %v630_v57, %v629_v56  ;;  %v633_v62 = vld [vmem:[%s1872_s6 + $0x20] sm:$0xff]  ;;  %v636_v2 = vld [vmem:[%s1872_s6 + $0x38] sm:$0xff]  ;;  %vm1049_vm15 = vcmp.eq.s32.totalorder %v1626_v26, %v1623_v23  ;;  %vm1050_vm0 = vcmp.eq.s32.totalorder %v1629_v27, %v1623_v23 }
   0x9   :  { %1369 = vmatprep.subr.bf16.mxu0 %v1368_v15  ;;  %1377 = vmatprep.subr.bf16.mxu1 %v1376_v16  ;;  %v1404_v0 = vpack.c.bf16 %v634_v63, %v633_v62  ;;  %v1408_v3 = vpack.c.bf16 %v636_v2, %v635_v1  ;;  %v637_v4 = vld [vmem:[%s1872_s6 + $0x40] sm:$0xff]  ;;  %v638_v5 = vld [vmem:[%s1872_s6 + $0x48] sm:$0xff]  ;;  %v639_v7 = vld [vmem:[%s1872_s6 + $0x50] sm:$0xff] }
   0xa   :  { %v1412_v6 = vpack.c.bf16 %v638_v5, %v637_v4  ;;  %v640_v8 = vld [vmem:[%s1872_s6 + $0x58] sm:$0xff]  ;;  %v798_v60 = vld [vmem:[%s1874_s10] sm:$0xff]  ;;  %v800_v63 = vld [vmem:[%s1874_s10 + $0x10] sm:$0xff] }
   0xb   :  { %v1416_v9 = vpack.c.bf16 %v640_v8, %v639_v7  ;;  %v802_v1 = vld [vmem:[%s1874_s10 + $0x20] sm:$0xff]  ;;  %v803_v2 = vld [vmem:[%s1874_s10 + $0x28] sm:$0xff]  ;;  %v804_v4 = vld [vmem:[%s1874_s10 + $0x30] sm:$0xff] }
   0xc   :  { %1371 = vmatpush3.bf16.msra.mxu0 %v1368_v15  ;;  %1379 = vmatpush3.bf16.msra.mxu1 %v1376_v16  ;;  %v805_v5 = vld [vmem:[%s1874_s10 + $0x38] sm:$0xff]  ;;  %v806_v7 = vld [vmem:[%s1874_s10 + $0x40] sm:$0xff]  ;;  %v807_v8 = vld [vmem:[%s1874_s10 + $0x48] sm:$0xff] }
   0xd   :  { %1381 = vmatprep.subr.msk.bf16.mxu0 %vm1617_vm2, %v1493_v22  ;;  %1252 = vmatprep.subr.msk.mxu1 %vm424_vm11, %v410_v35 }
  0x81   :  { %v65_v24 = vpop.permute.xlu1 %64  ;;  %v59_v25 = vpop.permute.xlu0 %58 }
  0x82   :  { %vm69_vm4 = vcmp.eq.s32.totalorder %v1623_v23, %v59_v25  ;;  %vm71_vm5 = vcmp.eq.s32.totalorder %v1623_v23, %v65_v24 }
  0x83   :  { %v1082_v29 = vsel %vm69_vm4, 1.0, %v1494_v28  ;;  %v1084_v32 = vsel %vm71_vm5, 1.0, %v1494_v28 }
  0x84   :  { %1218 = vmatprep.mubr.msk.f32.mxu0 %vm102_vm3, %v1082_v29  ;;  %1232 = vmatprep.mubr.msk.f32.mxu1 %vm102_vm3, %v1082_v29 }
  0x85   :  { %v68_v30 = vpop.permute.xlu1 %67 }
  0x86   :  { %v62_v31 = vpop.permute.xlu0 %61  ;;  %vm72_vm9 = vcmp.eq.s32.totalorder %v1623_v23, %v68_v30 }
  0x87   :  { %vm70_vm8 = vcmp.eq.s32.totalorder %v1623_v23, %v62_v31  ;;  %v1085_v34 = vsel %vm72_vm9, 1.0, %v1494_v28 }
  0x88   :  { %v1083_v33 = vsel %vm70_vm8, 1.0, %v1494_v28 }
  0x89   :  { %1219 = vmatmul.mubr.msk.f32.vlgmr.msra.gmra.mrb[0].mxu0 %vm102_vm3, %v1083_v33  ;;  %1233 = vmatmul.mubr.msk.f32.vlgmr.msra.gmra.mrb[0].mxu1 %vm102_vm3, %v1083_v33  ;;  %v641_v33 = vld [vmem:[%s1872_s6 + $0x60] sm:$0xff] }
  0x8a   :  { %1221 = vmatprep.mubr.msk.f32.mxu0 %vm102_vm3, %v1084_v32  ;;  %1235 = vmatprep.mubr.msk.f32.mxu1 %vm102_vm3, %v1084_v32 }
  0x8b   :  { %1383 = vmatpush3.bf16.msk.msra.mxu0 %vm1617_vm2, %v1493_v22  ;;  %1253 = vmatpush3.msk.msra.mxu1 %vm424_vm11, %v410_v35 }
  0x8c   :  { %1385 = vmatprep.subr.msk.bf16.mxu0 %vm1384_vm10, %v1493_v22  ;;  %1397 = vmatprep.subr.bf16.mxu1 %v1396_v59 }
  0x8d   :  { %1222 = vmatmul.mubr.msk.f32.gmra.mrb[2].mxu0 %vm102_vm3, %v1085_v34  ;;  %1236 = vmatmul.mubr.msk.f32.gmra.mrb[2].mxu1 %vm102_vm3, %v1085_v34  ;;  %v642_v34 = vld [vmem:[%s1872_s6 + $0x68] sm:$0xff] }
  0x8e   :  { %v1420_v35 = vpack.c.bf16 %v642_v34, %v641_v33 }
  0x8f   :  { %1387 = vmatpush3.bf16.msk.msra.mxu0 %vm1384_vm10, %v1493_v22 }
 0x15c   :  { %v1220_v36 = vpop.f32.mrb[0].mxu0  ;;  %v1234_v37 = vpop.f32.mrb[0].mxu1 }
 0x15d   :  { %v181_v38 = vpop.f32.mrb[1].mxu0  ;;  %v270_v39 = vpop.f32.mrb[1].mxu1 }
 0x15e   :  { %1246 = vmatprep.mubr.msk.f32.mxu0 %vm102_vm3, %v270_v39  ;;  %1254 = vmatprep.mubr.msk.f32.mxu1 %vm411_vm12, %v181_v38 }
 0x15f   :  { %1247 = vmatmul.mubr.msk.f32.vlgmr.msra.gmra.mrb[4].mxu0 %vm102_vm3, %v1234_v37  ;;  %1255 = vmatmul.mubr.msk.f32.vlgmr.msra.gmra.mrb[4].mxu1 %vm411_vm12, %v1220_v36  ;;  %v643_v36 = vld [vmem:[%s1872_s6 + $0x70] sm:$0xff]  ;;  %v644_v37 = vld [vmem:[%s1872_s6 + $0x78] sm:$0xff] }
 0x160   :  { %v1223_v40 = vpop.f32.mrb[2].mxu0  ;;  %v1237_v41 = vpop.f32.mrb[2].mxu1  ;;  %1399 = vmatpush3.bf16.msra.mxu1 %v1396_v59  ;;  %v1424_v38 = vpack.c.bf16 %v644_v37, %v643_v36 }
 0x161   :  { %v191_v42 = vpop.f32.mrb[3].mxu0  ;;  %v280_v43 = vpop.f32.mrb[3].mxu1  ;;  %1401 = vmatprep.subr.bf16.mxu1 %v1400_v61 }
 0x162   :  { %1249 = vmatprep.mubr.msk.f32.mxu0 %vm102_vm3, %v280_v43  ;;  %1257 = vmatprep.mubr.msk.f32.mxu1 %vm411_vm12, %v191_v42 }
 0x163   :  { %1250 = vmatmul.mubr.msk.f32.gmra.mrb[6].mxu0 %vm102_vm3, %v1237_v41  ;;  %1258 = vmatmul.mubr.msk.f32.gmra.mrb[6].mxu1 %vm411_vm12, %v1223_v40 }
 0x164   :  { %1403 = vmatpush3.bf16.msra.mxu1 %v1400_v61  ;;  %v799_v61 = vld [vmem:[%s1874_s10 + $0x8] sm:$0xff] }
 0x165   :  { %1405 = vmatprep.subr.bf16.mxu1 %v1404_v0  ;;  %v1428_v62 = vpack.c.bf16 %v799_v61, %v798_v60 }
 0x168   :  { %1407 = vmatpush3.bf16.msra.mxu1 %v1404_v0  ;;  %v801_v0 = vld [vmem:[%s1874_s10 + $0x18] sm:$0xff] }
 0x169   :  { %1409 = vmatprep.subr.bf16.mxu1 %v1408_v3 }
 0x16c   :  { %1411 = vmatpush3.bf16.msra.mxu1 %v1408_v3  ;;  %v1436_v3 = vpack.c.bf16 %v803_v2, %v802_v1 }
 0x16d   :  { %1413 = vmatprep.subr.bf16.mxu1 %v1412_v6 }
 0x170   :  { %1415 = vmatpush3.bf16.msra.mxu1 %v1412_v6  ;;  %v1440_v6 = vpack.c.bf16 %v805_v5, %v804_v4 }
 0x171   :  { %1417 = vmatprep.subr.bf16.mxu1 %v1416_v9 }
 0x174   :  { %1419 = vmatpush3.bf16.msra.mxu1 %v1416_v9  ;;  %v1444_v9 = vpack.c.bf16 %v807_v8, %v806_v7 }
 0x175   :  { %1421 = vmatprep.subr.bf16.mxu1 %v1420_v35 }
 0x178   :  { %1423 = vmatpush3.bf16.msra.mxu1 %v1420_v35 }
 0x179   :  { %1425 = vmatprep.subr.bf16.mxu1 %v1424_v38 }
 0x17c   :  { %1427 = vmatpush3.bf16.msra.mxu1 %v1424_v38 }
 0x232   :  { %v1658_v44 = vpop.f32.mrb[4].mxu0  ;;  %v1660_v45 = vpop.f32.mrb[4].mxu1 }
 0x233   :  { %387 = vst.msk [vmem:[%s1871_s14 + $0x8] sm:$0xff] %vm102_vm3, %v1658_v44  ;;  %v1667_v46 = vpop.f32.mrb[5].mxu0  ;;  %v1669_v47 = vpop.f32.mrb[5].mxu1  ;;  %v393_v48 = vsel %vm102_vm3, %v1658_v44, 0.0 }
 0x234   :  { %386 = vst.msk [vmem:[%s1871_s14] sm:$0xff] %vm102_vm3, %v1667_v46  ;;  %394 = vadd.xlane.f32.xlu1 %v393_v48  ;;  %1268 = vmatprep.mubr.msk.f32.mxu0 %vm102_vm3, %v1667_v46  ;;  %v390_v49 = vsel %vm102_vm3, %v1667_v46, 0.0 }
 0x235   :  { %391 = vadd.xlane.f32.xlu0 %v390_v49 }
 0x236   :  { %v1682_v50 = vpop.f32.mrb[6].mxu0  ;;  %v1259_v51 = vpop.f32.mrb[6].mxu1 }
 0x237   :  { %389 = vst.msk [vmem:[%s1871_s14 + $0x18] sm:$0xff] %vm102_vm3, %v1682_v50  ;;  %v1689_v52 = vpop.f32.mrb[7].mxu0  ;;  %v504_v53 = vpop.f32.mrb[7].mxu1  ;;  %v399_v55 = vsel %vm102_vm3, %v1682_v50, 0.0 }
 0x238   :  { %388 = vst.msk [vmem:[%s1871_s14 + $0x10] sm:$0xff] %vm102_vm3, %v1689_v52  ;;  %v396_v54 = vsel %vm102_vm3, %v1689_v52, 0.0 }
 0x239   :  { %397 = vadd.xlane.f32.xlu0 %v396_v54 }
 0x23d   :  { %400 = vadd.xlane.f32.xlu0 %v399_v55 }
 0x2c1   :  { %v395_v10 = vpop.xlane.xlu1 %394 }
 0x2c2   :  { %v403_v11 = vadd.f32 1.0, %v395_v10  ;;  %v392_v12 = vpop.xlane.xlu0 %391  ;;  %v808_v10 = vld [vmem:[%s1874_s10 + $0x50] sm:$0xff] }
 0x2c3   :  { %v402_v13 = vadd.f32 1.0, %v392_v12 }
 0x2c4   :  { %1474 = vrsqrt.f32 %v403_v11  ;;  %v809_v11 = vld [vmem:[%s1874_s10 + $0x58] sm:$0xff] }
 0x2c5   :  { %1476 = vrsqrt.f32 %v402_v13  ;;  %v1448_v12 = vpack.c.bf16 %v809_v11, %v808_v10  ;;  %v810_v13 = vld [vmem:[%s1874_s10 + $0x60] sm:$0xff] }
 0x2c6   :  { %v398_v14 = vpop.xlane.xlu0 %397  ;;  %v1119_v11 = vld [vmem:[%s1877_s9] ss:$0 sm:$0xff] }
 0x2c7   :  { %v404_v15 = vadd.f32 1.0, %v398_v14  ;;  %v811_v14 = vld [vmem:[%s1874_s10 + $0x68] sm:$0xff] }
 0x2c9   :  { %1478 = vrsqrt.f32 %v404_v15  ;;  %v1452_v15 = vpack.c.bf16 %v811_v14, %v810_v13 }
 0x2ca   :  { %v401_v16 = vpop.xlane.xlu0 %400 }
 0x2cb   :  { %v405_v17 = vadd.f32 1.0, %v401_v16  ;;  %v812_v16 = vld [vmem:[%s1874_s10 + $0x70] sm:$0xff] }
 0x2cd   :  { %1480 = vrsqrt.f32 %v405_v17  ;;  %v813_v17 = vld [vmem:[%s1874_s10 + $0x78] sm:$0xff] }
 0x2ce   :  { %v1475_v19 = vpop.eup %1474 }
 0x2cf   :  { %v1477_v21 = vpop.eup %1476  ;;  %v514_v22 = vmul.f32 %v1475_v19, %v1660_v45  ;;  %v1116_v45 = vld [vmem:[%s1873_s5] ss:$0 sm:$0xff] }
 0x2d0   :  { %v513_v24 = vmul.f32 %v1477_v21, %v1669_v47 }
 0x2d2   :  { %v1388_v25 = vpack.c.bf16 %v514_v22, %v513_v24 }
 0x2d3   :  { %v1479_v28 = vpop.eup %1478 }
 0x2d4   :  { %1389 = vmatprep.subr.bf16.mxu0 %v1388_v25  ;;  %v515_v30 = vmul.f32 %v1479_v28, %v504_v53 }
 0x2d5   :  { %1391 = vmatpush3.bf16.msra.mxu0 %v1388_v25 }
 0x2d7   :  { %v1481_v29 = vpop.eup %1480 }
 0x2d8   :  { %v516_v31 = vmul.f32 %v1481_v29, %v1259_v51 }
 0x2da   :  { %v1392_v32 = vpack.c.bf16 %v516_v31, %v515_v30 }
 0x2dc   :  { %1393 = vmatprep.subr.bf16.mxu0 %v1392_v32 }
 0x2dd   :  { %1395 = vmatpush3.bf16.msra.mxu0 %v1392_v32 }
 0x2de   :  { %1429 = vmatprep.subr.bf16.mxu0 %v1428_v62 }
 0x2e0   :  { %1269 = vmatmul.mubr.msk.f32.vlgmr.msra.gmra.mrb[8].mxu0 %vm102_vm3, %v1658_v44 }
 0x2e1   :  { %1271 = vmatprep.mubr.msk.f32.mxu0 %vm102_vm3, %v1689_v52  ;;  %1431 = vmatpush3.bf16.msra.mxu0 %v1428_v62 }
 0x2e4   :  { %1272 = vmatmul.mubr.msk.f32.gmra.mrb[10].mxu0 %vm102_vm3, %v1682_v50 }
 0x3b3   :  { %v1270_v39 = vpop.f32.mrb[8].mxu0 }
 0x3b4   :  { %v601_v40 = vadd.f32 %v1270_v39, %v514_v22  ;;  %v595_v41 = vpop.f32.mrb[9].mxu0 }
 0x3b5   :  { %v596_v42 = vadd.f32 %v595_v41, %v513_v24 }
 0x3b6   :  { %v615_v43 = vmul.f32 %v1475_v19, %v601_v40  ;;  %v1456_v19 = vpack.c.bf16 %v813_v17, %v812_v16 }
 0x3b7   :  { %v614_v47 = vmul.f32 %v1477_v21, %v596_v42  ;;  %v1273_v48 = vpop.f32.mrb[10].mxu0  ;;  %v1117_v21 = vld [vmem:[%s1875_s7] ss:$0 sm:$0xff] }
 0x3b8   :  { %v611_v49 = vadd.f32 %v1273_v48, %v516_v31  ;;  %v605_v51 = vpop.f32.mrb[11].mxu0  ;;  %v626_v55 = vadd.f32 %v1116_v45, %v615_v43 }
 0x3b9   :  { %v606_v53 = vadd.f32 %v605_v51, %v515_v30  ;;  %v625_v54 = vadd.f32 %v1116_v45, %v614_v47 }
 0x3ba   :  { %v617_v56 = vmul.f32 %v1481_v29, %v611_v49 }
 0x3bb   :  { %v616_v57 = vmul.f32 %v1479_v28, %v606_v53  ;;  %1306 = vmatprep.mubr.f32.mxu1 %v625_v54 }
 0x3bc   :  { %1307 = vmatmul.mubr.f32.vlgmr.msra.gmra.mrb[8].mxu1 %v626_v55  ;;  %v628_v59 = vadd.f32 %v1116_v45, %v617_v56 }
 0x3bd   :  { %v627_v58 = vadd.f32 %v1116_v45, %v616_v57 }
 0x3bf   :  { %1309 = vmatprep.mubr.f32.mxu1 %v627_v58 }
 0x3c0   :  { %1310 = vmatmul.mubr.f32.gmra.mrb[10].mxu1 %v628_v59 }
 0x3c1   :  { %1358 = vmatprep.mubr.msk.f32.mxu1 %vm102_vm3, %v1667_v46  ;;  %v1432_v46 = vpack.c.bf16 %v801_v0, %v800_v63 }
 0x3c3   :  { %1433 = vmatprep.subr.bf16.mxu0 %v1432_v46 }
 0x3c4   :  { %1435 = vmatpush3.bf16.msra.mxu0 %v1432_v46 }
 0x3c5   :  { %1437 = vmatprep.subr.bf16.mxu0 %v1436_v3 }
 0x3c8   :  { %1439 = vmatpush3.bf16.msra.mxu0 %v1436_v3 }
 0x3c9   :  { %1441 = vmatprep.subr.bf16.mxu0 %v1440_v6 }
 0x3cc   :  { %1443 = vmatpush3.bf16.msra.mxu0 %v1440_v6  ;;  %v1118_v6 = vld [vmem:[%s1876_s8] ss:$0 sm:$0xff] }
 0x3cd   :  { %1445 = vmatprep.subr.bf16.mxu0 %v1444_v9 }
 0x3d0   :  { %1447 = vmatpush3.bf16.msra.mxu0 %v1444_v9 }
 0x3d1   :  { %1449 = vmatprep.subr.bf16.mxu0 %v1448_v12 }
 0x3d4   :  { %1451 = vmatpush3.bf16.msra.mxu0 %v1448_v12 }
 0x3d5   :  { %1453 = vmatprep.subr.bf16.mxu0 %v1452_v15 }
 0x3d8   :  { %1455 = vmatpush3.bf16.msra.mxu0 %v1452_v15 }
 0x3d9   :  { %1457 = vmatprep.subr.bf16.mxu0 %v1456_v19 }
 0x3dc   :  { %1459 = vmatpush3.bf16.msra.mxu0 %v1456_v19 }
 0x48f   :  { %v1308_v22 = vpop.f32.mrb[8].mxu1 }
 0x490   :  { %v724_v24 = vadd.f32 %v1308_v22, %v1117_v21  ;;  %v718_v25 = vpop.f32.mrb[9].mxu1 }
 0x491   :  { %v719_v28 = vadd.f32 %v1117_v21, %v718_v25 }
 0x492   :  { %v738_v29 = vmax.f32 %v724_v24, 0.0 }
 0x493   :  { %v737_v30 = vmax.f32 %v719_v28, 0.0  ;;  %v1311_v31 = vpop.f32.mrb[10].mxu1 }
 0x494   :  { %v728_v32 = vpop.f32.mrb[11].mxu1  ;;  %v734_v34 = vadd.f32 %v1311_v31, %v1117_v21  ;;  %v20_v31 = vstv %s1878_s11 }
 0x495   :  { %v741_v33 = vadd.f32 %v738_v29, %v737_v30  ;;  %v729_v35 = vadd.f32 %v1117_v21, %v728_v32  ;;  %21 = vst [vmem:[#allocation2] sm:$0x1] %v20_v31 }
 0x496   :  { %v740_v37 = vmax.f32 %v734_v34, 0.0 }
 0x497   :  { %v739_v36 = vmax.f32 %v729_v35, 0.0 }
 0x499   :  { %v742_v38 = vadd.f32 %v741_v33, %v739_v36 }
 0x49b   :  { %v743_v39 = vadd.f32 %v742_v38, %v740_v37 }
 0x49d   :  { %v744_v40 = vrot.slane %v743_v39, 4 }
 0x49f   :  { %v745_v41 = vadd.f32 %v744_v40, %v743_v39 }
 0x4a1   :  { %v746_v42 = vrot.slane %v745_v41, 2 }
 0x4a3   :  { %v747_v43 = vadd.f32 %v746_v42, %v745_v41 }
 0x4a5   :  { %v748_v45 = vrot.slane %v747_v43, 1 }
 0x4a7   :  { %v749_v47 = vadd.f32 %v748_v45, %v747_v43 }
 0x4a9   :  { %v751_v48 = vmul.f32 0.03125, %v749_v47 }
 0x4ab   :  { %v752_v49 = vsub.f32 %v737_v30, %v751_v48  ;;  %v753_v51 = vsub.f32 %v738_v29, %v751_v48  ;;  %v754_v53 = vsub.f32 %v739_v36, %v751_v48  ;;  %v755_v54 = vsub.f32 %v740_v37, %v751_v48 }
 0x4ad   :  { %v756_v55 = vmul.f32 %v752_v49, %v752_v49  ;;  %v757_v56 = vmul.f32 %v753_v51, %v753_v51  ;;  %v758_v57 = vmul.f32 %v754_v53, %v754_v53  ;;  %v759_v59 = vmul.f32 %v755_v54, %v755_v54 }
 0x4af   :  { %v760_v58 = vadd.f32 %v757_v56, %v756_v55 }
 0x4b1   :  { %v761_v60 = vadd.f32 %v760_v58, %v758_v57 }
 0x4b3   :  { %v762_v61 = vadd.f32 %v761_v60, %v759_v59 }
 0x4b5   :  { %v763_v62 = vrot.slane %v762_v61, 4 }
 0x4b7   :  { %v764_v63 = vadd.f32 %v763_v62, %v762_v61 }
 0x4b9   :  { %v765_v0 = vrot.slane %v764_v63, 2 }
 0x4bb   :  { %v766_v46 = vadd.f32 %v765_v0, %v764_v63 }
 0x4bd   :  { %v767_v1 = vrot.slane %v766_v46, 1 }
 0x4bf   :  { %v768_v2 = vadd.f32 %v767_v1, %v766_v46 }
 0x4c1   :  { %v769_v3 = vmul.f32 0.03125, %v768_v2 }
 0x4c3   :  { %v770_v4 = vadd.f32 1e-05, %v769_v3 }
 0x4c5   :  { %1482 = vrsqrt.f32 %v770_v4 }
 0x4cf   :  { %v1483_v5 = vpop.eup %1482 }
 0x4d0   :  { %v773_v7 = vmul.f32 %v1483_v5, %v753_v51  ;;  %v774_v8 = vmul.f32 %v1483_v5, %v754_v53  ;;  %v772_v9 = vmul.f32 %v1483_v5, %v752_v49  ;;  %v775_v10 = vmul.f32 %v1483_v5, %v755_v54 }
 0x4d2   :  { %v783_v12 = vmul.f32 %v1118_v6, %v772_v9  ;;  %v784_v13 = vmul.f32 %v1118_v6, %v773_v7  ;;  %v785_v14 = vmul.f32 %v1118_v6, %v774_v8  ;;  %v786_v17 = vmul.f32 %v1118_v6, %v775_v10 }
 0x4d4   :  { %v1818_v15 = vadd.f32 %v1119_v11, %v783_v12  ;;  %v795_v16 = vadd.f32 %v1119_v11, %v784_v13  ;;  %v1821_v19 = vadd.f32 %v1119_v11, %v785_v14  ;;  %v1824_v21 = vadd.f32 %v1119_v11, %v786_v17 }
 0x4d6   :  { %1344 = vmatprep.mubr.f32.mxu0 %v1818_v15 }
 0x4d7   :  { %1345 = vmatmul.mubr.f32.vlgmr.msra.gmra.mrb[12].mxu0 %v795_v16 }
 0x4d8   :  { %1347 = vmatprep.mubr.f32.mxu0 %v1821_v19 }
 0x4db   :  { %1348 = vmatmul.mubr.f32.gmra.mrb[14].mxu0 %v1824_v21 }
 0x5aa   :  { %v1346_v22 = vpop.f32.mrb[12].mxu0 }
 0x5ab   :  { %v880_v24 = vpop.f32.mrb[13].mxu0 }
 0x5ac   :  { %v1460_v25 = vpack.c.bf16 %v1346_v22, %v880_v24 }
 0x5ae   :  { %v1349_v28 = vpop.f32.mrb[14].mxu0  ;;  %1461 = vmatprep.subr.bf16.mxu1 %v1460_v25 }
 0x5af   :  { %v890_v29 = vpop.f32.mrb[15].mxu0  ;;  %1463 = vmatpush3.bf16.msra.mxu1 %v1460_v25 }
 0x5b0   :  { %v1464_v30 = vpack.c.bf16 %v1349_v28, %v890_v29 }
 0x5b2   :  { %1465 = vmatprep.subr.bf16.mxu1 %v1464_v30 }
 0x5b3   :  { %1467 = vmatpush3.bf16.msra.mxu1 %v1464_v30 }
 0x5b6   :  { %1359 = vmatmul.mubr.msk.f32.vlgmr.msra.gmra.mrb[12].mxu1 %vm102_vm3, %v1658_v44  ;;  %v1124_v44 = vld [vmem:[#allocation2] ss:$0 sm:$0xff] }
 0x5b7   :  { %1361 = vmatprep.mubr.msk.f32.mxu1 %vm102_vm3, %v1689_v52 }
 0x5ba   :  { %1362 = vmatmul.mubr.msk.f32.gmra.mrb[14].mxu1 %vm102_vm3, %v1682_v50 }
 0x689   :  { %v1360_v32 = vpop.f32.mrb[12].mxu1 }
 0x68a   :  { %990 = vrot.lane.b32.xlu0 %v1360_v32, %s1495_s28  ;;  %v965_v33 = vpop.f32.mrb[13].mxu1 }
 0x68b   :  { %988 = vrot.lane.b32.xlu1 %v965_v33, %s1495_s28 }
 0x68d   :  { %v1363_v34 = vpop.f32.mrb[14].mxu1 }
 0x68e   :  { %v975_v35 = vpop.f32.mrb[15].mxu1 }
 0x68f   :  { %992 = vrot.lane.b32.xlu1 %v975_v35, %s1495_s28 }
 0x693   :  { %994 = vrot.lane.b32.xlu1 %v1363_v34, %s1495_s28 }
 0x6fc   :  { %v991_v36 = vpop.permute.xlu0 %990 }
 0x6fd   :  { %v1001_v52 = vadd.f32 %v1346_v22, %v991_v36  ;;  %v989_v37 = vpop.permute.xlu1 %988 }
 0x6fe   :  { %v1000_v38 = vadd.f32 %v989_v37, %v880_v24 }
 0x6ff   :  { %v1012_v50 = vadd.f32 %v1124_v44, %v1001_v52 }
 0x700   :  { %v1011_v39 = vadd.f32 %v1124_v44, %v1000_v38 }
 0x701   :  { %1484 = vtanh.f32 %v1012_v50  ;;  %v993_v40 = vpop.permute.xlu1 %992 }
 0x702   :  { %1486 = vtanh.f32 %v1011_v39  ;;  %v1002_v41 = vadd.f32 %v993_v40, %v890_v29 }
 0x704   :  { %v1013_v42 = vadd.f32 %v1124_v44, %v1002_v41 }
 0x705   :  { %v995_v43 = vpop.permute.xlu1 %994 }
 0x706   :  { %1488 = vtanh.f32 %v1013_v42  ;;  %v1003_v45 = vadd.f32 %v1349_v28, %v995_v43 }
 0x708   :  { %v1014_v47 = vadd.f32 %v1124_v44, %v1003_v45 }
 0x70a   :  { %1490 = vtanh.f32 %v1014_v47 }
 0x70b   :  { %v1485_v48 = vpop.eup %1484 }
 0x70c   :  { %v1487_v49 = vpop.eup %1486  ;;  %1026 = vperm.xlu1 %1473, %v1485_v48  }
 0x70d   :  { %1021 = vperm.xlu0 %1472, %v1487_v49  }
 0x710   :  { %v1489_v51 = vpop.eup %1488 }
 0x711   :  { %1031 = vperm.xlu0 %1472, %v1489_v51  }
 0x714   :  { %v1491_v53 = vpop.eup %1490 }
 0x715   :  { %1036 = vperm.xlu1 %1473, %v1491_v53  }
 0x78b   :  { %v1027_v54 = vpop.permute.xlu1 %1026 }
 0x78c   :  { %v1040_v55 = vmul.f32 %v1027_v54, %v795_v16  ;;  %v1022_v56 = vpop.permute.xlu0 %1021  ;;  %v1052_v57 = vsel %vm1048_vm13, %v1027_v54, 0.0 }
 0x78d   :  { %v1039_v58 = vmul.f32 %v1022_v56, %v1818_v15  ;;  %v1051_v59 = vsel %vm1047_vm14, %v1022_v56, 0.0  ;;  %v1056_v18 = vsel %vm102_vm3, %v1052_v57, 0.0 }
 0x78e   :  { %1044 = vst [vmem:[%s1879_s12 + $0x8] sm:$0xff] %v1040_v55  ;;  %v1055_v20 = vsel %vm102_vm3, %v1051_v59, 0.0 }
 0x78f   :  { %1043 = vst [vmem:[%s1879_s12] sm:$0xff] %v1039_v58  ;;  %v1057_v0 = vadd.f32 %v1056_v18, %v1055_v20 }
 0x790   :  { %v1032_v60 = vpop.permute.xlu0 %1031 }
 0x791   :  { %v1041_v61 = vmul.f32 %v1032_v60, %v1821_v19  ;;  %v1053_v62 = vsel %vm1049_vm15, %v1032_v60, 0.0 }
 0x792   :  { %v1058_v63 = vsel %vm102_vm3, %v1053_v62, 0.0 }
 0x793   :  { %1045 = vst [vmem:[%s1879_s12 + $0x10] sm:$0xff] %v1041_v61  ;;  %v1059_v46 = vadd.f32 %v1058_v63, %v1057_v0 }
 0x794   :  { %v1037_v26 = vpop.permute.xlu1 %1036 }
 0x795   :  { %v1042_v1 = vmul.f32 %v1037_v26, %v1824_v21  ;;  %v1054_v2 = vsel %vm1050_vm0, %v1037_v26, 0.0 }
 0x796   :  { %v1060_v3 = vsel %vm102_vm3, %v1054_v2, 0.0 }
 0x797   :  { %1046 = vst [vmem:[%s1879_s12 + $0x18] sm:$0xff] %v1042_v1  ;;  %v1061_v4 = vadd.f32 %v1060_v3, %v1059_v46 }
 0x799   :  { %v1062_v5 = vrot.slane %v1061_v4, 4 }
 0x79b   :  { %v1063_v6 = vadd.f32 %v1062_v5, %v1061_v4 }
 0x79d   :  { %v1064_v23 = vrot.slane %v1063_v6, 2 }
 0x79f   :  { %v1065_v27 = vadd.f32 %v1064_v23, %v1063_v6 }
 0x7a1   :  { %v1066_v7 = vrot.slane %v1065_v27, 1 }
 0x7a3   :  { %v1067_v8 = vadd.f32 %v1066_v7, %v1065_v27 }
 0x7a5   :  { %1069 = vst.msk [vmem:[%s1880_s13] sm:$0x1] %vm1068_vm1, %v1067_v8 }

// kernel: custom-call
= control target key start
LH: loop header
LB: loop body
LE: loop exit
PB: predicated region body
PF: predicated region fallthrough
CT: control target
= control target key end

     0   :  { %5 = vsyncpa [#allocation9], 0  ;;  %s1165_s0 = inlined_call_operand.vmem [shape: f32[2,2], index: 0, kind: input, shape index: {}]   ;;  %s1166_s1 = inlined_call_operand.hbm [shape: f32[2,1], index: 1, kind: output, shape index: {0}]   ;;  %s1167_s2 = inlined_call_operand.vmem [shape: s32[2,1], index: 2, kind: output, shape index: {1}]  }
   0x1   :  { %v28_v0 = vld [vmem:[%s1165_s0] sm:$0x3]  ;;  %v46_v1 = vlaneseq  ;;  %v1039_v23 = vmov 2147483648   ;;  %v1040_v24 = vmov 2147483647   ;;  %s1044_s6 = smov [#allocation8]  }
   0x2   :  { %29 = vst [vmem:[#allocation16] sm:$0x3] %v28_v0  ;;  %75 = vst [vmem:[#allocation13] sm:$0xff] %v1039_v23  ;;  %s936_s7 = sshll.u32 %s1044_s6, 4  ;;  %s937_s7 = int_to_ptr.vmem [resolvable:$true] %s936_s7 }
   0x3   :  { %v1064_v2 = vshrl.u32 %v46_v1, 7  ;;  %v47_v3 = vand.u32 127, %v46_v1  ;;  %76 = vst [vmem:[#allocation15] sm:$0xff] %v1040_v24  ;;  %s1015_s8 = scalar_lea.vmem %s937_s7, 32  ;;  %p1020_p3 = scmp.lt.s32.totalorder %s937_s7, %s937_s7 }
   0x4   :  { %p1016_p2 = scmp.ne.s32.totalorder %s937_s7, %s1015_s8  ;;  %p1021_p4 = scmp.lt.s32.totalorder %s1015_s8, %s1015_s8 }
   0x5   :  { %v50_v4 = vshrl.u32 %v1064_v2, 1 }
   0x6   :  { %p1022_p5 = por %p1021_p4, %p1020_p3 }
   0x7   :  { %v52_v5 = vmul.u32 128, %v50_v4 }
   0x8   :  { %p1023_p6 = pnand %p1022_p5, %p1016_p2 }
   0x9   :  { %v53_v6 = vadd.s32 %v52_v5, %v47_v3  ;;  %v55_v7 = vld [vmem:[#allocation16] sm:$0xff] }
   0xa   :  { %vm56_vm0 = vcmp.lt.s32.totalorder %v55_v7, 0  ;;  %v57_v8 = vsub.s32 2147483647, %v55_v7 }
   0xb   :  { %vm60_vm1 = vcmp.lt.s32.totalorder %v53_v6, 2  ;;  %v88_v9 = vrot.slane %v53_v6, 2 }
   0xc   :  { %v58_v10 = vsel %vm56_vm0, %v57_v8, %v55_v7 }
   0xd   :  { %v61_v11 = vsel %vm60_vm1, %v58_v10, 2147483648  ;;  %vm92_vm2 = vcmp.lt.s32.totalorder %v88_v9, %v53_v6 }
   0xe   :  { %62 = vst [vmem:[#allocation16] sm:$0xff] %v61_v11  ;;  %v87_v12 = vrot.slane %v61_v11, 2 }
  0x10   :  { %vm90_vm3 = vcmp.gt.s32.totalorder %v87_v12, %v61_v11  ;;  %vm91_vm4 = vcmp.eq.s32.totalorder %v87_v12, %v61_v11 }
  0x11   :  { %vm93_vm5 = vmand %vm91_vm4, %vm92_vm2 }
  0x12   :  { %vm94_vm6 = vmor %vm90_vm3, %vm93_vm5 }
  0x13   :  { %v95_v13 = vsel %vm94_vm6, %v87_v12, %v61_v11  ;;  %v96_v14 = vsel %vm94_vm6, %v88_v9, %v53_v6 }
  0x14   :  { %v98_v15 = vrot.slane %v95_v13, 2  ;;  %v99_v16 = vrot.slane %v96_v14, 2 }
  0x16   :  { %vm101_vm7 = vcmp.gt.s32.totalorder %v98_v15, %v95_v13  ;;  %vm102_vm8 = vcmp.eq.s32.totalorder %v98_v15, %v95_v13  ;;  %vm103_vm9 = vcmp.lt.s32.totalorder %v99_v16, %v96_v14 }
  0x17   :  { %vm104_vm10 = vmand %vm102_vm8, %vm103_vm9 }
  0x18   :  { %vm105_vm11 = vmor %vm101_vm7, %vm104_vm10 }
  0x19   :  { %v106_v17 = vsel %vm105_vm11, %v98_v15, %v95_v13  ;;  %v107_v18 = vsel %vm105_vm11, %v99_v16, %v96_v14 }
  0x1a   :  { %v109_v19 = vrot.slane %v106_v17, 2  ;;  %v110_v20 = vrot.slane %v107_v18, 2 }
  0x1c   :  { %vm112_vm12 = vcmp.gt.s32.totalorder %v109_v19, %v106_v17  ;;  %vm113_vm13 = vcmp.eq.s32.totalorder %v109_v19, %v106_v17  ;;  %vm114_vm14 = vcmp.lt.s32.totalorder %v110_v20, %v107_v18 }
  0x1d   :  { %vm115_vm15 = vmand %vm113_vm13, %vm114_vm14 }
  0x1e   :  { %vm116_vm0 = vmor %vm112_vm12, %vm115_vm15 }
  0x1f   :  { %v118_v21 = vsel %vm116_vm0, %v110_v20, %v107_v18  ;;  %v117_v22 = vsel %vm116_vm0, %v109_v19, %v106_v17 }
  0x20   :  { %152 = vxpose.xlu1.b32.start [1/16] %v118_v21, 128  ;;  %120 = vxpose.xlu0.b32.start [1/16] %v117_v22, 128 }
  0x24   :  { %153 = vxpose.xlu1.b32.cont [2/16] %v118_v21, 128  ;;  %121 = vxpose.xlu0.b32.cont [2/16] %v117_v22, 128 }
  0x28   :  { %154 = vxpose.xlu1.b32.cont [3/16] %v118_v21, 128  ;;  %122 = vxpose.xlu0.b32.cont [3/16] %v117_v22, 128 }
  0x2c   :  { %155 = vxpose.xlu1.b32.cont [4/16] %v118_v21, 128  ;;  %123 = vxpose.xlu0.b32.cont [4/16] %v117_v22, 128 }
  0x30   :  { %156 = vxpose.xlu1.b32.cont [5/16] %v118_v21, 128  ;;  %124 = vxpose.xlu0.b32.cont [5/16] %v117_v22, 128 }
  0x34   :  { %157 = vxpose.xlu1.b32.cont [6/16] %v118_v21, 128  ;;  %125 = vxpose.xlu0.b32.cont [6/16] %v117_v22, 128 }
  0x38   :  { %158 = vxpose.xlu1.b32.cont [7/16] %v118_v21, 128  ;;  %126 = vxpose.xlu0.b32.cont [7/16] %v117_v22, 128 }
  0x3c   :  { %159 = vxpose.xlu1.b32.cont [8/16] %v118_v21, 128  ;;  %127 = vxpose.xlu0.b32.cont [8/16] %v117_v22, 128 }
  0x40   :  { %160 = vxpose.xlu1.b32.cont [9/16] %v118_v21, 128  ;;  %128 = vxpose.xlu0.b32.cont [9/16] %v117_v22, 128 }
  0x44   :  { %161 = vxpose.xlu1.b32.cont [10/16] %v118_v21, 128  ;;  %129 = vxpose.xlu0.b32.cont [10/16] %v117_v22, 128 }
  0x48   :  { %162 = vxpose.xlu1.b32.cont [11/16] %v118_v21, 128  ;;  %130 = vxpose.xlu0.b32.cont [11/16] %v117_v22, 128 }
  0x4c   :  { %163 = vxpose.xlu1.b32.cont [12/16] %v118_v21, 128  ;;  %131 = vxpose.xlu0.b32.cont [12/16] %v117_v22, 128 }
  0x50   :  { %164 = vxpose.xlu1.b32.cont [13/16] %v118_v21, 128  ;;  %132 = vxpose.xlu0.b32.cont [13/16] %v117_v22, 128 }
  0x54   :  { %165 = vxpose.xlu1.b32.cont [14/16] %v118_v21, 128  ;;  %133 = vxpose.xlu0.b32.cont [14/16] %v117_v22, 128 }
  0x58   :  { %166 = vxpose.xlu1.b32.cont [15/16] %v118_v21, 128  ;;  %134 = vxpose.xlu0.b32.cont [15/16] %v117_v22, 128 }
  0x5c   :  { %167 = vxpose.xlu1.b32.end [16/16] %v118_v21, 128  ;;  %135 = vxpose.xlu0.b32.end [16/16] %v117_v22, 128 }
  0xa0   :  { %v168_v25 = vpop.trf.xlu1  ;;  %v136_v26 = vpop.trf.xlu0 }
  0xa4   :  { %v169_v27 = vpop.trf.xlu1  ;;  %v137_v28 = vpop.trf.xlu0 }
  0xa5   :  { %vm188_vm1 = vcmp.lt.s32.totalorder %v169_v27, %v168_v25  ;;  %vm186_vm2 = vcmp.gt.s32.totalorder %v137_v28, %v136_v26  ;;  %vm187_vm3 = vcmp.eq.s32.totalorder %v137_v28, %v136_v26 }
  0xa6   :  { %vm189_vm4 = vmand %vm187_vm3, %vm188_vm1 }
  0xa7   :  { %vm190_vm5 = vmor %vm186_vm2, %vm189_vm4 }
  0xa8   :  { %v191_v29 = vsel %vm190_vm5, %v137_v28, %v136_v26  ;;  %v170_v30 = vpop.trf.xlu1  ;;  %v192_v31 = vsel %vm190_vm5, %v169_v27, %v168_v25  ;;  %v138_v32 = vpop.trf.xlu0 }
  0xa9   :  { %vm197_vm6 = vcmp.lt.s32.totalorder %v170_v30, %v192_v31  ;;  %vm195_vm7 = vcmp.gt.s32.totalorder %v138_v32, %v191_v29  ;;  %vm196_vm8 = vcmp.eq.s32.totalorder %v138_v32, %v191_v29 }
  0xaa   :  { %vm198_vm9 = vmand %vm196_vm8, %vm197_vm6 }
  0xab   :  { %vm199_vm10 = vmor %vm195_vm7, %vm198_vm9 }
  0xac   :  { %v200_v33 = vsel %vm199_vm10, %v138_v32, %v191_v29  ;;  %v171_v34 = vpop.trf.xlu1  ;;  %v201_v35 = vsel %vm199_vm10, %v170_v30, %v192_v31  ;;  %v139_v36 = vpop.trf.xlu0 }
  0xad   :  { %vm206_vm11 = vcmp.lt.s32.totalorder %v171_v34, %v201_v35  ;;  %vm204_vm12 = vcmp.gt.s32.totalorder %v139_v36, %v200_v33  ;;  %vm205_vm13 = vcmp.eq.s32.totalorder %v139_v36, %v200_v33 }
  0xae   :  { %vm207_vm14 = vmand %vm205_vm13, %vm206_vm11 }
  0xaf   :  { %vm208_vm15 = vmor %vm204_vm12, %vm207_vm14 }
  0xb0   :  { %v209_v37 = vsel %vm208_vm15, %v139_v36, %v200_v33  ;;  %v172_v38 = vpop.trf.xlu1  ;;  %v210_v39 = vsel %vm208_vm15, %v171_v34, %v201_v35  ;;  %v140_v40 = vpop.trf.xlu0 }
  0xb1   :  { %vm215_vm0 = vcmp.lt.s32.totalorder %v172_v38, %v210_v39  ;;  %vm213_vm1 = vcmp.gt.s32.totalorder %v140_v40, %v209_v37  ;;  %vm214_vm2 = vcmp.eq.s32.totalorder %v140_v40, %v209_v37 }
  0xb2   :  { %vm216_vm3 = vmand %vm214_vm2, %vm215_vm0 }
  0xb3   :  { %vm217_vm4 = vmor %vm213_vm1, %vm216_vm3 }
  0xb4   :  { %v218_v41 = vsel %vm217_vm4, %v140_v40, %v209_v37  ;;  %v173_v42 = vpop.trf.xlu1  ;;  %v219_v43 = vsel %vm217_vm4, %v172_v38, %v210_v39  ;;  %v141_v44 = vpop.trf.xlu0 }
  0xb5   :  { %vm224_vm5 = vcmp.lt.s32.totalorder %v173_v42, %v219_v43  ;;  %vm222_vm6 = vcmp.gt.s32.totalorder %v141_v44, %v218_v41  ;;  %vm223_vm7 = vcmp.eq.s32.totalorder %v141_v44, %v218_v41 }
  0xb6   :  { %vm225_vm8 = vmand %vm223_vm7, %vm224_vm5 }
  0xb7   :  { %vm226_vm9 = vmor %vm222_vm6, %vm225_vm8 }
  0xb8   :  { %v227_v45 = vsel %vm226_vm9, %v141_v44, %v218_v41  ;;  %v174_v46 = vpop.trf.xlu1  ;;  %v228_v47 = vsel %vm226_vm9, %v173_v42, %v219_v43  ;;  %v142_v48 = vpop.trf.xlu0 }
  0xb9   :  { %vm233_vm10 = vcmp.lt.s32.totalorder %v174_v46, %v228_v47  ;;  %vm231_vm11 = vcmp.gt.s32.totalorder %v142_v48, %v227_v45  ;;  %vm232_vm12 = vcmp.eq.s32.totalorder %v142_v48, %v227_v45 }
  0xba   :  { %vm234_vm13 = vmand %vm232_vm12, %vm233_vm10 }
  0xbb   :  { %vm235_vm14 = vmor %vm231_vm11, %vm234_vm13 }
  0xbc   :  { %v236_v49 = vsel %vm235_vm14, %v142_v48, %v227_v45  ;;  %v175_v50 = vpop.trf.xlu1  ;;  %v237_v51 = vsel %vm235_vm14, %v174_v46, %v228_v47  ;;  %v143_v52 = vpop.trf.xlu0 }
  0xbd   :  { %vm242_vm15 = vcmp.lt.s32.totalorder %v175_v50, %v237_v51  ;;  %vm240_vm0 = vcmp.gt.s32.totalorder %v143_v52, %v236_v49  ;;  %vm241_vm1 = vcmp.eq.s32.totalorder %v143_v52, %v236_v49 }
  0xbe   :  { %vm243_vm2 = vmand %vm241_vm1, %vm242_vm15 }
  0xbf   :  { %vm244_vm3 = vmor %vm240_vm0, %vm243_vm2 }
  0xc0   :  { %v245_v53 = vsel %vm244_vm3, %v143_v52, %v236_v49  ;;  %v176_v54 = vpop.trf.xlu1  ;;  %v246_v55 = vsel %vm244_vm3, %v175_v50, %v237_v51  ;;  %v144_v56 = vpop.trf.xlu0 }
  0xc1   :  { %vm251_vm4 = vcmp.lt.s32.totalorder %v176_v54, %v246_v55  ;;  %vm249_vm5 = vcmp.gt.s32.totalorder %v144_v56, %v245_v53  ;;  %vm250_vm6 = vcmp.eq.s32.totalorder %v144_v56, %v245_v53 }
  0xc2   :  { %vm252_vm7 = vmand %vm250_vm6, %vm251_vm4 }
  0xc3   :  { %vm253_vm8 = vmor %vm249_vm5, %vm252_vm7 }
  0xc4   :  { %v254_v57 = vsel %vm253_vm8, %v144_v56, %v245_v53  ;;  %v177_v58 = vpop.trf.xlu1  ;;  %v255_v59 = vsel %vm253_vm8, %v176_v54, %v246_v55  ;;  %v145_v60 = vpop.trf.xlu0  ;;  %v1041_v54 = vmov 839939668  }
  0xc5   :  { %vm260_vm9 = vcmp.lt.s32.totalorder %v177_v58, %v255_v59  ;;  %vm258_vm10 = vcmp.gt.s32.totalorder %v145_v60, %v254_v57  ;;  %vm259_vm11 = vcmp.eq.s32.totalorder %v145_v60, %v254_v57  ;;  %v520_v55 = vunpack.c.l.s4 %v1041_v54 }
  0xc6   :  { %vm261_vm12 = vmand %vm259_vm11, %vm260_vm9 }
  0xc7   :  { %vm262_vm13 = vmor %vm258_vm10, %vm261_vm12  ;;  %v521_v56 = vunpack.c.0.s8 %v520_v55 }
  0xc8   :  { %v263_v61 = vsel %vm262_vm13, %v145_v60, %v254_v57  ;;  %v178_v62 = vpop.trf.xlu1  ;;  %v264_v63 = vsel %vm262_vm13, %v177_v58, %v255_v59  ;;  %v146_v0 = vpop.trf.xlu0  ;;  %v1042_v57 = vmov 1417023538  }
  0xc9   :  { %vm269_vm14 = vcmp.lt.s32.totalorder %v178_v62, %v264_v63  ;;  %vm267_vm15 = vcmp.gt.s32.totalorder %v146_v0, %v263_v61  ;;  %vm268_vm0 = vcmp.eq.s32.totalorder %v146_v0, %v263_v61  ;;  %v548_v58 = vunpack.c.l.s4 %v1042_v57 }
  0xca   :  { %vm270_vm1 = vmand %vm268_vm0, %vm269_vm14 }
  0xcb   :  { %vm271_vm2 = vmor %vm267_vm15, %vm270_vm1 }
  0xcc   :  { %v272_v3 = vsel %vm271_vm2, %v146_v0, %v263_v61  ;;  %v179_v4 = vpop.trf.xlu1  ;;  %v273_v5 = vsel %vm271_vm2, %v178_v62, %v264_v63  ;;  %v147_v6 = vpop.trf.xlu0  ;;  %v1070_v61 = vsub.s32 %v521_v56, %v1064_v2  ;;  %v541_v62 = vand.u32 4, %v1064_v2 }
  0xcd   :  { %vm278_vm3 = vcmp.lt.s32.totalorder %v179_v4, %v273_v5  ;;  %vm276_vm4 = vcmp.gt.s32.totalorder %v147_v6, %v272_v3  ;;  %vm277_vm5 = vcmp.eq.s32.totalorder %v147_v6, %v272_v3  ;;  %v549_v63 = vunpack.c.0.s8 %v548_v58 }
  0xce   :  { %vm279_vm6 = vmand %vm277_vm5, %vm278_vm3 }
  0xcf   :  { %vm280_vm7 = vmor %vm276_vm4, %vm279_vm6 }
  0xd0   :  { %v281_v7 = vsel %vm280_vm7, %v147_v6, %v272_v3  ;;  %v180_v8 = vpop.trf.xlu1  ;;  %v282_v9 = vsel %vm280_vm7, %v179_v4, %v273_v5  ;;  %v148_v10 = vpop.trf.xlu0 }
  0xd1   :  { %vm287_vm8 = vcmp.lt.s32.totalorder %v180_v8, %v282_v9  ;;  %vm285_vm9 = vcmp.gt.s32.totalorder %v148_v10, %v281_v7  ;;  %vm286_vm10 = vcmp.eq.s32.totalorder %v148_v10, %v281_v7 }
  0xd2   :  { %vm288_vm11 = vmand %vm286_vm10, %vm287_vm8 }
  0xd3   :  { %vm289_vm12 = vmor %vm285_vm9, %vm288_vm11 }
  0xd4   :  { %v290_v11 = vsel %vm289_vm12, %v148_v10, %v281_v7  ;;  %v181_v12 = vpop.trf.xlu1  ;;  %v291_v13 = vsel %vm289_vm12, %v180_v8, %v282_v9  ;;  %v149_v14 = vpop.trf.xlu0 }
  0xd5   :  { %vm296_vm13 = vcmp.lt.s32.totalorder %v181_v12, %v291_v13  ;;  %vm294_vm14 = vcmp.gt.s32.totalorder %v149_v14, %v290_v11  ;;  %vm295_vm15 = vcmp.eq.s32.totalorder %v149_v14, %v290_v11 }
  0xd6   :  { %vm297_vm0 = vmand %vm295_vm15, %vm296_vm13 }
  0xd7   :  { %vm298_vm1 = vmor %vm294_vm14, %vm297_vm0 }
  0xd8   :  { %v299_v15 = vsel %vm298_vm1, %v149_v14, %v290_v11  ;;  %v182_v16 = vpop.trf.xlu1  ;;  %v300_v17 = vsel %vm298_vm1, %v181_v12, %v291_v13  ;;  %v150_v18 = vpop.trf.xlu0  ;;  %v1043_v11 = vmov 1732584193   ;;  %v1082_v13 = vsub.s32 %v549_v63, %v1064_v2 }
  0xd9   :  { %vm305_vm2 = vcmp.lt.s32.totalorder %v182_v16, %v300_v17  ;;  %vm303_vm3 = vcmp.gt.s32.totalorder %v150_v18, %v299_v15  ;;  %vm304_vm4 = vcmp.eq.s32.totalorder %v150_v18, %v299_v15  ;;  %v576_v12 = vunpack.c.l.s4 %v1043_v11 }
  0xda   :  { %vm306_vm5 = vmand %vm304_vm4, %vm305_vm2  ;;  %v569_v14 = vand.u32 2, %v1064_v2 }
  0xdb   :  { %vm307_vm6 = vmor %vm303_vm3, %vm306_vm5 }
  0xdc   :  { %v308_v19 = vsel %vm307_vm6, %v150_v18, %v299_v15  ;;  %v183_v20 = vpop.trf.xlu1  ;;  %v309_v21 = vsel %vm307_vm6, %v182_v16, %v300_v17  ;;  %v151_v22 = vpop.trf.xlu0  ;;  %v577_v15 = vunpack.c.0.s8 %v576_v12 }
  0xdd   :  { %vm314_vm7 = vcmp.lt.s32.totalorder %v183_v20, %v309_v21  ;;  %vm312_vm8 = vcmp.gt.s32.totalorder %v151_v22, %v308_v19  ;;  %vm313_vm9 = vcmp.eq.s32.totalorder %v151_v22, %v308_v19 }
  0xde   :  { %vm315_vm10 = vmand %vm313_vm9, %vm314_vm7 }
  0xdf   :  { %vm316_vm11 = vmor %vm312_vm8, %vm315_vm10 }
  0xe0   :  { %v317_v24 = vsel %vm316_vm11, %v151_v22, %v308_v19  ;;  %v318_v25 = vsel %vm316_vm11, %v183_v20, %v309_v21  ;;  %v1096_v22 = vsub.s32 %v577_v15, %v1064_v2 }
  0xe1   :  { %v320_v26 = vrot.slane %v317_v24, 1  ;;  %v321_v27 = vrot.slane %v318_v25, 1 }
  0xe3   :  { %vm323_vm12 = vcmp.gt.s32.totalorder %v320_v26, %v317_v24  ;;  %vm324_vm13 = vcmp.eq.s32.totalorder %v320_v26, %v317_v24  ;;  %vm325_vm14 = vcmp.lt.s32.totalorder %v321_v27, %v318_v25 }
  0xe4   :  { %vm326_vm15 = vmand %vm324_vm13, %vm325_vm14 }
  0xe5   :  { %vm327_vm0 = vmor %vm323_vm12, %vm326_vm15 }
  0xe6   :  { %v328_v28 = vsel %vm327_vm0, %v320_v26, %v317_v24  ;;  %v329_v29 = vsel %vm327_vm0, %v321_v27, %v318_v25  ;;  %v597_v27 = vand.u32 1, %v1064_v2 }
  0xe7   :  { %v331_v30 = vrot.slane %v328_v28, 1  ;;  %v332_v31 = vrot.slane %v329_v29, 1 }
  0xe9   :  { %vm334_vm1 = vcmp.gt.s32.totalorder %v331_v30, %v328_v28  ;;  %vm335_vm2 = vcmp.eq.s32.totalorder %v331_v30, %v328_v28  ;;  %vm336_vm3 = vcmp.lt.s32.totalorder %v332_v31, %v329_v29 }
  0xea   :  { %vm337_vm4 = vmand %vm335_vm2, %vm336_vm3 }
  0xeb   :  { %vm338_vm5 = vmor %vm334_vm1, %vm337_vm4 }
  0xec   :  { %v339_v32 = vsel %vm338_vm5, %v331_v30, %v328_v28  ;;  %v340_v33 = vsel %vm338_vm5, %v332_v31, %v329_v29 }
  0xed   :  { %v342_v34 = vrot.slane %v339_v32, 1  ;;  %v343_v35 = vrot.slane %v340_v33, 1 }
  0xef   :  { %vm347_vm6 = vcmp.lt.s32.totalorder %v343_v35, %v340_v33  ;;  %vm345_vm7 = vcmp.gt.s32.totalorder %v342_v34, %v339_v32  ;;  %vm346_vm8 = vcmp.eq.s32.totalorder %v342_v34, %v339_v32 }
  0xf0   :  { %vm348_vm9 = vmand %vm346_vm8, %vm347_vm6 }
  0xf1   :  { %vm349_vm10 = vmor %vm345_vm7, %vm348_vm9 }
  0xf2   :  { %v350_v36 = vsel %vm349_vm10, %v342_v34, %v339_v32  ;;  %v351_v37 = vsel %vm349_vm10, %v343_v35, %v340_v33 }
  0xf3   :  { %v353_v38 = vrot.slane %v350_v36, 1  ;;  %v354_v39 = vrot.slane %v351_v37, 1 }
  0xf5   :  { %vm356_vm11 = vcmp.gt.s32.totalorder %v353_v38, %v350_v36  ;;  %vm357_vm12 = vcmp.eq.s32.totalorder %v353_v38, %v350_v36  ;;  %vm358_vm13 = vcmp.lt.s32.totalorder %v354_v39, %v351_v37 }
  0xf6   :  { %vm359_vm14 = vmand %vm357_vm12, %vm358_vm13 }
  0xf7   :  { %vm360_vm15 = vmor %vm356_vm11, %vm359_vm14 }
  0xf8   :  { %v361_v40 = vsel %vm360_vm15, %v353_v38, %v350_v36  ;;  %v362_v41 = vsel %vm360_vm15, %v354_v39, %v351_v37 }
  0xf9   :  { %v364_v42 = vrot.slane %v361_v40, 1  ;;  %v365_v43 = vrot.slane %v362_v41, 1 }
  0xfb   :  { %vm367_vm0 = vcmp.gt.s32.totalorder %v364_v42, %v361_v40  ;;  %vm368_vm1 = vcmp.eq.s32.totalorder %v364_v42, %v361_v40  ;;  %vm369_vm2 = vcmp.lt.s32.totalorder %v365_v43, %v362_v41 }
  0xfc   :  { %vm370_vm3 = vmand %vm368_vm1, %vm369_vm2 }
  0xfd   :  { %vm371_vm4 = vmor %vm367_vm0, %vm370_vm3 }
  0xfe   :  { %v372_v44 = vsel %vm371_vm4, %v364_v42, %v361_v40  ;;  %v373_v45 = vsel %vm371_vm4, %v365_v43, %v362_v41  ;;  %vm1077_vm4 = vcmp.ne.s32.totalorder %v541_v62, 0 }
  0xff   :  { %v375_v46 = vrot.slane %v372_v44, 1  ;;  %v376_v47 = vrot.slane %v373_v45, 1 }
 0x101   :  { %vm378_vm5 = vcmp.gt.s32.totalorder %v375_v46, %v372_v44  ;;  %vm379_vm6 = vcmp.eq.s32.totalorder %v375_v46, %v372_v44  ;;  %vm380_vm7 = vcmp.lt.s32.totalorder %v376_v47, %v373_v45 }
 0x102   :  { %vm381_vm8 = vmand %vm379_vm6, %vm380_vm7 }
 0x103   :  { %vm382_vm9 = vmor %vm378_vm5, %vm381_vm8 }
 0x104   :  { %v383_v48 = vsel %vm382_vm9, %v375_v46, %v372_v44  ;;  %v384_v49 = vsel %vm382_vm9, %v376_v47, %v373_v45 }
 0x105   :  { %v386_v50 = vrot.slane %v383_v48, 1  ;;  %v387_v51 = vrot.slane %v384_v49, 1 }
 0x107   :  { %vm389_vm10 = vcmp.gt.s32.totalorder %v386_v50, %v383_v48  ;;  %vm390_vm11 = vcmp.eq.s32.totalorder %v386_v50, %v383_v48  ;;  %vm391_vm12 = vcmp.lt.s32.totalorder %v387_v51, %v384_v49 }
 0x108   :  { %vm392_vm13 = vmand %vm390_vm11, %vm391_vm12 }
 0x109   :  { %vm393_vm14 = vmor %vm389_vm10, %vm392_vm13 }
 0x10a   :  { %v395_v52 = vsel %vm393_vm14, %v387_v51, %v384_v49  ;;  %v394_v53 = vsel %vm393_vm14, %v386_v50, %v383_v48 }
 0x10b   :  { %402 = vxpose.xlu0.b32.start.end [1/1] (short) (narrow) %v395_v52, 8  ;;  %398 = vst [vmem:[#allocation13] sm:$0x1] %v394_v53  ;;  %400 = vst [vmem:[#allocation15] sm:$0x1] %v395_v52 }
 0x112   :  { %v483_v59 = vld [vmem:[#allocation13 + $0x7] ss:$-1 sm:$0xff]  ;;  %v489_v60 = vld [vmem:[#allocation15 + $0x7] ss:$-1 sm:$0xff] }
 0x113   :  { %vm1001_vm15 = vcmp.lt.s32.totalorder %v483_v59, 2147483648  ;;  %vm1002_vm0 = vcmp.eq.s32.totalorder %v483_v59, 2147483648  ;;  %vm1003_vm1 = vcmp.gt.s32.totalorder %v489_v60, 2147483647 }
 0x114   :  { %vm504_vm2 = vmand %vm1002_vm0, %vm1003_vm1  ;;  %vm1089_vm0 = vcmp.ne.s32.totalorder %v569_v14, 0 }
 0x115   :  { %vm505_vm3 = vmor %vm1001_vm15, %vm504_vm2 }
 0x116   :  { %v506_v0 = vsel %vm505_vm3, 2147483648, %v483_v59  ;;  %v508_v3 = vsel %vm505_vm3, %v483_v59, 2147483648  ;;  %v510_v4 = vsel %vm505_vm3, 2147483647, %v489_v60  ;;  %v512_v5 = vsel %vm505_vm3, %v489_v60, 2147483647 }
 0x117   :  { %v525_v6 = vrot.slane %v506_v0, %v1070_v61  ;;  %v532_v7 = vrot.slane %v510_v4, %v1070_v61  ;;  %v706_v8 = vrot.slane %v508_v3, %v1070_v61  ;;  %v713_v9 = vrot.slane %v512_v5, %v1070_v61 }
 0x119   :  { %vm534_vm5 = vcmp.gt.s32.totalorder %v506_v0, %v525_v6  ;;  %vm535_vm6 = vcmp.eq.s32.totalorder %v506_v0, %v525_v6  ;;  %vm536_vm7 = vcmp.lt.s32.totalorder %v510_v4, %v532_v7  ;;  %vm716_vm9 = vcmp.eq.s32.totalorder %v508_v3, %v706_v8 }
 0x11a   :  { %vm537_vm8 = vmand %vm535_vm6, %vm536_vm7  ;;  %vm717_vm10 = vcmp.lt.s32.totalorder %v512_v5, %v713_v9  ;;  %vm715_vm12 = vcmp.gt.s32.totalorder %v508_v3, %v706_v8 }
 0x11b   :  { %vm538_vm11 = vmor %vm534_vm5, %vm537_vm8 }
 0x11c   :  { %vm543_vm13 = vmxor %vm538_vm11, %vm1077_vm4 }
 0x11d   :  { %v544_v16 = vsel %vm543_vm13, %v506_v0, %v525_v6  ;;  %v545_v17 = vsel %vm543_vm13, %v510_v4, %v532_v7  ;;  %vm718_vm14 = vmand %vm716_vm9, %vm717_vm10 }
 0x11e   :  { %v553_v18 = vrot.slane %v544_v16, %v1082_v13  ;;  %v560_v19 = vrot.slane %v545_v17, %v1082_v13  ;;  %vm719_vm15 = vmor %vm715_vm12, %vm718_vm14  ;;  %vm1105_vm14 = vcmp.ne.s32.totalorder %v597_v27, 0 }
 0x11f   :  { %vm724_vm1 = vmxor %vm719_vm15, %vm1077_vm4 }
 0x120   :  { %vm562_vm2 = vcmp.gt.s32.totalorder %v544_v16, %v553_v18  ;;  %vm563_vm3 = vcmp.eq.s32.totalorder %v544_v16, %v553_v18  ;;  %vm564_vm5 = vcmp.lt.s32.totalorder %v545_v17, %v560_v19  ;;  %v725_v21 = vsel %vm724_vm1, %v508_v3, %v706_v8 }
 0x121   :  { %vm565_vm6 = vmand %vm563_vm3, %vm564_vm5  ;;  %v726_v24 = vsel %vm724_vm1, %v512_v5, %v713_v9  ;;  %v734_v25 = vrot.slane %v725_v21, %v1082_v13 }
 0x122   :  { %vm566_vm7 = vmor %vm562_vm2, %vm565_vm6  ;;  %v741_v26 = vrot.slane %v726_v24, %v1082_v13 }
 0x123   :  { %vm571_vm8 = vmxor %vm566_vm7, %vm1089_vm0  ;;  %vm743_vm9 = vcmp.gt.s32.totalorder %v725_v21, %v734_v25  ;;  %vm744_vm10 = vcmp.eq.s32.totalorder %v725_v21, %v734_v25 }
 0x124   :  { %v572_v28 = vsel %vm571_vm8, %v544_v16, %v553_v18  ;;  %v573_v29 = vsel %vm571_vm8, %v545_v17, %v560_v19  ;;  %vm745_vm11 = vcmp.lt.s32.totalorder %v726_v24, %v741_v26 }
 0x125   :  { %v581_v30 = vrot.slane %v572_v28, %v1096_v22  ;;  %v588_v31 = vrot.slane %v573_v29, %v1096_v22  ;;  %vm746_vm12 = vmand %vm744_vm10, %vm745_vm11 }
 0x126   :  { %vm747_vm13 = vmor %vm743_vm9, %vm746_vm12 }
 0x127   :  { %vm590_vm15 = vcmp.gt.s32.totalorder %v572_v28, %v581_v30  ;;  %vm591_vm1 = vcmp.eq.s32.totalorder %v572_v28, %v581_v30  ;;  %vm592_vm2 = vcmp.lt.s32.totalorder %v573_v29, %v588_v31  ;;  %vm752_vm3 = vmxor %vm747_vm13, %vm1089_vm0 }
 0x128   :  { %vm593_vm5 = vmand %vm591_vm1, %vm592_vm2  ;;  %v753_v2 = vsel %vm752_vm3, %v725_v21, %v734_v25  ;;  %v754_v33 = vsel %vm752_vm3, %v726_v24, %v741_v26 }
 0x129   :  { %vm594_vm6 = vmor %vm590_vm15, %vm593_vm5  ;;  %v762_v34 = vrot.slane %v753_v2, %v1096_v22  ;;  %v769_v35 = vrot.slane %v754_v33, %v1096_v22 }
 0x12a   :  { %vm599_vm7 = vmxor %vm594_vm6, %vm1105_vm14 }
 0x12b   :  { %v600_v36 = vsel %vm599_vm7, %v572_v28, %v581_v30  ;;  %v601_v37 = vsel %vm599_vm7, %v573_v29, %v588_v31  ;;  %vm771_vm8 = vcmp.gt.s32.totalorder %v753_v2, %v762_v34  ;;  %vm772_vm9 = vcmp.eq.s32.totalorder %v753_v2, %v762_v34 }
 0x12c   :  { %v615_v38 = vrot.slane %v600_v36, %v1070_v61  ;;  %v622_v39 = vrot.slane %v601_v37, %v1070_v61  ;;  %vm773_vm10 = vcmp.lt.s32.totalorder %v754_v33, %v769_v35 }
 0x12d   :  { %vm774_vm11 = vmand %vm772_vm9, %vm773_vm10 }
 0x12e   :  { %vm624_vm12 = vcmp.gt.s32.totalorder %v600_v36, %v615_v38  ;;  %vm625_vm13 = vcmp.eq.s32.totalorder %v600_v36, %v615_v38  ;;  %vm626_vm15 = vcmp.lt.s32.totalorder %v601_v37, %v622_v39  ;;  %vm775_vm1 = vmor %vm771_vm8, %vm774_vm11 }
 0x12f   :  { %vm627_vm2 = vmand %vm625_vm13, %vm626_vm15 }
 0x130   :  { %vm628_vm3 = vmor %vm624_vm12, %vm627_vm2 }
 0x131   :  { %vm633_vm5 = vmxor %vm628_vm3, %vm1077_vm4 }
 0x132   :  { %v634_v40 = vsel %vm633_vm5, %v600_v36, %v615_v38  ;;  %v635_v41 = vsel %vm633_vm5, %v601_v37, %v622_v39  ;;  %vm780_vm6 = vmxor %vm775_vm1, %vm1105_vm14 }
 0x133   :  { %v643_v42 = vrot.slane %v634_v40, %v1082_v13  ;;  %v650_v43 = vrot.slane %v635_v41, %v1082_v13  ;;  %v781_v44 = vsel %vm780_vm6, %v753_v2, %v762_v34  ;;  %v782_v45 = vsel %vm780_vm6, %v754_v33, %v769_v35 }
 0x134   :  { %v796_v46 = vrot.slane %v781_v44, %v1070_v61  ;;  %v803_v47 = vrot.slane %v782_v45, %v1070_v61 }
 0x135   :  { %vm652_vm7 = vcmp.gt.s32.totalorder %v634_v40, %v643_v42  ;;  %vm653_vm8 = vcmp.eq.s32.totalorder %v634_v40, %v643_v42  ;;  %vm654_vm9 = vcmp.lt.s32.totalorder %v635_v41, %v650_v43 }
 0x136   :  { %vm655_vm10 = vmand %vm653_vm8, %vm654_vm9  ;;  %vm806_vm11 = vcmp.eq.s32.totalorder %v781_v44, %v796_v46  ;;  %vm807_vm12 = vcmp.lt.s32.totalorder %v782_v45, %v803_v47  ;;  %vm805_vm15 = vcmp.gt.s32.totalorder %v781_v44, %v796_v46 }
 0x137   :  { %vm656_vm13 = vmor %vm652_vm7, %vm655_vm10 }
 0x138   :  { %vm661_vm1 = vmxor %vm656_vm13, %vm1089_vm0 }
 0x139   :  { %v662_v48 = vsel %vm661_vm1, %v634_v40, %v643_v42  ;;  %v663_v49 = vsel %vm661_vm1, %v635_v41, %v650_v43  ;;  %vm808_vm2 = vmand %vm806_vm11, %vm807_vm12 }
 0x13a   :  { %v671_v50 = vrot.slane %v662_v48, %v1096_v22  ;;  %v678_v51 = vrot.slane %v663_v49, %v1096_v22  ;;  %vm809_vm3 = vmor %vm805_vm15, %vm808_vm2 }
 0x13b   :  { %vm814_vm5 = vmxor %vm809_vm3, %vm1077_vm4 }
 0x13c   :  { %vm680_vm6 = vcmp.gt.s32.totalorder %v662_v48, %v671_v50  ;;  %vm681_vm8 = vcmp.eq.s32.totalorder %v662_v48, %v671_v50  ;;  %vm682_vm9 = vcmp.lt.s32.totalorder %v663_v49, %v678_v51  ;;  %v815_v52 = vsel %vm814_vm5, %v781_v44, %v796_v46 }
 0x13d   :  { %vm683_vm7 = vmand %vm681_vm8, %vm682_vm9  ;;  %v816_v53 = vsel %vm814_vm5, %v782_v45, %v803_v47  ;;  %v824_v54 = vrot.slane %v815_v52, %v1082_v13 }
 0x13e   :  { %vm684_vm10 = vmor %vm680_vm6, %vm683_vm7  ;;  %v831_v55 = vrot.slane %v816_v53, %v1082_v13 }
 0x13f   :  { %vm689_vm11 = vmxor %vm684_vm10, %vm1105_vm14  ;;  %vm833_vm12 = vcmp.gt.s32.totalorder %v815_v52, %v824_v54  ;;  %vm834_vm13 = vcmp.eq.s32.totalorder %v815_v52, %v824_v54 }
 0x140   :  { %v1135_v56 = vsel %vm689_vm11, %v662_v48, %v671_v50  ;;  %v691_v57 = vsel %vm689_vm11, %v663_v49, %v678_v51  ;;  %vm835_vm4 = vcmp.lt.s32.totalorder %v816_v53, %v831_v55 }
 0x141   :  { %vm836_vm15 = vmand %vm834_vm13, %vm835_vm4  ;;  %902 = vxpose.xlu0.b32.start.end [1/1] (short) (narrow) %v691_v57, 8  ;;  %vm878_vm10 = vcmp.lt.s32.totalorder %v1135_v56, 0  ;;  %v879_v7 = vsub.s32 2147483647, %v1135_v56 }
 0x142   :  { %vm837_vm1 = vmor %vm833_vm12, %vm836_vm15 }
 0x143   :  { %vm842_vm2 = vmxor %vm837_vm1, %vm1089_vm0  ;;  %v880_v8 = vsel %vm878_vm10, %v879_v7, %v1135_v56 }
 0x144   :  { %v843_v58 = vsel %vm842_vm2, %v815_v52, %v824_v54  ;;  %v844_v59 = vsel %vm842_vm2, %v816_v53, %v831_v55 }
 0x145   :  { %v852_v60 = vrot.slane %v843_v58, %v1096_v22  ;;  %v859_v61 = vrot.slane %v844_v59, %v1096_v22  ;;  %883 = vxpose.xlu0.b32.start.end [1/1] (short) (narrow) %v880_v8, 8 }
 0x147   :  { %vm861_vm3 = vcmp.gt.s32.totalorder %v843_v58, %v852_v60  ;;  %vm862_vm5 = vcmp.eq.s32.totalorder %v843_v58, %v852_v60  ;;  %vm863_vm6 = vcmp.lt.s32.totalorder %v844_v59, %v859_v61 }
 0x148   :  { %vm864_vm8 = vmand %vm862_vm5, %vm863_vm6 }
 0x149   :  { %vm865_vm9 = vmor %vm861_vm3, %vm864_vm8 }
 0x14a   :  { %vm870_vm7 = vmxor %vm865_vm9, %vm1105_vm14 }
 0x14b   :  { %v871_v62 = vsel %vm870_vm7, %v843_v58, %v852_v60  ;;  %v872_v63 = vsel %vm870_vm7, %v844_v59, %v859_v61 }
 0x14c   :  { %874 = vst [vmem:[#allocation13] sm:$0xff] %v871_v62  ;;  %875 = vst [vmem:[#allocation15] sm:$0xff] %v872_v63 }
 0x18b   :  { %v418_v0 = vpop.trf.xlu0 }
 0x18c   :  { %v457_v3 = vrot.slane %v418_v0, 1  ;;  %1004 = vpush %v418_v0 }
 0x18e   :  { %1006 = vpush %v457_v3 }
 0x1bd   :  { %s1005_s0 = spop %1004 }
 0x1be   :  { %s435_s11 = sshrl.u32 %s1005_s0, 9  ;;  %s437_s12 = ssub.s32 0, %s1005_s0 }
 0x1bf   :  { %p436_p0 = scmp.lt.s32.totalorder %s1005_s0, 0  ;;  %s993_s13 = smin.u32 %s1005_s0, %s437_s12 }
 0x1c0   :  { %s439_s14 = sand.u32 511, %s993_s13   ;;  %s995_s15 = sshll.u32 %s435_s11, 3 }
 0x1c1   :  { %s440_s16 = ssub.s32 0, %s439_s14  ;;  %s1007_s17 = spop %1006  ;;  %v903_v9 = vpop.trf.xlu0 }
 0x1c2   :  { %s1175_s16 = smov (!%p436_p0, %s440_s16), %s439_s14  ;;  %s461_s21 = ssub.s32 0, %s1007_s17  ;;  %919 = vst [vmem:[#allocation10] sm:$0xff] %v903_v9 }
 0x1c3   :  { %s442_s18 = sshrl.u32 %s1175_s16, 7  ;;  %s444_s19 = sand.u32 127, %s1175_s16  }
 0x1c4   :  { %s994_s20 = sshll.u32 %s442_s18, 8  ;;  %s997_s23 = smin.u32 %s1007_s17, %s461_s21 }
 0x1c5   :  { %s445_s22 = sadd.s32 %s994_s20, %s444_s19  ;;  %p460_p1 = scmp.lt.s32.totalorder %s1007_s17, 0  ;;  %v884_v10 = vpop.trf.xlu0 }
 0x1c6   :  { %v447_v4 = vstv %s445_s22  ;;  %s463_s24 = sand.u32 511, %s997_s23   ;;  %s451_s26 = scalar_lea.vmem [#allocation16], %s995_s15  ;;  %900 = vst [vmem:[#allocation7] sm:$0xff] %v884_v10 }
 0x1c7   :  { %vm449_vm0 = vcmp.eq.s32.totalorder %v46_v1, %v447_v4  ;;  %s464_s25 = ssub.s32 0, %s463_s24  ;;  %s459_s27 = sshrl.u32 %s1007_s17, 9 }
 0x1c8   :  { %452 = vst.msk [vmem:[%s451_s26] sm:$0xff] %vm449_vm0, %v1039_v23  ;;  %s1177_s25 = smov (!%p460_p1, %s464_s25), %s463_s24  ;;  %s999_s4 = sshll.u32 %s459_s27, 3 }
 0x1c9   :  { %s466_s28 = sshrl.u32 %s1177_s25, 7  ;;  %s468_s29 = sand.u32 127, %s1177_s25   ;;  %v929_v11 = vld [vmem:[#allocation10] sm:$0x3] }
 0x1ca   :  { %s998_s30 = sshll.u32 %s466_s28, 8  ;;  %s475_s5 = scalar_lea.vmem [#allocation16], %s999_s4  ;;  %931 = vst [vmem:[#allocation11] sm:$0x3] %v929_v11 }
 0x1cb   :  { %s469_s3 = sadd.s32 %s998_s30, %s468_s29 }
 0x1cc   :  { %v471_v5 = vstv %s469_s3 }
 0x1cd   :  { %v472_v6 = vadd.s32 128, %v471_v5 }
 0x1cf   :  { %vm473_vm14 = vcmp.eq.s32.totalorder %v46_v1, %v472_v6  ;;  %v923_v1 = vld [vmem:[#allocation7] sm:$0x3] }
 0x1d0   :  { %476 = vst.msk [vmem:[%s475_s5] sm:$0xff] %vm473_vm14, %v1039_v23  ;;  %925 = vst [vmem:[#allocation8] sm:$0x3] %v923_v1 }
 0x1d1   :  { %1026 = shalt.err (!%p1023_p6)
}
 0x1d2   :  { %s1027_s0 = scalar_lea.hbm %s1166_s1, 32 }
 0x1d3   :  { %p1028_p7 = scmp.ne.s32.totalorder %s1166_s1, %s1027_s0  ;;  %p1031_p8 = scmp.lt.u32.totalorder %s1027_s0, %s1166_s1 }
 0x1d5   :  { %p1033_p9 = pnand %p1031_p8, %p1028_p7 }
 0x1d7   :  { %1036 = shalt.err (!%p1033_p9)
}
 0x1d8   :  { %939 = dma.vmem_to_hbm [thread:$0]  %s937_s7, 32, %s1166_s1, [#allocation9]   ;;  %v955_v23 = vld [vmem:[#allocation11] sm:$0x3] }
 0x1d9   :  { %956 = vst [vmem:[%s1167_s2] sm:$0x3] %v955_v23 }
 0x1da   :  { %1037 = dma.done.wait [#allocation9], 32  }
 0x1db   :  { %1038 = vsyncadd [#allocation9], 4294967264 }
 0x1dc   :  { %972 = vsyncpa [#allocation9], 1 }

// kernel: gcn_forward.7
= control target key start
LH: loop header
LB: loop body
LE: loop exit
PB: predicated region body
PF: predicated region fallthrough
CT: control target
= control target key end

     0   :  { %s1472_s0 = inlined_call_operand.vmem [shape: s32[4,1], index: 0, kind: input, shape index: {}]   ;;  %s1473_s1 = inlined_call_operand.vmem [shape: s32[1,4], index: 1, kind: input, shape index: {}]   ;;  %s1474_s2 = inlined_call_operand.vmem [shape: f32[8,8], index: 2, kind: input, shape index: {}]   ;;  %s1475_s3 = inlined_call_operand.vmem [shape: f32[8,128], index: 3, kind: input, shape index: {}]   ;;  %s1476_s4 = inlined_call_operand.vmem [shape: f32[128,128], index: 4, kind: input, shape index: {}]   ;;  %s1477_s5 = inlined_call_operand.vmem [shape: f32[1,128], index: 5, kind: input, shape index: {}]   ;;  %s1478_s6 = inlined_call_operand.vmem [shape: f32[128,128], index: 6, kind: input, shape index: {}]   ;;  %s1479_s7 = inlined_call_operand.vmem [shape: f32[1,128], index: 7, kind: input, shape index: {}]   ;;  %s1480_s8 = inlined_call_operand.vmem [shape: f32[1,128], index: 8, kind: input, shape index: {}]   ;;  %s1481_s9 = inlined_call_operand.vmem [shape: f32[1,128], index: 9, kind: input, shape index: {}]   ;;  %s1482_s10 = inlined_call_operand.vmem [shape: f32[128,2], index: 10, kind: input, shape index: {}]   ;;  %s1483_s11 = inlined_call_operand.<no memory space> [shape: f32[1,1], index: 11, kind: input, shape index: {}]   ;;  %s1484_s12 = inlined_call_operand.vmem [shape: f32[4,128], index: 12, kind: output, shape index: {0}]   ;;  %s1485_s13 = inlined_call_operand.vmem [shape: f32[1,4], index: 13, kind: output, shape index: {1}]   ;;  %s1486_s14 = inlined_call_operand.hbm [shape: f32[4,4], index: 14, kind: output, shape index: {2}]  }
   0x1   :  { %v20_v0 = vstv %s1483_s11 }
   0x2   :  { %21 = vst [vmem:[#allocation2] sm:$0x1] %v20_v0 }
   0x3   :  { %v51_v1 = vld [vmem:[%s1472_s0] sm:$0xf] }
   0x4   :  { %22 = vsyncpa [#allocation4], 0  ;;  %v1129_v2 = vmov 0   ;;  %v1130_v3 = vmov 0.0   ;;  %v66_v4 = vld [vmem:[%s1475_s3] sm:$0xff]  ;;  %vm1131_vm0 = vmmov 0   ;;  %v47_v30 = vlaneseq }
   0x5   :  { %1097 = vset.pattern.permute.xlu0 %v1129_v2  ;;  %888 = vmatprep.subr.mxu0 %v1130_v3  ;;  %v292_v5 = vld [vmem:[%s1476_s4] sm:$0xff]  ;;  %v293_v6 = vld [vmem:[%s1476_s4 + $0x8] sm:$0xff]  ;;  %v294_v7 = vld [vmem:[%s1476_s4 + $0x10] sm:$0xff]  ;;  %v1132_v8 = vmov 0.0|0.0   ;;  %vm67_vm1 = vcmask 64512   ;;  %v1133_v37 = vmov 1.0  }
   0x6   :  { %53 = vperm.xlu0 %1097, %v51_v1   ;;  %1098 = vset.pattern.permute.xlu1 %v1129_v2  ;;  %v1019_v9 = vpack.c.bf16 %v293_v6, %v292_v5  ;;  %v295_v10 = vld [vmem:[%s1476_s4 + $0x18] sm:$0xff]  ;;  %v296_v12 = vld [vmem:[%s1476_s4 + $0x20] sm:$0xff]  ;;  %v297_v13 = vld [vmem:[%s1476_s4 + $0x28] sm:$0xff]  ;;  %v1283_v31 = vand.u32 127, %v47_v30  ;;  %v1297_v35 = vshrl.u32 %v47_v30, 7  ;;  %vm285_vm4 = vcmask 27648  }
   0x7   :  { %889 = vmatpush3.msra.mxu0 %v66_v4  ;;  %890 = vmatprep.mubr.msk.f32.mxu0 %vm1131_vm0, %v1130_v3  ;;  %v1022_v11 = vpack.c.bf16 %v295_v10, %v294_v7  ;;  %v1025_v14 = vpack.c.bf16 %v297_v13, %v296_v12  ;;  %v298_v15 = vld [vmem:[%s1476_s4 + $0x30] sm:$0xff]  ;;  %v299_v16 = vld [vmem:[%s1476_s4 + $0x38] sm:$0xff]  ;;  %v300_v18 = vld [vmem:[%s1476_s4 + $0x40] sm:$0xff]  ;;  %vm383_vm5 = vcmask 1043456   ;;  %vm379_vm6 = vcmask 31744  }
   0x8   :  { %893 = vmatprep.subr.mxu0 %v1130_v3  ;;  %935 = vmatprep.mubr.msk.f32.mxu1 %vm1131_vm0, %v1130_v3  ;;  %v1028_v17 = vpack.c.bf16 %v299_v16, %v298_v15  ;;  %v301_v19 = vld [vmem:[%s1476_s4 + $0x48] sm:$0xff]  ;;  %v302_v21 = vld [vmem:[%s1476_s4 + $0x50] sm:$0xff]  ;;  %v303_v22 = vld [vmem:[%s1476_s4 + $0x58] sm:$0xff] }
   0x9   :  { %1018 = vmatprep.subr.bf16.mxu1 %v1132_v8  ;;  %v1031_v20 = vpack.c.bf16 %v301_v19, %v300_v18  ;;  %v1034_v23 = vpack.c.bf16 %v303_v22, %v302_v21  ;;  %v304_v24 = vld [vmem:[%s1476_s4 + $0x60] sm:$0xff]  ;;  %v305_v25 = vld [vmem:[%s1476_s4 + $0x68] sm:$0xff]  ;;  %v306_v27 = vld [vmem:[%s1476_s4 + $0x70] sm:$0xff] }
   0xa   :  { %1020 = vmatpush3.bf16.msra.mxu1 %v1019_v9  ;;  %v1037_v26 = vpack.c.bf16 %v305_v25, %v304_v24  ;;  %v307_v28 = vld [vmem:[%s1476_s4 + $0x78] sm:$0xff]  ;;  %v141_v33 = vld [vmem:[%s1474_s2] sm:$0xff]  ;;  %v467_v50 = vld [vmem:[%s1478_s6 + $0x8] sm:$0xff] }
   0xb   :  { %1021 = vmatprep.subr.bf16.mxu1 %v1132_v8  ;;  %v1040_v29 = vpack.c.bf16 %v307_v28, %v306_v27  ;;  %v812_v36 = vld [vmem:[%s1473_s1] ss:$0 sm:$0xff]  ;;  %v468_v54 = vld [vmem:[%s1478_s6 + $0x10] sm:$0xff]  ;;  %v469_v55 = vld [vmem:[%s1478_s6 + $0x18] sm:$0xff]  ;;  %s1134_s1 = smov 127  }
   0xc   :  { %vm63_vm3 = vcmp.eq.s32.totalorder %v1297_v35, %v812_v36  ;;  %v466_v49 = vld [vmem:[%s1478_s6] sm:$0xff]  ;;  %v1046_v56 = vpack.c.bf16 %v469_v55, %v468_v54  ;;  %v471_v58 = vld [vmem:[%s1478_s6 + $0x28] sm:$0xff]  ;;  %v472_v60 = vld [vmem:[%s1478_s6 + $0x30] sm:$0xff] }
   0xd   :  { %v1043_v53 = vpack.c.bf16 %v467_v50, %v466_v49  ;;  %v470_v57 = vld [vmem:[%s1478_s6 + $0x20] sm:$0xff]  ;;  %v473_v61 = vld [vmem:[%s1478_s6 + $0x38] sm:$0xff]  ;;  %v475_v0 = vld [vmem:[%s1478_s6 + $0x48] sm:$0xff] }
   0xe   :  { %1023 = vmatpush3.bf16.msra.mxu1 %v1022_v11  ;;  %v1049_v59 = vpack.c.bf16 %v471_v58, %v470_v57  ;;  %v1052_v62 = vpack.c.bf16 %v473_v61, %v472_v60  ;;  %v474_v63 = vld [vmem:[%s1478_s6 + $0x40] sm:$0xff]  ;;  %v476_v2 = vld [vmem:[%s1478_s6 + $0x50] sm:$0xff]  ;;  %v477_v4 = vld [vmem:[%s1478_s6 + $0x58] sm:$0xff] }
   0xf   :  { %1024 = vmatprep.subr.bf16.mxu1 %v1132_v8  ;;  %v1055_v1 = vpack.c.bf16 %v475_v0, %v474_v63  ;;  %v1058_v5 = vpack.c.bf16 %v477_v4, %v476_v2  ;;  %v478_v6 = vld [vmem:[%s1478_s6 + $0x60] sm:$0xff]  ;;  %v479_v7 = vld [vmem:[%s1478_s6 + $0x68] sm:$0xff]  ;;  %v480_v10 = vld [vmem:[%s1478_s6 + $0x70] sm:$0xff] }
  0x10   :  { %v1061_v9 = vpack.c.bf16 %v479_v7, %v478_v6  ;;  %v481_v11 = vld [vmem:[%s1478_s6 + $0x78] sm:$0xff]  ;;  %v820_v16 = vld [vmem:[%s1477_s5] ss:$0 sm:$0xff]  ;;  %v600_v22 = vld [vmem:[%s1482_s10 + $0x10] sm:$0xff] }
  0x11   :  { %v1064_v12 = vpack.c.bf16 %v481_v11, %v480_v10  ;;  %v598_v19 = vld [vmem:[%s1482_s10] sm:$0xff]  ;;  %v603_v25 = vld [vmem:[%s1482_s10 + $0x28] sm:$0xff]  ;;  %v604_v27 = vld [vmem:[%s1482_s10 + $0x30] sm:$0xff] }
  0x12   :  { %1026 = vmatpush3.bf16.msra.mxu1 %v1025_v14  ;;  %v602_v24 = vld [vmem:[%s1482_s10 + $0x20] sm:$0xff]  ;;  %v605_v28 = vld [vmem:[%s1482_s10 + $0x38] sm:$0xff] }
  0x13   :  { %1027 = vmatprep.subr.bf16.mxu1 %v1132_v8  ;;  %v606_v30 = vld [vmem:[%s1482_s10 + $0x40] sm:$0xff]  ;;  %v609_v36 = vld [vmem:[%s1482_s10 + $0x58] sm:$0xff] }
  0x14   :  { %v822_v6 = vld [vmem:[%s1480_s8] ss:$0 sm:$0xff]  ;;  %s1135_s8 = smov [#allocation3]  }
  0x16   :  { %1029 = vmatpush3.bf16.msra.mxu1 %v1028_v17 }
  0x17   :  { %1030 = vmatprep.subr.bf16.mxu1 %v1132_v8 }
  0x1a   :  { %1032 = vmatpush3.bf16.msra.mxu1 %v1031_v20  ;;  %v599_v20 = vld [vmem:[%s1482_s10 + $0x8] sm:$0xff] }
  0x1b   :  { %1033 = vmatprep.subr.bf16.mxu1 %v1132_v8  ;;  %v1067_v21 = vpack.c.bf16 %v599_v20, %v598_v19 }
  0x1e   :  { %1035 = vmatpush3.bf16.msra.mxu1 %v1034_v23 }
  0x1f   :  { %1036 = vmatprep.subr.bf16.mxu1 %v1132_v8 }
  0x22   :  { %1038 = vmatpush3.bf16.msra.mxu1 %v1037_v26  ;;  %v1073_v26 = vpack.c.bf16 %v603_v25, %v602_v24 }
  0x23   :  { %1039 = vmatprep.subr.bf16.mxu1 %v1132_v8 }
  0x26   :  { %1041 = vmatpush3.bf16.msra.mxu1 %v1040_v29  ;;  %v1076_v29 = vpack.c.bf16 %v605_v28, %v604_v27 }
  0x27   :  { %1066 = vmatprep.subr.bf16.mxu1 %v1132_v8 }
  0x85   :  { %v54_v32 = vpop.permute.xlu0 %53 }
  0x86   :  { %vm55_vm2 = vcmp.eq.s32.totalorder %v1283_v31, %v54_v32  ;;  %v607_v32 = vld [vmem:[%s1482_s10 + $0x48] sm:$0xff] }
  0x87   :  { %v811_v34 = vsel %vm55_vm2, 1.0, %v1130_v3 }
  0x88   :  { %891 = vmatmul.mubr.msk.f32.vlgmr.msra.gmra.mrb[0].mxu0 %vm67_vm1, %v811_v34 }
  0x89   :  { %894 = vmatpush3.msra.mxu0 %v141_v33  ;;  %895 = vmatprep.mubr.msk.f32.mxu0 %vm1131_vm0, %v1130_v3  ;;  %v1079_v33 = vpack.c.bf16 %v607_v32, %v606_v30 }
  0x8a   :  { %898 = vmatprep.subr.mxu0 %v1130_v3 }
  0x8c   :  { %896 = vmatmul.mubr.msk.f32.vlgmr.msra.gmra.mrb[2].mxu0 %vm67_vm1, %v811_v34  ;;  %v608_v34 = vld [vmem:[%s1482_s10 + $0x50] sm:$0xff] }
  0x8d   :  { %900 = vmatprep.mubr.msk.f32.mxu0 %vm1131_vm0, %v1130_v3  ;;  %899 = vmatpush3.msk.msra.mxu0 %vm63_vm3, %v1133_v37  ;;  %v1082_v37 = vpack.c.bf16 %v609_v36, %v608_v34 }
  0x8e   :  { %938 = vmatprep.subr.mxu0 %v1130_v3 }
 0x15b   :  { %v137_v38 = vpop.f32.mrb[0].mxu0 }
 0x15c   :  { %v892_v39 = vpop.f32.mrb[1].mxu0  ;;  %936 = vmatmul.mubr.f32.vlgmr.msra.gmra.mrb[0].mxu1 %v137_v38  ;;  %v610_v38 = vld [vmem:[%s1482_s10 + $0x60] sm:$0xff] }
 0x15d   :  { %1010 = vmatprep.mubr.msk.f32.mxu1 %vm1131_vm0, %v1130_v3  ;;  %1068 = vmatpush3.bf16.msra.mxu1 %v1067_v21  ;;  %v611_v39 = vld [vmem:[%s1482_s10 + $0x68] sm:$0xff] }
 0x15e   :  { %1069 = vmatprep.subr.bf16.mxu1 %v1132_v8 }
 0x15f   :  { %v208_v40 = vpop.f32.mrb[2].mxu0 }
 0x160   :  { %v897_v41 = vpop.f32.mrb[3].mxu0  ;;  %901 = vmatmul.mubr.msk.f32.vlgmr.msra.gmra.mrb[4].mxu0 %vm67_vm1, %v208_v40  ;;  %v1085_v40 = vpack.c.bf16 %v611_v39, %v610_v38 }
 0x161   :  { %940 = vmatprep.mubr.msk.f32.mxu0 %vm1131_vm0, %v1130_v3  ;;  %v612_v41 = vld [vmem:[%s1482_s10 + $0x70] sm:$0xff] }
 0x22f   :  { %v374_v42 = vpop.f32.mrb[0].mxu1 }
 0x230   :  { %v937_v43 = vpop.f32.mrb[1].mxu1 }
 0x233   :  { %v1309_v44 = vpop.f32.mrb[4].mxu0 }
 0x234   :  { %v902_v45 = vpop.f32.mrb[5].mxu0  ;;  %v287_v46 = vsel %vm285_vm4, %v1309_v44, 0.0  ;;  %286 = vst.msk [vmem:[#allocation3] sm:$0xf] %vm285_vm4, %v1309_v44 }
 0x235   :  { %288 = vadd.xlane.f32.xlu0 %v287_v46  ;;  %v821_v45 = vld [vmem:[%s1479_s7] ss:$0 sm:$0xff] }
 0x2c2   :  { %v289_v47 = vpop.xlane.xlu0 %288 }
 0x2c3   :  { %v290_v48 = vadd.f32 1.0, %v289_v47 }
 0x2c5   :  { %1099 = vrsqrt.f32 %v290_v48 }
 0x2cf   :  { %v1100_v51 = vpop.eup %1099 }
 0x2d0   :  { %v378_v52 = vmul.f32 %v1100_v51, %v374_v42  ;;  %v613_v42 = vld [vmem:[%s1482_s10 + $0x78] sm:$0xff] }
 0x2d1   :  { %v1088_v43 = vpack.c.bf16 %v613_v42, %v612_v41 }
 0x2d2   :  { %939 = vmatpush3.msk.msra.mxu0 %vm383_vm5, %v378_v52 }
 0x2d3   :  { %941 = vmatmul.mubr.msk.f32.vlgmr.msra.gmra.mrb[6].mxu0 %vm379_vm6, %v1309_v44  ;;  %1042 = vmatprep.subr.bf16.mxu0 %v1132_v8 }
 0x2d4   :  { %1044 = vmatpush3.bf16.msra.mxu0 %v1043_v53  ;;  %975 = vmatprep.mubr.msk.f32.mxu0 %vm1131_vm0, %v1130_v3 }
 0x2d5   :  { %1045 = vmatprep.subr.bf16.mxu0 %v1132_v8 }
 0x2d8   :  { %1047 = vmatpush3.bf16.msra.mxu0 %v1046_v56 }
 0x2d9   :  { %1048 = vmatprep.subr.bf16.mxu0 %v1132_v8 }
 0x2dc   :  { %1050 = vmatpush3.bf16.msra.mxu0 %v1049_v59 }
 0x2dd   :  { %1051 = vmatprep.subr.bf16.mxu0 %v1132_v8 }
 0x2e0   :  { %1053 = vmatpush3.bf16.msra.mxu0 %v1052_v62 }
 0x2e1   :  { %1054 = vmatprep.subr.bf16.mxu0 %v1132_v8 }
 0x2e4   :  { %1056 = vmatpush3.bf16.msra.mxu0 %v1055_v1 }
 0x2e5   :  { %1057 = vmatprep.subr.bf16.mxu0 %v1132_v8 }
 0x2e8   :  { %1059 = vmatpush3.bf16.msra.mxu0 %v1058_v5 }
 0x2e9   :  { %1060 = vmatprep.subr.bf16.mxu0 %v1132_v8 }
 0x2ec   :  { %1062 = vmatpush3.bf16.msra.mxu0 %v1061_v9  ;;  %v823_v9 = vld [vmem:[%s1481_s9] ss:$0 sm:$0xff]  ;;  %s799_s9 = sshll.u32 %s1135_s8, 4  ;;  %s800_s9 = int_to_ptr.vmem [resolvable:$true] %s799_s9 }
 0x2ed   :  { %1063 = vmatprep.subr.bf16.mxu0 %v1132_v8  ;;  %s1105_s2 = scalar_lea.vmem %s800_s9, 64  ;;  %p1110_p1 = scmp.lt.s32.totalorder %s800_s9, %s800_s9 }
 0x2ee   :  { %p1106_p0 = scmp.ne.s32.totalorder %s800_s9, %s1105_s2  ;;  %p1111_p2 = scmp.lt.s32.totalorder %s1105_s2, %s1105_s2 }
 0x2f0   :  { %1065 = vmatpush3.bf16.msra.mxu0 %v1064_v12  ;;  %p1112_p3 = por %p1111_p2, %p1110_p1 }
 0x2f1   :  { %1013 = vmatprep.subr.mxu0 %v1130_v3 }
 0x2f2   :  { %p1113_p4 = pnand %p1112_p3, %p1106_p0 }
 0x3a6   :  { %v453_v13 = vpop.f32.mrb[6].mxu0 }
 0x3a7   :  { %v454_v14 = vadd.f32 %v453_v13, %v378_v52  ;;  %v942_v15 = vpop.f32.mrb[7].mxu0 }
 0x3a9   :  { %v457_v17 = vmul.f32 %v1100_v51, %v454_v14 }
 0x3ab   :  { %v465_v18 = vadd.f32 %v820_v16, %v457_v17  ;;  %v826_v16 = vld [vmem:[#allocation2] ss:$0 sm:$0xff] }
 0x3ad   :  { %976 = vmatmul.mubr.f32.vlgmr.msra.gmra.mrb[8].mxu0 %v465_v18 }
 0x3ae   :  { %1015 = vmatprep.mubr.msk.f32.mxu0 %vm1131_vm0, %v1130_v3  ;;  %v601_v3 = vld [vmem:[%s1482_s10 + $0x18] sm:$0xff] }
 0x3af   :  { %v1070_v23 = vpack.c.bf16 %v601_v3, %v600_v22 }
 0x3b1   :  { %1071 = vmatpush3.bf16.msra.mxu1 %v1070_v23 }
 0x3b2   :  { %1072 = vmatprep.subr.bf16.mxu1 %v1132_v8 }
 0x3b5   :  { %1074 = vmatpush3.bf16.msra.mxu1 %v1073_v26 }
 0x3b6   :  { %1075 = vmatprep.subr.bf16.mxu1 %v1132_v8 }
 0x3b9   :  { %1077 = vmatpush3.bf16.msra.mxu1 %v1076_v29 }
 0x3ba   :  { %1078 = vmatprep.subr.bf16.mxu1 %v1132_v8 }
 0x3bd   :  { %1080 = vmatpush3.bf16.msra.mxu1 %v1079_v33 }
 0x3be   :  { %1081 = vmatprep.subr.bf16.mxu1 %v1132_v8 }
 0x3c1   :  { %1083 = vmatpush3.bf16.msra.mxu1 %v1082_v37 }
 0x3c2   :  { %1084 = vmatprep.subr.bf16.mxu1 %v1132_v8 }
 0x3c5   :  { %1086 = vmatpush3.bf16.msra.mxu1 %v1085_v40 }
 0x3c6   :  { %1087 = vmatprep.subr.bf16.mxu1 %v1132_v8 }
 0x3c9   :  { %1089 = vmatpush3.bf16.msra.mxu1 %v1088_v43 }
 0x480   :  { %v555_v46 = vpop.f32.mrb[8].mxu0 }
 0x481   :  { %v556_v47 = vadd.f32 %v821_v45, %v555_v46  ;;  %v977_v48 = vpop.f32.mrb[9].mxu0 }
 0x483   :  { %v559_v49 = vmax.f32 %v556_v47, 0.0 }
 0x485   :  { %v560_v8 = vsel %vm383_vm5, %v559_v49, 0.0 }
 0x486   :  { %v561_v50 = vrot.slane %v560_v8, 4 }
 0x488   :  { %v562_v51 = vadd.f32 %v561_v50, %v560_v8 }
 0x48a   :  { %v563_v52 = vrot.slane %v562_v51, 2 }
 0x48c   :  { %v564_v53 = vadd.f32 %v563_v52, %v562_v51 }
 0x48e   :  { %v565_v54 = vrot.slane %v564_v53, 1 }
 0x490   :  { %v566_v55 = vadd.f32 %v565_v54, %v564_v53 }
 0x492   :  { %v568_v56 = vmul.f32 0.25, %v566_v55 }
 0x494   :  { %v569_v57 = vsub.f32 %v559_v49, %v568_v56 }
 0x496   :  { %v570_v58 = vmul.f32 %v569_v57, %v569_v57 }
 0x498   :  { %v571_v59 = vsel %vm383_vm5, %v570_v58, 0.0 }
 0x499   :  { %v572_v60 = vrot.slane %v571_v59, 4 }
 0x49b   :  { %v573_v61 = vadd.f32 %v572_v60, %v571_v59 }
 0x49d   :  { %v574_v62 = vrot.slane %v573_v61, 2 }
 0x49f   :  { %v575_v63 = vadd.f32 %v574_v62, %v573_v61 }
 0x4a1   :  { %v576_v0 = vrot.slane %v575_v63, 1 }
 0x4a3   :  { %v577_v1 = vadd.f32 %v576_v0, %v575_v63 }
 0x4a5   :  { %v578_v2 = vmul.f32 0.25, %v577_v1 }
 0x4a7   :  { %v579_v4 = vadd.f32 1e-05, %v578_v2 }
 0x4a9   :  { %1101 = vrsqrt.f32 %v579_v4 }
 0x4b3   :  { %v1102_v5 = vpop.eup %1101 }
 0x4b4   :  { %v581_v7 = vmul.f32 %v1102_v5, %v569_v57 }
 0x4b6   :  { %v589_v10 = vmul.f32 %v822_v6, %v581_v7 }
 0x4b8   :  { %v597_v11 = vadd.f32 %v823_v9, %v589_v10 }
 0x4ba   :  { %1011 = vmatmul.mubr.f32.vlgmr.msra.gmra.mrb[2].mxu1 %v597_v11 }
 0x58d   :  { %v680_v12 = vpop.f32.mrb[2].mxu1 }
 0x58e   :  { %v1012_v13 = vpop.f32.mrb[3].mxu1  ;;  %1014 = vmatpush3.msk.msra.mxu0 %vm383_vm5, %v680_v12 }
 0x58f   :  { %1016 = vmatmul.mubr.msk.f32.vlgmr.msra.gmra.mrb[10].mxu0 %vm379_vm6, %v1309_v44 }
 0x662   :  { %v753_v14 = vpop.f32.mrb[10].mxu0 }
 0x663   :  { %758 = vrot.lane.b32.xlu1 %v753_v14, %s1134_s1  ;;  %v1017_v15 = vpop.f32.mrb[11].mxu0 }
 0x6d5   :  { %v759_v17 = vpop.permute.xlu1 %758 }
 0x6d6   :  { %v761_v18 = vadd.f32 %v759_v17, %v680_v12 }
 0x6d8   :  { %v769_v19 = vadd.f32 %v826_v16, %v761_v18 }
 0x6da   :  { %1103 = vtanh.f32 %v769_v19 }
 0x6e4   :  { %v1104_v20 = vpop.eup %1103 }
 0x6e5   :  { %773 = vperm.xlu1 %1098, %v1104_v20  }
 0x6e6   :  { %1116 = shalt.err (!%p1113_p4)
}
 0x6e7   :  { %s1117_s18 = scalar_lea.hbm %s1486_s14, 64 }
 0x6e8   :  { %p1118_p5 = scmp.ne.s32.totalorder %s1486_s14, %s1117_s18  ;;  %p1121_p6 = scmp.lt.u32.totalorder %s1117_s18, %s1486_s14 }
 0x6ea   :  { %p1123_p7 = pnand %p1121_p6, %p1118_p5 }
 0x6ec   :  { %1126 = shalt.err (!%p1123_p7)
}
 0x6ed   :  { %802 = dma.vmem_to_hbm [thread:$0]  %s800_s9, 64, %s1486_s14, [#allocation4]   ;;  %vm778_vm7 = vcmp.eq.s32.totalorder %v1297_v35, %v1283_v31  ;;  %vm787_vm8 = vcmask 24576  }
 0x764   :  { %v774_v44 = vpop.permute.xlu1 %773 }
 0x765   :  { %v776_v21 = vmul.f32 %v774_v44, %v597_v11  ;;  %v779_v22 = vsel %vm778_vm7, %v774_v44, 0.0 }
 0x766   :  { %v780_v3 = vsel %vm285_vm4, %v779_v22, 0.0 }
 0x767   :  { %777 = vst [vmem:[%s1484_s12] sm:$0xf] %v776_v21  ;;  %v781_v23 = vrot.slane %v780_v3, 4 }
 0x769   :  { %v782_v24 = vadd.f32 %v781_v23, %v780_v3 }
 0x76b   :  { %v783_v25 = vrot.slane %v782_v24, 2 }
 0x76d   :  { %v784_v26 = vadd.f32 %v783_v25, %v782_v24 }
 0x76f   :  { %v785_v27 = vrot.slane %v784_v26, 1 }
 0x771   :  { %v786_v28 = vadd.f32 %v785_v27, %v784_v26 }
 0x773   :  { %788 = vst.msk [vmem:[%s1485_s13] sm:$0x1] %vm787_vm8, %v786_v28 }
 0x774   :  { %1127 = dma.done.wait [#allocation4], 64  }
 0x775   :  { %1128 = vsyncadd [#allocation4], 4294967232 }
 0x776   :  { %810 = vsyncpa [#allocation4], 1 }

</bundles_post_ra>
